<compile_context>
chip_gen: v7x
topology: tpu7x:2x2x1
jax: 0.10.0
libtpu: 0.0.40
codegen_flags: <defaults>
</compile_context>

<pallas_src>
import numpy as np
import jax
import jax.numpy as jnp
from jax.experimental import pallas as pl
from jax.experimental.pallas import tpu as pltpu


# ----------------------------- schedule / buffers (glue, plain numpy) -----------------------

def cosine_beta_schedule(timesteps, s=0.008):
    steps = timesteps + 1
    x = np.linspace(0, steps, steps)
    alphas_cumprod = np.cos(((x / steps) + s) / (1 + s) * np.pi * 0.5) ** 2
    alphas_cumprod = alphas_cumprod / alphas_cumprod[0]
    betas = 1.0 - (alphas_cumprod[1:] / alphas_cumprod[:-1])
    return np.clip(betas, 0.0, 0.999).astype(np.float32)


def make_diffusion_buffers(n_timesteps):
    betas = cosine_beta_schedule(n_timesteps).astype(np.float64)
    alphas = 1.0 - betas
    alphas_cumprod = np.cumprod(alphas)
    alphas_cumprod_prev = np.concatenate([np.ones(1), alphas_cumprod[:-1]])
    posterior_variance = betas * (1.0 - alphas_cumprod_prev) / (1.0 - alphas_cumprod)
    posterior_log_variance_clipped = np.log(np.clip(posterior_variance, 1e-20, None))
    posterior_mean_coef1 = betas * np.sqrt(alphas_cumprod_prev) / (1.0 - alphas_cumprod)
    posterior_mean_coef2 = (1.0 - alphas_cumprod_prev) * np.sqrt(alphas) / (1.0 - alphas_cumprod)
    return dict(
        posterior_mean_coef1=posterior_mean_coef1.astype(np.float32),
        posterior_mean_coef2=posterior_mean_coef2.astype(np.float32),
        posterior_log_variance_clipped=posterior_log_variance_clipped.astype(np.float32),
    )


# ----------------------------- Pallas kernel: full reverse-diffusion loop -------------------

def diffusion_sample_kernel(coef_ref, x_ref, noise_ref, temb_ref, keep_ref, cval_ref,
                            w1_ref, w2_ref, b2_ref, out_ref):
    # coef_ref  : SMEM (3*T,) f32        [c1_i, c2_i, sigma_i] per loop step i (t = T-1-i)
    # x_ref     : VMEM (N, Dp) f32       initial noise sample (lane-padded)
    # noise_ref : VMEM (T-1, N, Dp) f32  pre-generated per-step Gaussian noise (t=0 step needs none)
    # temb_ref  : VMEM (T, 1, Hp) f32    per-step time embedding (b1 folded in, lane-padded)
    # keep_ref  : VMEM (N, Dp) f32       condition-projection keep mask (0 on padded lanes)
    # cval_ref  : VMEM (N, Dp) f32       condition-projection values
    # w1_ref    : VMEM (Dp, Hp) bf16     denoiser MLP weights (padded rows/cols are zero)
    # w2_ref    : VMEM (Hp, Dp) bf16
    # b2_ref    : VMEM (1, Dp) f32
    keep = keep_ref[...]
    cval = cval_ref[...]
    w1 = w1_ref[...]            # bf16; small -> fine to hold resident
    w2 = w2_ref[...]            # bf16

    N, Dp = x_ref.shape
    n_steps = temb_ref.shape[0]

    # Hoist the b2 broadcast out of the unrolled loop (broadcast_in_dim is not CSE'd by JAX).
    b2_b = jnp.broadcast_to(b2_ref[...], (N, Dp))

    # initial condition projection: x = condition_projection(randn * ratio, cond, ...)
    x = x_ref[...] * keep + cval

    # Fully unrolled reverse-diffusion loop (T is static and small).  Unrolling lets the
    # scheduler overlap MXU / EUP / VALU work across steps; all SMEM / temb / noise indices
    # are compile-time constants.
    for i in range(n_steps):
        temb = temb_ref[i]                 # (1, Hp), includes b1
        c1 = coef_ref[3 * i]               # posterior_mean_coef1[t]
        c2 = coef_ref[3 * i + 1]           # posterior_mean_coef2[t]
        sigma = coef_ref[3 * i + 2]        # nonzero_mask * exp(0.5*log_var_clipped) * ratio

        # denoiser model(x, t, cond): 2-layer MLP on the feature dim (bf16 MXU, f32 accumulate)
        h = jnp.tanh(
            jnp.dot(x.astype(jnp.bfloat16), w1, preferred_element_type=jnp.float32) + temb)
        x_recon = jnp.dot(h.astype(jnp.bfloat16), w2,
                          preferred_element_type=jnp.float32) + b2_b

        # q_posterior mean + p_sample update (kept in f32)
        model_mean = c1 * x_recon + c2 * x
        if i < n_steps - 1:
            # noise was pre-generated in the wrapper -> off the serial matmul->tanh->matmul chain
            x_new = model_mean + sigma * noise_ref[i]
        else:
            # last step: t = 0, nonzero_mask = 0 -> sigma = 0, skip the noise FMA statically
            x_new = model_mean

        # condition_projection
        x = x_new * keep + cval

    out_ref[...] = x


def run_p_sample_loop(coef, x_init, noise, temb, keep, cval, w1, w2, b2):
    N, Dp = x_init.shape
    smem = pl.BlockSpec(memory_space=pltpu.MemorySpace.SMEM)
    vmem = pl.BlockSpec(memory_space=pltpu.MemorySpace.VMEM)
    # Grid-less (whole arrays resident in VMEM): all buffers total well under 1 MiB at demo size.
    # TODO(synk): for production N (hundreds+ rows), add a "parallel" grid over row blocks so
    #             v7x's two TensorCores and the MXU M-dimension are filled.
    return pl.pallas_call(
        diffusion_sample_kernel,
        out_shape=jax.ShapeDtypeStruct((N, Dp), jnp.float32),
        in_specs=[smem, vmem, vmem, vmem, vmem, vmem, vmem, vmem, vmem],
        out_specs=vmem,
        compiler_params=pltpu.CompilerParams(vmem_limit_bytes=32 * 1024 * 1024),
    )(coef, x_init, noise, temb, keep, cval, w1, w2, b2)


# ----------------------------- GaussianDiffusion wrapper (glue) -----------------------------

class GaussianDiffusionPallas:
    def __init__(self, horizon, observation_dim, action_dim, horizon_dim, class_dim,
                 n_timesteps=20, hidden=64, seed=0):
        self.horizon = horizon
        self.observation_dim = observation_dim
        self.action_dim = action_dim
        self.horizon_dim = horizon_dim
        self.class_dim = class_dim
        self.n_timesteps = n_timesteps
        self.random_ratio = 1.0
        self.hidden = hidden
        self.D = class_dim + action_dim + observation_dim + horizon_dim
        # lane-pad feature and hidden dims to multiples of 128 for unmasked vreg ops / stores
        self.Dp = ((self.D + 127) // 128) * 128
        self.Hp = ((hidden + 127) // 128) * 128

        bufs = make_diffusion_buffers(n_timesteps)
        self.pmc1 = jnp.asarray(bufs["posterior_mean_coef1"])
        self.pmc2 = jnp.asarray(bufs["posterior_mean_coef2"])
        self.plvc = jnp.asarray(bufs["posterior_log_variance_clipped"])

        # deterministic synthetic denoiser weights (zero-padded to Dp/Hp; matmul operands bf16)
        key = jax.random.PRNGKey(seed)
        k1, k2, k3 = jax.random.split(key, 3)
        w1 = jax.random.normal(k1, (self.D, hidden), jnp.float32) / np.sqrt(self.D)
        w2 = jax.random.normal(k2, (hidden, self.D), jnp.float32) / np.sqrt(hidden)
        self.w1 = jnp.zeros((self.Dp, self.Hp), jnp.bfloat16).at[: self.D, : hidden].set(
            w1.astype(jnp.bfloat16))
        self.w2 = jnp.zeros((self.Hp, self.Dp), jnp.bfloat16).at[: hidden, : self.D].set(
            w2.astype(jnp.bfloat16))
        self.b1 = jnp.zeros((1, hidden), jnp.float32)
        self.b2 = jnp.zeros((1, self.Dp), jnp.float32)
        self.wt = (jax.random.normal(k3, (hidden, hidden), jnp.float32)
                   / np.sqrt(hidden)).astype(jnp.float32)

    def _time_embedding(self, t_idx):
        # sinusoidal embedding + linear projection (per loop step), computed in glue
        half = self.hidden // 2
        freqs = jnp.exp(-jnp.log(10000.0) * jnp.arange(half, dtype=jnp.float32) / half)
        args = t_idx[:, None].astype(jnp.float32) * freqs[None, :]
        emb = jnp.concatenate([jnp.sin(args), jnp.cos(args)], axis=-1)   # (T, hidden)
        return jnp.tanh(emb @ self.wt)                                    # (T, hidden)

    def forward(self, cond, length, if_jump=False, key=None):
        # TODO(synk): ddim (if_jump=True) path not implemented; forward default uses if_jump=False.
        assert not if_jump
        B = cond[0].shape[0]
        H = length
        D, Dp, Hp = self.D, self.Dp, self.Hp
        N = B * H
        T = self.n_timesteps
        if key is None:
            key = jax.random.PRNGKey(1)
        kx, kn = jax.random.split(key)

        # initial sample (x = randn * random_ratio); padded lanes zero
        x_init = jnp.zeros((B, H, Dp), jnp.float32).at[:, :, :D].set(
            jax.random.normal(kx, (B, H, D), jnp.float32) * self.random_ratio)

        # per-step Gaussian noise, pre-generated for all but the final (t=0, sigma=0) step;
        # random_ratio is folded into sigma below (matching p_sample: randn * random_ratio).
        n_noise = max(T - 1, 1)
        noise = jax.random.normal(kn, (n_noise, N, Dp), jnp.float32)

        # condition projection as x*keep + cval: observation channels of the conditioned frames
        # (0 and H-1) are pinned to the conditions every step; everything else passes through.
        # Padded lanes have keep=0, cval=0.
        obs_start = self.class_dim + self.horizon_dim + self.action_dim
        keep = jnp.zeros((B, H, Dp), jnp.float32).at[:, :, :D].set(1.0)
        keep = keep.at[:, 0, obs_start:obs_start + self.observation_dim].set(0.0)
        keep = keep.at[:, H - 1, obs_start:obs_start + self.observation_dim].set(0.0)
        cval = jnp.zeros((B, H, Dp), jnp.float32)
        cval = cval.at[:, 0, obs_start:obs_start + self.observation_dim].set(cond[0])
        cval = cval.at[:, H - 1, obs_start:obs_start + self.observation_dim].set(cond[H - 1])

        # per-loop-step (i = 0..T-1, t = T-1-i) scalar coefficients (flat 1-D SMEM table)
        ts = jnp.arange(T - 1, -1, -1, dtype=jnp.int32)
        sigma = (ts != 0).astype(jnp.float32) * jnp.exp(0.5 * self.plvc[ts]) * self.random_ratio
        coef = jnp.stack([self.pmc1[ts], self.pmc2[ts], sigma], axis=-1).reshape(-1)  # (3*T,)

        # time embeddings with b1 folded in, lane-padded to Hp
        temb = jnp.zeros((T, 1, Hp), jnp.float32).at[:, 0, : self.hidden].set(
            self._time_embedding(ts) + self.b1)

        out = run_p_sample_loop(
            coef,
            x_init.reshape(N, Dp),
            noise,
            temb,
            keep.reshape(N, Dp),
            cval.reshape(N, Dp),
            self.w1, self.w2, self.b2,
        )
        return out.reshape(B, H, Dp)[:, :, :D]


# ----------------------------- demo ----------------------------------------------------------

if __name__ == "__main__":
    batch = 2
    horizon = 8
    class_dim = 6
    action_dim = 10
    observation_dim = 32
    horizon_dim = 8
    n_timesteps = 20

    diffusion = GaussianDiffusionPallas(
        horizon=horizon,
        observation_dim=observation_dim,
        action_dim=action_dim,
        horizon_dim=horizon_dim,
        class_dim=class_dim,
        n_timesteps=n_timesteps,
        hidden=64,
        seed=0,
    )

    key = jax.random.PRNGKey(0)
    k0, k1, k2 = jax.random.split(key, 3)
    cond = {
        0: jax.random.normal(k0, (batch, observation_dim), jnp.float32),
        horizon - 1: jax.random.normal(k1, (batch, observation_dim), jnp.float32),
    }

    out = diffusion.forward(cond, length=horizon, if_jump=False, key=k2)
    out = jax.block_until_ready(out)
    assert out.shape == (batch, horizon, class_dim + action_dim + observation_dim + horizon_dim)
    assert bool(jnp.all(jnp.isfinite(out)))
    print("KERNEL_OK")
</pallas_src>

<mosaic_0001>
module attributes {stable_mosaic.version = 11 : i64} {
  func.func @diffusion_sample_kernel(%arg0: memref<60xf32, #tpu.memory_space<smem>>, %arg1: memref<16x128xf32, #tpu.memory_space<vmem>>, %arg2: memref<19x16x128xf32, #tpu.memory_space<vmem>>, %arg3: memref<20x1x128xf32, #tpu.memory_space<vmem>>, %arg4: memref<16x128xf32, #tpu.memory_space<vmem>>, %arg5: memref<16x128xf32, #tpu.memory_space<vmem>>, %arg6: memref<128x128xbf16, #tpu.memory_space<vmem>>, %arg7: memref<128x128xbf16, #tpu.memory_space<vmem>>, %arg8: memref<1x128xf32, #tpu.memory_space<vmem>>, %arg9: memref<16x128xf32, #tpu.memory_space<vmem>>) attributes {dimension_semantics = [], scalar_prefetch = 0 : i64, scratch_operands = 0 : i64, tpu.core_type = #tpu.core_type<tc>} {
    %c0 = arith.constant 0 : index
    %c0_0 = arith.constant 0 : index
    %0 = vector.load %arg4[%c0, %c0_0] : memref<16x128xf32, #tpu.memory_space<vmem>>, vector<16x128xf32>
    %c0_1 = arith.constant 0 : index
    %c0_2 = arith.constant 0 : index
    %1 = vector.load %arg5[%c0_1, %c0_2] : memref<16x128xf32, #tpu.memory_space<vmem>>, vector<16x128xf32>
    %c0_3 = arith.constant 0 : index
    %c0_4 = arith.constant 0 : index
    %2 = vector.load %arg6[%c0_3, %c0_4] : memref<128x128xbf16, #tpu.memory_space<vmem>>, vector<128x128xbf16>
    %c0_5 = arith.constant 0 : index
    %c0_6 = arith.constant 0 : index
    %3 = vector.load %arg7[%c0_5, %c0_6] : memref<128x128xbf16, #tpu.memory_space<vmem>>, vector<128x128xbf16>
    %c0_7 = arith.constant 0 : index
    %c0_8 = arith.constant 0 : index
    %4 = vector.load %arg8[%c0_7, %c0_8] : memref<1x128xf32, #tpu.memory_space<vmem>>, vector<1x128xf32>
    %5 = vector.shape_cast %4 : vector<1x128xf32> to vector<1x128xf32>
    %6 = vector.broadcast %5 : vector<1x128xf32> to vector<16x128xf32>
    %c0_9 = arith.constant 0 : index
    %c0_10 = arith.constant 0 : index
    %7 = vector.load %arg1[%c0_9, %c0_10] : memref<16x128xf32, #tpu.memory_space<vmem>>, vector<16x128xf32>
    %8 = arith.mulf %7, %0 : vector<16x128xf32>
    %9 = arith.addf %8, %1 : vector<16x128xf32>
    %c0_11 = arith.constant 0 : index
    %c0_12 = arith.constant 0 : index
    %c0_13 = arith.constant 0 : index
    %10 = vector.load %arg3[%c0_11, %c0_12, %c0_13] : memref<20x1x128xf32, #tpu.memory_space<vmem>>, vector<1x1x128xf32>
    %11 = vector.shape_cast %10 : vector<1x1x128xf32> to vector<1x128xf32>
    %c0_14 = arith.constant 0 : index
    %12 = memref.load %arg0[%c0_14] : memref<60xf32, #tpu.memory_space<smem>>
    %c1 = arith.constant 1 : index
    %13 = memref.load %arg0[%c1] : memref<60xf32, #tpu.memory_space<smem>>
    %c2 = arith.constant 2 : index
    %14 = memref.load %arg0[%c2] : memref<60xf32, #tpu.memory_space<smem>>
    %15 = arith.truncf %9 : vector<16x128xf32> to vector<16x128xbf16>
    %cst = arith.constant dense<0.000000e+00> : vector<16x128xf32>
    %16 = tpu.matmul %15, %2, %cst {dimension_numbers = #tpu.dot_dimension_numbers<[1], [0], [0], [1], [0, 0, 1, 1], [], []>} : vector<16x128xbf16>, vector<128x128xbf16>, vector<16x128xf32> -> vector<16x128xf32>
    %17 = vector.broadcast %11 : vector<1x128xf32> to vector<16x128xf32>
    %18 = arith.addf %16, %17 : vector<16x128xf32>
    %19 = math.tanh %18 : vector<16x128xf32>
    %20 = arith.truncf %19 : vector<16x128xf32> to vector<16x128xbf16>
    %cst_15 = arith.constant dense<0.000000e+00> : vector<16x128xf32>
    %21 = tpu.matmul %20, %3, %cst_15 {dimension_numbers = #tpu.dot_dimension_numbers<[1], [0], [0], [1], [0, 0, 1, 1], [], []>} : vector<16x128xbf16>, vector<128x128xbf16>, vector<16x128xf32> -> vector<16x128xf32>
    %22 = arith.addf %21, %6 : vector<16x128xf32>
    %23 = vector.broadcast %12 : f32 to vector<16x128xf32>
    %24 = arith.mulf %23, %22 : vector<16x128xf32>
    %25 = vector.broadcast %13 : f32 to vector<16x128xf32>
    %26 = arith.mulf %25, %9 : vector<16x128xf32>
    %27 = arith.addf %24, %26 : vector<16x128xf32>
    %c0_16 = arith.constant 0 : index
    %c0_17 = arith.constant 0 : index
    %c0_18 = arith.constant 0 : index
    %28 = vector.load %arg2[%c0_16, %c0_17, %c0_18] : memref<19x16x128xf32, #tpu.memory_space<vmem>>, vector<1x16x128xf32>
    %29 = vector.shape_cast %28 : vector<1x16x128xf32> to vector<16x128xf32>
    %30 = vector.broadcast %14 : f32 to vector<16x128xf32>
    %31 = arith.mulf %30, %29 : vector<16x128xf32>
    %32 = arith.addf %27, %31 : vector<16x128xf32>
    %33 = arith.mulf %32, %0 : vector<16x128xf32>
    %34 = arith.addf %33, %1 : vector<16x128xf32>
    %c1_19 = arith.constant 1 : index
    %c0_20 = arith.constant 0 : index
    %c0_21 = arith.constant 0 : index
    %35 = vector.load %arg3[%c1_19, %c0_20, %c0_21] : memref<20x1x128xf32, #tpu.memory_space<vmem>>, vector<1x1x128xf32>
    %36 = vector.shape_cast %35 : vector<1x1x128xf32> to vector<1x128xf32>
    %c3 = arith.constant 3 : index
    %37 = memref.load %arg0[%c3] : memref<60xf32, #tpu.memory_space<smem>>
    %c4 = arith.constant 4 : index
    %38 = memref.load %arg0[%c4] : memref<60xf32, #tpu.memory_space<smem>>
    %c5 = arith.constant 5 : index
    %39 = memref.load %arg0[%c5] : memref<60xf32, #tpu.memory_space<smem>>
    %40 = arith.truncf %34 : vector<16x128xf32> to vector<16x128xbf16>
    %cst_22 = arith.constant dense<0.000000e+00> : vector<16x128xf32>
    %41 = tpu.matmul %40, %2, %cst_22 {dimension_numbers = #tpu.dot_dimension_numbers<[1], [0], [0], [1], [0, 0, 1, 1], [], []>} : vector<16x128xbf16>, vector<128x128xbf16>, vector<16x128xf32> -> vector<16x128xf32>
    %42 = vector.broadcast %36 : vector<1x128xf32> to vector<16x128xf32>
    %43 = arith.addf %41, %42 : vector<16x128xf32>
    %44 = math.tanh %43 : vector<16x128xf32>
    %45 = arith.truncf %44 : vector<16x128xf32> to vector<16x128xbf16>
    %cst_23 = arith.constant dense<0.000000e+00> : vector<16x128xf32>
    %46 = tpu.matmul %45, %3, %cst_23 {dimension_numbers = #tpu.dot_dimension_numbers<[1], [0], [0], [1], [0, 0, 1, 1], [], []>} : vector<16x128xbf16>, vector<128x128xbf16>, vector<16x128xf32> -> vector<16x128xf32>
    %47 = arith.addf %46, %6 : vector<16x128xf32>
    %48 = vector.broadcast %37 : f32 to vector<16x128xf32>
    %49 = arith.mulf %48, %47 : vector<16x128xf32>
    %50 = vector.broadcast %38 : f32 to vector<16x128xf32>
    %51 = arith.mulf %50, %34 : vector<16x128xf32>
    %52 = arith.addf %49, %51 : vector<16x128xf32>
    %c1_24 = arith.constant 1 : index
    %c0_25 = arith.constant 0 : index
    %c0_26 = arith.constant 0 : index
    %53 = vector.load %arg2[%c1_24, %c0_25, %c0_26] : memref<19x16x128xf32, #tpu.memory_space<vmem>>, vector<1x16x128xf32>
    %54 = vector.shape_cast %53 : vector<1x16x128xf32> to vector<16x128xf32>
    %55 = vector.broadcast %39 : f32 to vector<16x128xf32>
    %56 = arith.mulf %55, %54 : vector<16x128xf32>
    %57 = arith.addf %52, %56 : vector<16x128xf32>
    %58 = arith.mulf %57, %0 : vector<16x128xf32>
    %59 = arith.addf %58, %1 : vector<16x128xf32>
    %c2_27 = arith.constant 2 : index
    %c0_28 = arith.constant 0 : index
    %c0_29 = arith.constant 0 : index
    %60 = vector.load %arg3[%c2_27, %c0_28, %c0_29] : memref<20x1x128xf32, #tpu.memory_space<vmem>>, vector<1x1x128xf32>
    %61 = vector.shape_cast %60 : vector<1x1x128xf32> to vector<1x128xf32>
    %c6 = arith.constant 6 : index
    %62 = memref.load %arg0[%c6] : memref<60xf32, #tpu.memory_space<smem>>
    %c7 = arith.constant 7 : index
    %63 = memref.load %arg0[%c7] : memref<60xf32, #tpu.memory_space<smem>>
    %c8 = arith.constant 8 : index
    %64 = memref.load %arg0[%c8] : memref<60xf32, #tpu.memory_space<smem>>
    %65 = arith.truncf %59 : vector<16x128xf32> to vector<16x128xbf16>
    %cst_30 = arith.constant dense<0.000000e+00> : vector<16x128xf32>
    %66 = tpu.matmul %65, %2, %cst_30 {dimension_numbers = #tpu.dot_dimension_numbers<[1], [0], [0], [1], [0, 0, 1, 1], [], []>} : vector<16x128xbf16>, vector<128x128xbf16>, vector<16x128xf32> -> vector<16x128xf32>
    %67 = vector.broadcast %61 : vector<1x128xf32> to vector<16x128xf32>
    %68 = arith.addf %66, %67 : vector<16x128xf32>
    %69 = math.tanh %68 : vector<16x128xf32>
    %70 = arith.truncf %69 : vector<16x128xf32> to vector<16x128xbf16>
    %cst_31 = arith.constant dense<0.000000e+00> : vector<16x128xf32>
    %71 = tpu.matmul %70, %3, %cst_31 {dimension_numbers = #tpu.dot_dimension_numbers<[1], [0], [0], [1], [0, 0, 1, 1], [], []>} : vector<16x128xbf16>, vector<128x128xbf16>, vector<16x128xf32> -> vector<16x128xf32>
    %72 = arith.addf %71, %6 : vector<16x128xf32>
    %73 = vector.broadcast %62 : f32 to vector<16x128xf32>
    %74 = arith.mulf %73, %72 : vector<16x128xf32>
    %75 = vector.broadcast %63 : f32 to vector<16x128xf32>
    %76 = arith.mulf %75, %59 : vector<16x128xf32>
    %77 = arith.addf %74, %76 : vector<16x128xf32>
    %c2_32 = arith.constant 2 : index
    %c0_33 = arith.constant 0 : index
    %c0_34 = arith.constant 0 : index
    %78 = vector.load %arg2[%c2_32, %c0_33, %c0_34] : memref<19x16x128xf32, #tpu.memory_space<vmem>>, vector<1x16x128xf32>
    %79 = vector.shape_cast %78 : vector<1x16x128xf32> to vector<16x128xf32>
    %80 = vector.broadcast %64 : f32 to vector<16x128xf32>
    %81 = arith.mulf %80, %79 : vector<16x128xf32>
    %82 = arith.addf %77, %81 : vector<16x128xf32>
    %83 = arith.mulf %82, %0 : vector<16x128xf32>
    %84 = arith.addf %83, %1 : vector<16x128xf32>
    %c3_35 = arith.constant 3 : index
    %c0_36 = arith.constant 0 : index
    %c0_37 = arith.constant 0 : index
    %85 = vector.load %arg3[%c3_35, %c0_36, %c0_37] : memref<20x1x128xf32, #tpu.memory_space<vmem>>, vector<1x1x128xf32>
    %86 = vector.shape_cast %85 : vector<1x1x128xf32> to vector<1x128xf32>
    %c9 = arith.constant 9 : index
    %87 = memref.load %arg0[%c9] : memref<60xf32, #tpu.memory_space<smem>>
    %c10 = arith.constant 10 : index
    %88 = memref.load %arg0[%c10] : memref<60xf32, #tpu.memory_space<smem>>
    %c11 = arith.constant 11 : index
    %89 = memref.load %arg0[%c11] : memref<60xf32, #tpu.memory_space<smem>>
    %90 = arith.truncf %84 : vector<16x128xf32> to vector<16x128xbf16>
    %cst_38 = arith.constant dense<0.000000e+00> : vector<16x128xf32>
    %91 = tpu.matmul %90, %2, %cst_38 {dimension_numbers = #tpu.dot_dimension_numbers<[1], [0], [0], [1], [0, 0, 1, 1], [], []>} : vector<16x128xbf16>, vector<128x128xbf16>, vector<16x128xf32> -> vector<16x128xf32>
    %92 = vector.broadcast %86 : vector<1x128xf32> to vector<16x128xf32>
    %93 = arith.addf %91, %92 : vector<16x128xf32>
    %94 = math.tanh %93 : vector<16x128xf32>
    %95 = arith.truncf %94 : vector<16x128xf32> to vector<16x128xbf16>
    %cst_39 = arith.constant dense<0.000000e+00> : vector<16x128xf32>
    %96 = tpu.matmul %95, %3, %cst_39 {dimension_numbers = #tpu.dot_dimension_numbers<[1], [0], [0], [1], [0, 0, 1, 1], [], []>} : vector<16x128xbf16>, vector<128x128xbf16>, vector<16x128xf32> -> vector<16x128xf32>
    %97 = arith.addf %96, %6 : vector<16x128xf32>
    %98 = vector.broadcast %87 : f32 to vector<16x128xf32>
    %99 = arith.mulf %98, %97 : vector<16x128xf32>
    %100 = vector.broadcast %88 : f32 to vector<16x128xf32>
    %101 = arith.mulf %100, %84 : vector<16x128xf32>
    %102 = arith.addf %99, %101 : vector<16x128xf32>
    %c3_40 = arith.constant 3 : index
    %c0_41 = arith.constant 0 : index
    %c0_42 = arith.constant 0 : index
    %103 = vector.load %arg2[%c3_40, %c0_41, %c0_42] : memref<19x16x128xf32, #tpu.memory_space<vmem>>, vector<1x16x128xf32>
    %104 = vector.shape_cast %103 : vector<1x16x128xf32> to vector<16x128xf32>
    %105 = vector.broadcast %89 : f32 to vector<16x128xf32>
    %106 = arith.mulf %105, %104 : vector<16x128xf32>
    %107 = arith.addf %102, %106 : vector<16x128xf32>
    %108 = arith.mulf %107, %0 : vector<16x128xf32>
    %109 = arith.addf %108, %1 : vector<16x128xf32>
    %c4_43 = arith.constant 4 : index
    %c0_44 = arith.constant 0 : index
    %c0_45 = arith.constant 0 : index
    %110 = vector.load %arg3[%c4_43, %c0_44, %c0_45] : memref<20x1x128xf32, #tpu.memory_space<vmem>>, vector<1x1x128xf32>
    %111 = vector.shape_cast %110 : vector<1x1x128xf32> to vector<1x128xf32>
    %c12 = arith.constant 12 : index
    %112 = memref.load %arg0[%c12] : memref<60xf32, #tpu.memory_space<smem>>
    %c13 = arith.constant 13 : index
    %113 = memref.load %arg0[%c13] : memref<60xf32, #tpu.memory_space<smem>>
    %c14 = arith.constant 14 : index
    %114 = memref.load %arg0[%c14] : memref<60xf32, #tpu.memory_space<smem>>
    %115 = arith.truncf %109 : vector<16x128xf32> to vector<16x128xbf16>
    %cst_46 = arith.constant dense<0.000000e+00> : vector<16x128xf32>
    %116 = tpu.matmul %115, %2, %cst_46 {dimension_numbers = #tpu.dot_dimension_numbers<[1], [0], [0], [1], [0, 0, 1, 1], [], []>} : vector<16x128xbf16>, vector<128x128xbf16>, vector<16x128xf32> -> vector<16x128xf32>
    %117 = vector.broadcast %111 : vector<1x128xf32> to vector<16x128xf32>
    %118 = arith.addf %116, %117 : vector<16x128xf32>
    %119 = math.tanh %118 : vector<16x128xf32>
    %120 = arith.truncf %119 : vector<16x128xf32> to vector<16x128xbf16>
    %cst_47 = arith.constant dense<0.000000e+00> : vector<16x128xf32>
    %121 = tpu.matmul %120, %3, %cst_47 {dimension_numbers = #tpu.dot_dimension_numbers<[1], [0], [0], [1], [0, 0, 1, 1], [], []>} : vector<16x128xbf16>, vector<128x128xbf16>, vector<16x128xf32> -> vector<16x128xf32>
    %122 = arith.addf %121, %6 : vector<16x128xf32>
    %123 = vector.broadcast %112 : f32 to vector<16x128xf32>
    %124 = arith.mulf %123, %122 : vector<16x128xf32>
    %125 = vector.broadcast %113 : f32 to vector<16x128xf32>
    %126 = arith.mulf %125, %109 : vector<16x128xf32>
    %127 = arith.addf %124, %126 : vector<16x128xf32>
    %c4_48 = arith.constant 4 : index
    %c0_49 = arith.constant 0 : index
    %c0_50 = arith.constant 0 : index
    %128 = vector.load %arg2[%c4_48, %c0_49, %c0_50] : memref<19x16x128xf32, #tpu.memory_space<vmem>>, vector<1x16x128xf32>
    %129 = vector.shape_cast %128 : vector<1x16x128xf32> to vector<16x128xf32>
    %130 = vector.broadcast %114 : f32 to vector<16x128xf32>
    %131 = arith.mulf %130, %129 : vector<16x128xf32>
    %132 = arith.addf %127, %131 : vector<16x128xf32>
    %133 = arith.mulf %132, %0 : vector<16x128xf32>
    %134 = arith.addf %133, %1 : vector<16x128xf32>
    %c5_51 = arith.constant 5 : index
    %c0_52 = arith.constant 0 : index
    %c0_53 = arith.constant 0 : index
    %135 = vector.load %arg3[%c5_51, %c0_52, %c0_53] : memref<20x1x128xf32, #tpu.memory_space<vmem>>, vector<1x1x128xf32>
    %136 = vector.shape_cast %135 : vector<1x1x128xf32> to vector<1x128xf32>
    %c15 = arith.constant 15 : index
    %137 = memref.load %arg0[%c15] : memref<60xf32, #tpu.memory_space<smem>>
    %c16 = arith.constant 16 : index
    %138 = memref.load %arg0[%c16] : memref<60xf32, #tpu.memory_space<smem>>
    %c17 = arith.constant 17 : index
    %139 = memref.load %arg0[%c17] : memref<60xf32, #tpu.memory_space<smem>>
    %140 = arith.truncf %134 : vector<16x128xf32> to vector<16x128xbf16>
    %cst_54 = arith.constant dense<0.000000e+00> : vector<16x128xf32>
    %141 = tpu.matmul %140, %2, %cst_54 {dimension_numbers = #tpu.dot_dimension_numbers<[1], [0], [0], [1], [0, 0, 1, 1], [], []>} : vector<16x128xbf16>, vector<128x128xbf16>, vector<16x128xf32> -> vector<16x128xf32>
    %142 = vector.broadcast %136 : vector<1x128xf32> to vector<16x128xf32>
    %143 = arith.addf %141, %142 : vector<16x128xf32>
    %144 = math.tanh %143 : vector<16x128xf32>
    %145 = arith.truncf %144 : vector<16x128xf32> to vector<16x128xbf16>
    %cst_55 = arith.constant dense<0.000000e+00> : vector<16x128xf32>
    %146 = tpu.matmul %145, %3, %cst_55 {dimension_numbers = #tpu.dot_dimension_numbers<[1], [0], [0], [1], [0, 0, 1, 1], [], []>} : vector<16x128xbf16>, vector<128x128xbf16>, vector<16x128xf32> -> vector<16x128xf32>
    %147 = arith.addf %146, %6 : vector<16x128xf32>
    %148 = vector.broadcast %137 : f32 to vector<16x128xf32>
    %149 = arith.mulf %148, %147 : vector<16x128xf32>
    %150 = vector.broadcast %138 : f32 to vector<16x128xf32>
    %151 = arith.mulf %150, %134 : vector<16x128xf32>
    %152 = arith.addf %149, %151 : vector<16x128xf32>
    %c5_56 = arith.constant 5 : index
    %c0_57 = arith.constant 0 : index
    %c0_58 = arith.constant 0 : index
    %153 = vector.load %arg2[%c5_56, %c0_57, %c0_58] : memref<19x16x128xf32, #tpu.memory_space<vmem>>, vector<1x16x128xf32>
    %154 = vector.shape_cast %153 : vector<1x16x128xf32> to vector<16x128xf32>
    %155 = vector.broadcast %139 : f32 to vector<16x128xf32>
    %156 = arith.mulf %155, %154 : vector<16x128xf32>
    %157 = arith.addf %152, %156 : vector<16x128xf32>
    %158 = arith.mulf %157, %0 : vector<16x128xf32>
    %159 = arith.addf %158, %1 : vector<16x128xf32>
    %c6_59 = arith.constant 6 : index
    %c0_60 = arith.constant 0 : index
    %c0_61 = arith.constant 0 : index
    %160 = vector.load %arg3[%c6_59, %c0_60, %c0_61] : memref<20x1x128xf32, #tpu.memory_space<vmem>>, vector<1x1x128xf32>
    %161 = vector.shape_cast %160 : vector<1x1x128xf32> to vector<1x128xf32>
    %c18 = arith.constant 18 : index
    %162 = memref.load %arg0[%c18] : memref<60xf32, #tpu.memory_space<smem>>
    %c19 = arith.constant 19 : index
    %163 = memref.load %arg0[%c19] : memref<60xf32, #tpu.memory_space<smem>>
    %c20 = arith.constant 20 : index
    %164 = memref.load %arg0[%c20] : memref<60xf32, #tpu.memory_space<smem>>
    %165 = arith.truncf %159 : vector<16x128xf32> to vector<16x128xbf16>
    %cst_62 = arith.constant dense<0.000000e+00> : vector<16x128xf32>
    %166 = tpu.matmul %165, %2, %cst_62 {dimension_numbers = #tpu.dot_dimension_numbers<[1], [0], [0], [1], [0, 0, 1, 1], [], []>} : vector<16x128xbf16>, vector<128x128xbf16>, vector<16x128xf32> -> vector<16x128xf32>
    %167 = vector.broadcast %161 : vector<1x128xf32> to vector<16x128xf32>
    %168 = arith.addf %166, %167 : vector<16x128xf32>
    %169 = math.tanh %168 : vector<16x128xf32>
    %170 = arith.truncf %169 : vector<16x128xf32> to vector<16x128xbf16>
    %cst_63 = arith.constant dense<0.000000e+00> : vector<16x128xf32>
    %171 = tpu.matmul %170, %3, %cst_63 {dimension_numbers = #tpu.dot_dimension_numbers<[1], [0], [0], [1], [0, 0, 1, 1], [], []>} : vector<16x128xbf16>, vector<128x128xbf16>, vector<16x128xf32> -> vector<16x128xf32>
    %172 = arith.addf %171, %6 : vector<16x128xf32>
    %173 = vector.broadcast %162 : f32 to vector<16x128xf32>
    %174 = arith.mulf %173, %172 : vector<16x128xf32>
    %175 = vector.broadcast %163 : f32 to vector<16x128xf32>
    %176 = arith.mulf %175, %159 : vector<16x128xf32>
    %177 = arith.addf %174, %176 : vector<16x128xf32>
    %c6_64 = arith.constant 6 : index
    %c0_65 = arith.constant 0 : index
    %c0_66 = arith.constant 0 : index
    %178 = vector.load %arg2[%c6_64, %c0_65, %c0_66] : memref<19x16x128xf32, #tpu.memory_space<vmem>>, vector<1x16x128xf32>
    %179 = vector.shape_cast %178 : vector<1x16x128xf32> to vector<16x128xf32>
    %180 = vector.broadcast %164 : f32 to vector<16x128xf32>
    %181 = arith.mulf %180, %179 : vector<16x128xf32>
    %182 = arith.addf %177, %181 : vector<16x128xf32>
    %183 = arith.mulf %182, %0 : vector<16x128xf32>
    %184 = arith.addf %183, %1 : vector<16x128xf32>
    %c7_67 = arith.constant 7 : index
    %c0_68 = arith.constant 0 : index
    %c0_69 = arith.constant 0 : index
    %185 = vector.load %arg3[%c7_67, %c0_68, %c0_69] : memref<20x1x128xf32, #tpu.memory_space<vmem>>, vector<1x1x128xf32>
    %186 = vector.shape_cast %185 : vector<1x1x128xf32> to vector<1x128xf32>
    %c21 = arith.constant 21 : index
    %187 = memref.load %arg0[%c21] : memref<60xf32, #tpu.memory_space<smem>>
    %c22 = arith.constant 22 : index
    %188 = memref.load %arg0[%c22] : memref<60xf32, #tpu.memory_space<smem>>
    %c23 = arith.constant 23 : index
    %189 = memref.load %arg0[%c23] : memref<60xf32, #tpu.memory_space<smem>>
    %190 = arith.truncf %184 : vector<16x128xf32> to vector<16x128xbf16>
    %cst_70 = arith.constant dense<0.000000e+00> : vector<16x128xf32>
    %191 = tpu.matmul %190, %2, %cst_70 {dimension_numbers = #tpu.dot_dimension_numbers<[1], [0], [0], [1], [0, 0, 1, 1], [], []>} : vector<16x128xbf16>, vector<128x128xbf16>, vector<16x128xf32> -> vector<16x128xf32>
    %192 = vector.broadcast %186 : vector<1x128xf32> to vector<16x128xf32>
    %193 = arith.addf %191, %192 : vector<16x128xf32>
    %194 = math.tanh %193 : vector<16x128xf32>
    %195 = arith.truncf %194 : vector<16x128xf32> to vector<16x128xbf16>
    %cst_71 = arith.constant dense<0.000000e+00> : vector<16x128xf32>
    %196 = tpu.matmul %195, %3, %cst_71 {dimension_numbers = #tpu.dot_dimension_numbers<[1], [0], [0], [1], [0, 0, 1, 1], [], []>} : vector<16x128xbf16>, vector<128x128xbf16>, vector<16x128xf32> -> vector<16x128xf32>
    %197 = arith.addf %196, %6 : vector<16x128xf32>
    %198 = vector.broadcast %187 : f32 to vector<16x128xf32>
    %199 = arith.mulf %198, %197 : vector<16x128xf32>
    %200 = vector.broadcast %188 : f32 to vector<16x128xf32>
    %201 = arith.mulf %200, %184 : vector<16x128xf32>
    %202 = arith.addf %199, %201 : vector<16x128xf32>
    %c7_72 = arith.constant 7 : index
    %c0_73 = arith.constant 0 : index
    %c0_74 = arith.constant 0 : index
    %203 = vector.load %arg2[%c7_72, %c0_73, %c0_74] : memref<19x16x128xf32, #tpu.memory_space<vmem>>, vector<1x16x128xf32>
    %204 = vector.shape_cast %203 : vector<1x16x128xf32> to vector<16x128xf32>
    %205 = vector.broadcast %189 : f32 to vector<16x128xf32>
    %206 = arith.mulf %205, %204 : vector<16x128xf32>
    %207 = arith.addf %202, %206 : vector<16x128xf32>
    %208 = arith.mulf %207, %0 : vector<16x128xf32>
    %209 = arith.addf %208, %1 : vector<16x128xf32>
    %c8_75 = arith.constant 8 : index
    %c0_76 = arith.constant 0 : index
    %c0_77 = arith.constant 0 : index
    %210 = vector.load %arg3[%c8_75, %c0_76, %c0_77] : memref<20x1x128xf32, #tpu.memory_space<vmem>>, vector<1x1x128xf32>
    %211 = vector.shape_cast %210 : vector<1x1x128xf32> to vector<1x128xf32>
    %c24 = arith.constant 24 : index
    %212 = memref.load %arg0[%c24] : memref<60xf32, #tpu.memory_space<smem>>
    %c25 = arith.constant 25 : index
    %213 = memref.load %arg0[%c25] : memref<60xf32, #tpu.memory_space<smem>>
    %c26 = arith.constant 26 : index
    %214 = memref.load %arg0[%c26] : memref<60xf32, #tpu.memory_space<smem>>
    %215 = arith.truncf %209 : vector<16x128xf32> to vector<16x128xbf16>
    %cst_78 = arith.constant dense<0.000000e+00> : vector<16x128xf32>
    %216 = tpu.matmul %215, %2, %cst_78 {dimension_numbers = #tpu.dot_dimension_numbers<[1], [0], [0], [1], [0, 0, 1, 1], [], []>} : vector<16x128xbf16>, vector<128x128xbf16>, vector<16x128xf32> -> vector<16x128xf32>
    %217 = vector.broadcast %211 : vector<1x128xf32> to vector<16x128xf32>
    %218 = arith.addf %216, %217 : vector<16x128xf32>
    %219 = math.tanh %218 : vector<16x128xf32>
    %220 = arith.truncf %219 : vector<16x128xf32> to vector<16x128xbf16>
    %cst_79 = arith.constant dense<0.000000e+00> : vector<16x128xf32>
    %221 = tpu.matmul %220, %3, %cst_79 {dimension_numbers = #tpu.dot_dimension_numbers<[1], [0], [0], [1], [0, 0, 1, 1], [], []>} : vector<16x128xbf16>, vector<128x128xbf16>, vector<16x128xf32> -> vector<16x128xf32>
    %222 = arith.addf %221, %6 : vector<16x128xf32>
    %223 = vector.broadcast %212 : f32 to vector<16x128xf32>
    %224 = arith.mulf %223, %222 : vector<16x128xf32>
    %225 = vector.broadcast %213 : f32 to vector<16x128xf32>
    %226 = arith.mulf %225, %209 : vector<16x128xf32>
    %227 = arith.addf %224, %226 : vector<16x128xf32>
    %c8_80 = arith.constant 8 : index
    %c0_81 = arith.constant 0 : index
    %c0_82 = arith.constant 0 : index
    %228 = vector.load %arg2[%c8_80, %c0_81, %c0_82] : memref<19x16x128xf32, #tpu.memory_space<vmem>>, vector<1x16x128xf32>
    %229 = vector.shape_cast %228 : vector<1x16x128xf32> to vector<16x128xf32>
    %230 = vector.broadcast %214 : f32 to vector<16x128xf32>
    %231 = arith.mulf %230, %229 : vector<16x128xf32>
    %232 = arith.addf %227, %231 : vector<16x128xf32>
    %233 = arith.mulf %232, %0 : vector<16x128xf32>
    %234 = arith.addf %233, %1 : vector<16x128xf32>
    %c9_83 = arith.constant 9 : index
    %c0_84 = arith.constant 0 : index
    %c0_85 = arith.constant 0 : index
    %235 = vector.load %arg3[%c9_83, %c0_84, %c0_85] : memref<20x1x128xf32, #tpu.memory_space<vmem>>, vector<1x1x128xf32>
    %236 = vector.shape_cast %235 : vector<1x1x128xf32> to vector<1x128xf32>
    %c27 = arith.constant 27 : index
    %237 = memref.load %arg0[%c27] : memref<60xf32, #tpu.memory_space<smem>>
    %c28 = arith.constant 28 : index
    %238 = memref.load %arg0[%c28] : memref<60xf32, #tpu.memory_space<smem>>
    %c29 = arith.constant 29 : index
    %239 = memref.load %arg0[%c29] : memref<60xf32, #tpu.memory_space<smem>>
    %240 = arith.truncf %234 : vector<16x128xf32> to vector<16x128xbf16>
    %cst_86 = arith.constant dense<0.000000e+00> : vector<16x128xf32>
    %241 = tpu.matmul %240, %2, %cst_86 {dimension_numbers = #tpu.dot_dimension_numbers<[1], [0], [0], [1], [0, 0, 1, 1], [], []>} : vector<16x128xbf16>, vector<128x128xbf16>, vector<16x128xf32> -> vector<16x128xf32>
    %242 = vector.broadcast %236 : vector<1x128xf32> to vector<16x128xf32>
    %243 = arith.addf %241, %242 : vector<16x128xf32>
    %244 = math.tanh %243 : vector<16x128xf32>
    %245 = arith.truncf %244 : vector<16x128xf32> to vector<16x128xbf16>
    %cst_87 = arith.constant dense<0.000000e+00> : vector<16x128xf32>
    %246 = tpu.matmul %245, %3, %cst_87 {dimension_numbers = #tpu.dot_dimension_numbers<[1], [0], [0], [1], [0, 0, 1, 1], [], []>} : vector<16x128xbf16>, vector<128x128xbf16>, vector<16x128xf32> -> vector<16x128xf32>
    %247 = arith.addf %246, %6 : vector<16x128xf32>
    %248 = vector.broadcast %237 : f32 to vector<16x128xf32>
    %249 = arith.mulf %248, %247 : vector<16x128xf32>
    %250 = vector.broadcast %238 : f32 to vector<16x128xf32>
    %251 = arith.mulf %250, %234 : vector<16x128xf32>
    %252 = arith.addf %249, %251 : vector<16x128xf32>
    %c9_88 = arith.constant 9 : index
    %c0_89 = arith.constant 0 : index
    %c0_90 = arith.constant 0 : index
    %253 = vector.load %arg2[%c9_88, %c0_89, %c0_90] : memref<19x16x128xf32, #tpu.memory_space<vmem>>, vector<1x16x128xf32>
    %254 = vector.shape_cast %253 : vector<1x16x128xf32> to vector<16x128xf32>
    %255 = vector.broadcast %239 : f32 to vector<16x128xf32>
    %256 = arith.mulf %255, %254 : vector<16x128xf32>
    %257 = arith.addf %252, %256 : vector<16x128xf32>
    %258 = arith.mulf %257, %0 : vector<16x128xf32>
    %259 = arith.addf %258, %1 : vector<16x128xf32>
    %c10_91 = arith.constant 10 : index
    %c0_92 = arith.constant 0 : index
    %c0_93 = arith.constant 0 : index
    %260 = vector.load %arg3[%c10_91, %c0_92, %c0_93] : memref<20x1x128xf32, #tpu.memory_space<vmem>>, vector<1x1x128xf32>
    %261 = vector.shape_cast %260 : vector<1x1x128xf32> to vector<1x128xf32>
    %c30 = arith.constant 30 : index
    %262 = memref.load %arg0[%c30] : memref<60xf32, #tpu.memory_space<smem>>
    %c31 = arith.constant 31 : index
    %263 = memref.load %arg0[%c31] : memref<60xf32, #tpu.memory_space<smem>>
    %c32 = arith.constant 32 : index
    %264 = memref.load %arg0[%c32] : memref<60xf32, #tpu.memory_space<smem>>
    %265 = arith.truncf %259 : vector<16x128xf32> to vector<16x128xbf16>
    %cst_94 = arith.constant dense<0.000000e+00> : vector<16x128xf32>
    %266 = tpu.matmul %265, %2, %cst_94 {dimension_numbers = #tpu.dot_dimension_numbers<[1], [0], [0], [1], [0, 0, 1, 1], [], []>} : vector<16x128xbf16>, vector<128x128xbf16>, vector<16x128xf32> -> vector<16x128xf32>
    %267 = vector.broadcast %261 : vector<1x128xf32> to vector<16x128xf32>
    %268 = arith.addf %266, %267 : vector<16x128xf32>
    %269 = math.tanh %268 : vector<16x128xf32>
    %270 = arith.truncf %269 : vector<16x128xf32> to vector<16x128xbf16>
    %cst_95 = arith.constant dense<0.000000e+00> : vector<16x128xf32>
    %271 = tpu.matmul %270, %3, %cst_95 {dimension_numbers = #tpu.dot_dimension_numbers<[1], [0], [0], [1], [0, 0, 1, 1], [], []>} : vector<16x128xbf16>, vector<128x128xbf16>, vector<16x128xf32> -> vector<16x128xf32>
    %272 = arith.addf %271, %6 : vector<16x128xf32>
    %273 = vector.broadcast %262 : f32 to vector<16x128xf32>
    %274 = arith.mulf %273, %272 : vector<16x128xf32>
    %275 = vector.broadcast %263 : f32 to vector<16x128xf32>
    %276 = arith.mulf %275, %259 : vector<16x128xf32>
    %277 = arith.addf %274, %276 : vector<16x128xf32>
    %c10_96 = arith.constant 10 : index
    %c0_97 = arith.constant 0 : index
    %c0_98 = arith.constant 0 : index
    %278 = vector.load %arg2[%c10_96, %c0_97, %c0_98] : memref<19x16x128xf32, #tpu.memory_space<vmem>>, vector<1x16x128xf32>
    %279 = vector.shape_cast %278 : vector<1x16x128xf32> to vector<16x128xf32>
    %280 = vector.broadcast %264 : f32 to vector<16x128xf32>
    %281 = arith.mulf %280, %279 : vector<16x128xf32>
    %282 = arith.addf %277, %281 : vector<16x128xf32>
    %283 = arith.mulf %282, %0 : vector<16x128xf32>
    %284 = arith.addf %283, %1 : vector<16x128xf32>
    %c11_99 = arith.constant 11 : index
    %c0_100 = arith.constant 0 : index
    %c0_101 = arith.constant 0 : index
    %285 = vector.load %arg3[%c11_99, %c0_100, %c0_101] : memref<20x1x128xf32, #tpu.memory_space<vmem>>, vector<1x1x128xf32>
    %286 = vector.shape_cast %285 : vector<1x1x128xf32> to vector<1x128xf32>
    %c33 = arith.constant 33 : index
    %287 = memref.load %arg0[%c33] : memref<60xf32, #tpu.memory_space<smem>>
    %c34 = arith.constant 34 : index
    %288 = memref.load %arg0[%c34] : memref<60xf32, #tpu.memory_space<smem>>
    %c35 = arith.constant 35 : index
    %289 = memref.load %arg0[%c35] : memref<60xf32, #tpu.memory_space<smem>>
    %290 = arith.truncf %284 : vector<16x128xf32> to vector<16x128xbf16>
    %cst_102 = arith.constant dense<0.000000e+00> : vector<16x128xf32>
    %291 = tpu.matmul %290, %2, %cst_102 {dimension_numbers = #tpu.dot_dimension_numbers<[1], [0], [0], [1], [0, 0, 1, 1], [], []>} : vector<16x128xbf16>, vector<128x128xbf16>, vector<16x128xf32> -> vector<16x128xf32>
    %292 = vector.broadcast %286 : vector<1x128xf32> to vector<16x128xf32>
    %293 = arith.addf %291, %292 : vector<16x128xf32>
    %294 = math.tanh %293 : vector<16x128xf32>
    %295 = arith.truncf %294 : vector<16x128xf32> to vector<16x128xbf16>
    %cst_103 = arith.constant dense<0.000000e+00> : vector<16x128xf32>
    %296 = tpu.matmul %295, %3, %cst_103 {dimension_numbers = #tpu.dot_dimension_numbers<[1], [0], [0], [1], [0, 0, 1, 1], [], []>} : vector<16x128xbf16>, vector<128x128xbf16>, vector<16x128xf32> -> vector<16x128xf32>
    %297 = arith.addf %296, %6 : vector<16x128xf32>
    %298 = vector.broadcast %287 : f32 to vector<16x128xf32>
    %299 = arith.mulf %298, %297 : vector<16x128xf32>
    %300 = vector.broadcast %288 : f32 to vector<16x128xf32>
    %301 = arith.mulf %300, %284 : vector<16x128xf32>
    %302 = arith.addf %299, %301 : vector<16x128xf32>
    %c11_104 = arith.constant 11 : index
    %c0_105 = arith.constant 0 : index
    %c0_106 = arith.constant 0 : index
    %303 = vector.load %arg2[%c11_104, %c0_105, %c0_106] : memref<19x16x128xf32, #tpu.memory_space<vmem>>, vector<1x16x128xf32>
    %304 = vector.shape_cast %303 : vector<1x16x128xf32> to vector<16x128xf32>
    %305 = vector.broadcast %289 : f32 to vector<16x128xf32>
    %306 = arith.mulf %305, %304 : vector<16x128xf32>
    %307 = arith.addf %302, %306 : vector<16x128xf32>
    %308 = arith.mulf %307, %0 : vector<16x128xf32>
    %309 = arith.addf %308, %1 : vector<16x128xf32>
    %c12_107 = arith.constant 12 : index
    %c0_108 = arith.constant 0 : index
    %c0_109 = arith.constant 0 : index
    %310 = vector.load %arg3[%c12_107, %c0_108, %c0_109] : memref<20x1x128xf32, #tpu.memory_space<vmem>>, vector<1x1x128xf32>
    %311 = vector.shape_cast %310 : vector<1x1x128xf32> to vector<1x128xf32>
    %c36 = arith.constant 36 : index
    %312 = memref.load %arg0[%c36] : memref<60xf32, #tpu.memory_space<smem>>
    %c37 = arith.constant 37 : index
    %313 = memref.load %arg0[%c37] : memref<60xf32, #tpu.memory_space<smem>>
    %c38 = arith.constant 38 : index
    %314 = memref.load %arg0[%c38] : memref<60xf32, #tpu.memory_space<smem>>
    %315 = arith.truncf %309 : vector<16x128xf32> to vector<16x128xbf16>
    %cst_110 = arith.constant dense<0.000000e+00> : vector<16x128xf32>
    %316 = tpu.matmul %315, %2, %cst_110 {dimension_numbers = #tpu.dot_dimension_numbers<[1], [0], [0], [1], [0, 0, 1, 1], [], []>} : vector<16x128xbf16>, vector<128x128xbf16>, vector<16x128xf32> -> vector<16x128xf32>
    %317 = vector.broadcast %311 : vector<1x128xf32> to vector<16x128xf32>
    %318 = arith.addf %316, %317 : vector<16x128xf32>
    %319 = math.tanh %318 : vector<16x128xf32>
    %320 = arith.truncf %319 : vector<16x128xf32> to vector<16x128xbf16>
    %cst_111 = arith.constant dense<0.000000e+00> : vector<16x128xf32>
    %321 = tpu.matmul %320, %3, %cst_111 {dimension_numbers = #tpu.dot_dimension_numbers<[1], [0], [0], [1], [0, 0, 1, 1], [], []>} : vector<16x128xbf16>, vector<128x128xbf16>, vector<16x128xf32> -> vector<16x128xf32>
    %322 = arith.addf %321, %6 : vector<16x128xf32>
    %323 = vector.broadcast %312 : f32 to vector<16x128xf32>
    %324 = arith.mulf %323, %322 : vector<16x128xf32>
    %325 = vector.broadcast %313 : f32 to vector<16x128xf32>
    %326 = arith.mulf %325, %309 : vector<16x128xf32>
    %327 = arith.addf %324, %326 : vector<16x128xf32>
    %c12_112 = arith.constant 12 : index
    %c0_113 = arith.constant 0 : index
    %c0_114 = arith.constant 0 : index
    %328 = vector.load %arg2[%c12_112, %c0_113, %c0_114] : memref<19x16x128xf32, #tpu.memory_space<vmem>>, vector<1x16x128xf32>
    %329 = vector.shape_cast %328 : vector<1x16x128xf32> to vector<16x128xf32>
    %330 = vector.broadcast %314 : f32 to vector<16x128xf32>
    %331 = arith.mulf %330, %329 : vector<16x128xf32>
    %332 = arith.addf %327, %331 : vector<16x128xf32>
    %333 = arith.mulf %332, %0 : vector<16x128xf32>
    %334 = arith.addf %333, %1 : vector<16x128xf32>
    %c13_115 = arith.constant 13 : index
    %c0_116 = arith.constant 0 : index
    %c0_117 = arith.constant 0 : index
    %335 = vector.load %arg3[%c13_115, %c0_116, %c0_117] : memref<20x1x128xf32, #tpu.memory_space<vmem>>, vector<1x1x128xf32>
    %336 = vector.shape_cast %335 : vector<1x1x128xf32> to vector<1x128xf32>
    %c39 = arith.constant 39 : index
    %337 = memref.load %arg0[%c39] : memref<60xf32, #tpu.memory_space<smem>>
    %c40 = arith.constant 40 : index
    %338 = memref.load %arg0[%c40] : memref<60xf32, #tpu.memory_space<smem>>
    %c41 = arith.constant 41 : index
    %339 = memref.load %arg0[%c41] : memref<60xf32, #tpu.memory_space<smem>>
    %340 = arith.truncf %334 : vector<16x128xf32> to vector<16x128xbf16>
    %cst_118 = arith.constant dense<0.000000e+00> : vector<16x128xf32>
    %341 = tpu.matmul %340, %2, %cst_118 {dimension_numbers = #tpu.dot_dimension_numbers<[1], [0], [0], [1], [0, 0, 1, 1], [], []>} : vector<16x128xbf16>, vector<128x128xbf16>, vector<16x128xf32> -> vector<16x128xf32>
    %342 = vector.broadcast %336 : vector<1x128xf32> to vector<16x128xf32>
    %343 = arith.addf %341, %342 : vector<16x128xf32>
    %344 = math.tanh %343 : vector<16x128xf32>
    %345 = arith.truncf %344 : vector<16x128xf32> to vector<16x128xbf16>
    %cst_119 = arith.constant dense<0.000000e+00> : vector<16x128xf32>
    %346 = tpu.matmul %345, %3, %cst_119 {dimension_numbers = #tpu.dot_dimension_numbers<[1], [0], [0], [1], [0, 0, 1, 1], [], []>} : vector<16x128xbf16>, vector<128x128xbf16>, vector<16x128xf32> -> vector<16x128xf32>
    %347 = arith.addf %346, %6 : vector<16x128xf32>
    %348 = vector.broadcast %337 : f32 to vector<16x128xf32>
    %349 = arith.mulf %348, %347 : vector<16x128xf32>
    %350 = vector.broadcast %338 : f32 to vector<16x128xf32>
    %351 = arith.mulf %350, %334 : vector<16x128xf32>
    %352 = arith.addf %349, %351 : vector<16x128xf32>
    %c13_120 = arith.constant 13 : index
    %c0_121 = arith.constant 0 : index
    %c0_122 = arith.constant 0 : index
    %353 = vector.load %arg2[%c13_120, %c0_121, %c0_122] : memref<19x16x128xf32, #tpu.memory_space<vmem>>, vector<1x16x128xf32>
    %354 = vector.shape_cast %353 : vector<1x16x128xf32> to vector<16x128xf32>
    %355 = vector.broadcast %339 : f32 to vector<16x128xf32>
    %356 = arith.mulf %355, %354 : vector<16x128xf32>
    %357 = arith.addf %352, %356 : vector<16x128xf32>
    %358 = arith.mulf %357, %0 : vector<16x128xf32>
    %359 = arith.addf %358, %1 : vector<16x128xf32>
    %c14_123 = arith.constant 14 : index
    %c0_124 = arith.constant 0 : index
    %c0_125 = arith.constant 0 : index
    %360 = vector.load %arg3[%c14_123, %c0_124, %c0_125] : memref<20x1x128xf32, #tpu.memory_space<vmem>>, vector<1x1x128xf32>
    %361 = vector.shape_cast %360 : vector<1x1x128xf32> to vector<1x128xf32>
    %c42 = arith.constant 42 : index
    %362 = memref.load %arg0[%c42] : memref<60xf32, #tpu.memory_space<smem>>
    %c43 = arith.constant 43 : index
    %363 = memref.load %arg0[%c43] : memref<60xf32, #tpu.memory_space<smem>>
    %c44 = arith.constant 44 : index
    %364 = memref.load %arg0[%c44] : memref<60xf32, #tpu.memory_space<smem>>
    %365 = arith.truncf %359 : vector<16x128xf32> to vector<16x128xbf16>
    %cst_126 = arith.constant dense<0.000000e+00> : vector<16x128xf32>
    %366 = tpu.matmul %365, %2, %cst_126 {dimension_numbers = #tpu.dot_dimension_numbers<[1], [0], [0], [1], [0, 0, 1, 1], [], []>} : vector<16x128xbf16>, vector<128x128xbf16>, vector<16x128xf32> -> vector<16x128xf32>
    %367 = vector.broadcast %361 : vector<1x128xf32> to vector<16x128xf32>
    %368 = arith.addf %366, %367 : vector<16x128xf32>
    %369 = math.tanh %368 : vector<16x128xf32>
    %370 = arith.truncf %369 : vector<16x128xf32> to vector<16x128xbf16>
    %cst_127 = arith.constant dense<0.000000e+00> : vector<16x128xf32>
    %371 = tpu.matmul %370, %3, %cst_127 {dimension_numbers = #tpu.dot_dimension_numbers<[1], [0], [0], [1], [0, 0, 1, 1], [], []>} : vector<16x128xbf16>, vector<128x128xbf16>, vector<16x128xf32> -> vector<16x128xf32>
    %372 = arith.addf %371, %6 : vector<16x128xf32>
    %373 = vector.broadcast %362 : f32 to vector<16x128xf32>
    %374 = arith.mulf %373, %372 : vector<16x128xf32>
    %375 = vector.broadcast %363 : f32 to vector<16x128xf32>
    %376 = arith.mulf %375, %359 : vector<16x128xf32>
    %377 = arith.addf %374, %376 : vector<16x128xf32>
    %c14_128 = arith.constant 14 : index
    %c0_129 = arith.constant 0 : index
    %c0_130 = arith.constant 0 : index
    %378 = vector.load %arg2[%c14_128, %c0_129, %c0_130] : memref<19x16x128xf32, #tpu.memory_space<vmem>>, vector<1x16x128xf32>
    %379 = vector.shape_cast %378 : vector<1x16x128xf32> to vector<16x128xf32>
    %380 = vector.broadcast %364 : f32 to vector<16x128xf32>
    %381 = arith.mulf %380, %379 : vector<16x128xf32>
    %382 = arith.addf %377, %381 : vector<16x128xf32>
    %383 = arith.mulf %382, %0 : vector<16x128xf32>
    %384 = arith.addf %383, %1 : vector<16x128xf32>
    %c15_131 = arith.constant 15 : index
    %c0_132 = arith.constant 0 : index
    %c0_133 = arith.constant 0 : index
    %385 = vector.load %arg3[%c15_131, %c0_132, %c0_133] : memref<20x1x128xf32, #tpu.memory_space<vmem>>, vector<1x1x128xf32>
    %386 = vector.shape_cast %385 : vector<1x1x128xf32> to vector<1x128xf32>
    %c45 = arith.constant 45 : index
    %387 = memref.load %arg0[%c45] : memref<60xf32, #tpu.memory_space<smem>>
    %c46 = arith.constant 46 : index
    %388 = memref.load %arg0[%c46] : memref<60xf32, #tpu.memory_space<smem>>
    %c47 = arith.constant 47 : index
    %389 = memref.load %arg0[%c47] : memref<60xf32, #tpu.memory_space<smem>>
    %390 = arith.truncf %384 : vector<16x128xf32> to vector<16x128xbf16>
    %cst_134 = arith.constant dense<0.000000e+00> : vector<16x128xf32>
    %391 = tpu.matmul %390, %2, %cst_134 {dimension_numbers = #tpu.dot_dimension_numbers<[1], [0], [0], [1], [0, 0, 1, 1], [], []>} : vector<16x128xbf16>, vector<128x128xbf16>, vector<16x128xf32> -> vector<16x128xf32>
    %392 = vector.broadcast %386 : vector<1x128xf32> to vector<16x128xf32>
    %393 = arith.addf %391, %392 : vector<16x128xf32>
    %394 = math.tanh %393 : vector<16x128xf32>
    %395 = arith.truncf %394 : vector<16x128xf32> to vector<16x128xbf16>
    %cst_135 = arith.constant dense<0.000000e+00> : vector<16x128xf32>
    %396 = tpu.matmul %395, %3, %cst_135 {dimension_numbers = #tpu.dot_dimension_numbers<[1], [0], [0], [1], [0, 0, 1, 1], [], []>} : vector<16x128xbf16>, vector<128x128xbf16>, vector<16x128xf32> -> vector<16x128xf32>
    %397 = arith.addf %396, %6 : vector<16x128xf32>
    %398 = vector.broadcast %387 : f32 to vector<16x128xf32>
    %399 = arith.mulf %398, %397 : vector<16x128xf32>
    %400 = vector.broadcast %388 : f32 to vector<16x128xf32>
    %401 = arith.mulf %400, %384 : vector<16x128xf32>
    %402 = arith.addf %399, %401 : vector<16x128xf32>
    %c15_136 = arith.constant 15 : index
    %c0_137 = arith.constant 0 : index
    %c0_138 = arith.constant 0 : index
    %403 = vector.load %arg2[%c15_136, %c0_137, %c0_138] : memref<19x16x128xf32, #tpu.memory_space<vmem>>, vector<1x16x128xf32>
    %404 = vector.shape_cast %403 : vector<1x16x128xf32> to vector<16x128xf32>
    %405 = vector.broadcast %389 : f32 to vector<16x128xf32>
    %406 = arith.mulf %405, %404 : vector<16x128xf32>
    %407 = arith.addf %402, %406 : vector<16x128xf32>
    %408 = arith.mulf %407, %0 : vector<16x128xf32>
    %409 = arith.addf %408, %1 : vector<16x128xf32>
    %c16_139 = arith.constant 16 : index
    %c0_140 = arith.constant 0 : index
    %c0_141 = arith.constant 0 : index
    %410 = vector.load %arg3[%c16_139, %c0_140, %c0_141] : memref<20x1x128xf32, #tpu.memory_space<vmem>>, vector<1x1x128xf32>
    %411 = vector.shape_cast %410 : vector<1x1x128xf32> to vector<1x128xf32>
    %c48 = arith.constant 48 : index
    %412 = memref.load %arg0[%c48] : memref<60xf32, #tpu.memory_space<smem>>
    %c49 = arith.constant 49 : index
    %413 = memref.load %arg0[%c49] : memref<60xf32, #tpu.memory_space<smem>>
    %c50 = arith.constant 50 : index
    %414 = memref.load %arg0[%c50] : memref<60xf32, #tpu.memory_space<smem>>
    %415 = arith.truncf %409 : vector<16x128xf32> to vector<16x128xbf16>
    %cst_142 = arith.constant dense<0.000000e+00> : vector<16x128xf32>
    %416 = tpu.matmul %415, %2, %cst_142 {dimension_numbers = #tpu.dot_dimension_numbers<[1], [0], [0], [1], [0, 0, 1, 1], [], []>} : vector<16x128xbf16>, vector<128x128xbf16>, vector<16x128xf32> -> vector<16x128xf32>
    %417 = vector.broadcast %411 : vector<1x128xf32> to vector<16x128xf32>
    %418 = arith.addf %416, %417 : vector<16x128xf32>
    %419 = math.tanh %418 : vector<16x128xf32>
    %420 = arith.truncf %419 : vector<16x128xf32> to vector<16x128xbf16>
    %cst_143 = arith.constant dense<0.000000e+00> : vector<16x128xf32>
    %421 = tpu.matmul %420, %3, %cst_143 {dimension_numbers = #tpu.dot_dimension_numbers<[1], [0], [0], [1], [0, 0, 1, 1], [], []>} : vector<16x128xbf16>, vector<128x128xbf16>, vector<16x128xf32> -> vector<16x128xf32>
    %422 = arith.addf %421, %6 : vector<16x128xf32>
    %423 = vector.broadcast %412 : f32 to vector<16x128xf32>
    %424 = arith.mulf %423, %422 : vector<16x128xf32>
    %425 = vector.broadcast %413 : f32 to vector<16x128xf32>
    %426 = arith.mulf %425, %409 : vector<16x128xf32>
    %427 = arith.addf %424, %426 : vector<16x128xf32>
    %c16_144 = arith.constant 16 : index
    %c0_145 = arith.constant 0 : index
    %c0_146 = arith.constant 0 : index
    %428 = vector.load %arg2[%c16_144, %c0_145, %c0_146] : memref<19x16x128xf32, #tpu.memory_space<vmem>>, vector<1x16x128xf32>
    %429 = vector.shape_cast %428 : vector<1x16x128xf32> to vector<16x128xf32>
    %430 = vector.broadcast %414 : f32 to vector<16x128xf32>
    %431 = arith.mulf %430, %429 : vector<16x128xf32>
    %432 = arith.addf %427, %431 : vector<16x128xf32>
    %433 = arith.mulf %432, %0 : vector<16x128xf32>
    %434 = arith.addf %433, %1 : vector<16x128xf32>
    %c17_147 = arith.constant 17 : index
    %c0_148 = arith.constant 0 : index
    %c0_149 = arith.constant 0 : index
    %435 = vector.load %arg3[%c17_147, %c0_148, %c0_149] : memref<20x1x128xf32, #tpu.memory_space<vmem>>, vector<1x1x128xf32>
    %436 = vector.shape_cast %435 : vector<1x1x128xf32> to vector<1x128xf32>
    %c51 = arith.constant 51 : index
    %437 = memref.load %arg0[%c51] : memref<60xf32, #tpu.memory_space<smem>>
    %c52 = arith.constant 52 : index
    %438 = memref.load %arg0[%c52] : memref<60xf32, #tpu.memory_space<smem>>
    %c53 = arith.constant 53 : index
    %439 = memref.load %arg0[%c53] : memref<60xf32, #tpu.memory_space<smem>>
    %440 = arith.truncf %434 : vector<16x128xf32> to vector<16x128xbf16>
    %cst_150 = arith.constant dense<0.000000e+00> : vector<16x128xf32>
    %441 = tpu.matmul %440, %2, %cst_150 {dimension_numbers = #tpu.dot_dimension_numbers<[1], [0], [0], [1], [0, 0, 1, 1], [], []>} : vector<16x128xbf16>, vector<128x128xbf16>, vector<16x128xf32> -> vector<16x128xf32>
    %442 = vector.broadcast %436 : vector<1x128xf32> to vector<16x128xf32>
    %443 = arith.addf %441, %442 : vector<16x128xf32>
    %444 = math.tanh %443 : vector<16x128xf32>
    %445 = arith.truncf %444 : vector<16x128xf32> to vector<16x128xbf16>
    %cst_151 = arith.constant dense<0.000000e+00> : vector<16x128xf32>
    %446 = tpu.matmul %445, %3, %cst_151 {dimension_numbers = #tpu.dot_dimension_numbers<[1], [0], [0], [1], [0, 0, 1, 1], [], []>} : vector<16x128xbf16>, vector<128x128xbf16>, vector<16x128xf32> -> vector<16x128xf32>
    %447 = arith.addf %446, %6 : vector<16x128xf32>
    %448 = vector.broadcast %437 : f32 to vector<16x128xf32>
    %449 = arith.mulf %448, %447 : vector<16x128xf32>
    %450 = vector.broadcast %438 : f32 to vector<16x128xf32>
    %451 = arith.mulf %450, %434 : vector<16x128xf32>
    %452 = arith.addf %449, %451 : vector<16x128xf32>
    %c17_152 = arith.constant 17 : index
    %c0_153 = arith.constant 0 : index
    %c0_154 = arith.constant 0 : index
    %453 = vector.load %arg2[%c17_152, %c0_153, %c0_154] : memref<19x16x128xf32, #tpu.memory_space<vmem>>, vector<1x16x128xf32>
    %454 = vector.shape_cast %453 : vector<1x16x128xf32> to vector<16x128xf32>
    %455 = vector.broadcast %439 : f32 to vector<16x128xf32>
    %456 = arith.mulf %455, %454 : vector<16x128xf32>
    %457 = arith.addf %452, %456 : vector<16x128xf32>
    %458 = arith.mulf %457, %0 : vector<16x128xf32>
    %459 = arith.addf %458, %1 : vector<16x128xf32>
    %c18_155 = arith.constant 18 : index
    %c0_156 = arith.constant 0 : index
    %c0_157 = arith.constant 0 : index
    %460 = vector.load %arg3[%c18_155, %c0_156, %c0_157] : memref<20x1x128xf32, #tpu.memory_space<vmem>>, vector<1x1x128xf32>
    %461 = vector.shape_cast %460 : vector<1x1x128xf32> to vector<1x128xf32>
    %c54 = arith.constant 54 : index
    %462 = memref.load %arg0[%c54] : memref<60xf32, #tpu.memory_space<smem>>
    %c55 = arith.constant 55 : index
    %463 = memref.load %arg0[%c55] : memref<60xf32, #tpu.memory_space<smem>>
    %c56 = arith.constant 56 : index
    %464 = memref.load %arg0[%c56] : memref<60xf32, #tpu.memory_space<smem>>
    %465 = arith.truncf %459 : vector<16x128xf32> to vector<16x128xbf16>
    %cst_158 = arith.constant dense<0.000000e+00> : vector<16x128xf32>
    %466 = tpu.matmul %465, %2, %cst_158 {dimension_numbers = #tpu.dot_dimension_numbers<[1], [0], [0], [1], [0, 0, 1, 1], [], []>} : vector<16x128xbf16>, vector<128x128xbf16>, vector<16x128xf32> -> vector<16x128xf32>
    %467 = vector.broadcast %461 : vector<1x128xf32> to vector<16x128xf32>
    %468 = arith.addf %466, %467 : vector<16x128xf32>
    %469 = math.tanh %468 : vector<16x128xf32>
    %470 = arith.truncf %469 : vector<16x128xf32> to vector<16x128xbf16>
    %cst_159 = arith.constant dense<0.000000e+00> : vector<16x128xf32>
    %471 = tpu.matmul %470, %3, %cst_159 {dimension_numbers = #tpu.dot_dimension_numbers<[1], [0], [0], [1], [0, 0, 1, 1], [], []>} : vector<16x128xbf16>, vector<128x128xbf16>, vector<16x128xf32> -> vector<16x128xf32>
    %472 = arith.addf %471, %6 : vector<16x128xf32>
    %473 = vector.broadcast %462 : f32 to vector<16x128xf32>
    %474 = arith.mulf %473, %472 : vector<16x128xf32>
    %475 = vector.broadcast %463 : f32 to vector<16x128xf32>
    %476 = arith.mulf %475, %459 : vector<16x128xf32>
    %477 = arith.addf %474, %476 : vector<16x128xf32>
    %c18_160 = arith.constant 18 : index
    %c0_161 = arith.constant 0 : index
    %c0_162 = arith.constant 0 : index
    %478 = vector.load %arg2[%c18_160, %c0_161, %c0_162] : memref<19x16x128xf32, #tpu.memory_space<vmem>>, vector<1x16x128xf32>
    %479 = vector.shape_cast %478 : vector<1x16x128xf32> to vector<16x128xf32>
    %480 = vector.broadcast %464 : f32 to vector<16x128xf32>
    %481 = arith.mulf %480, %479 : vector<16x128xf32>
    %482 = arith.addf %477, %481 : vector<16x128xf32>
    %483 = arith.mulf %482, %0 : vector<16x128xf32>
    %484 = arith.addf %483, %1 : vector<16x128xf32>
    %c19_163 = arith.constant 19 : index
    %c0_164 = arith.constant 0 : index
    %c0_165 = arith.constant 0 : index
    %485 = vector.load %arg3[%c19_163, %c0_164, %c0_165] : memref<20x1x128xf32, #tpu.memory_space<vmem>>, vector<1x1x128xf32>
    %486 = vector.shape_cast %485 : vector<1x1x128xf32> to vector<1x128xf32>
    %c57 = arith.constant 57 : index
    %487 = memref.load %arg0[%c57] : memref<60xf32, #tpu.memory_space<smem>>
    %c58 = arith.constant 58 : index
    %488 = memref.load %arg0[%c58] : memref<60xf32, #tpu.memory_space<smem>>
    %489 = arith.truncf %484 : vector<16x128xf32> to vector<16x128xbf16>
    %cst_166 = arith.constant dense<0.000000e+00> : vector<16x128xf32>
    %490 = tpu.matmul %489, %2, %cst_166 {dimension_numbers = #tpu.dot_dimension_numbers<[1], [0], [0], [1], [0, 0, 1, 1], [], []>} : vector<16x128xbf16>, vector<128x128xbf16>, vector<16x128xf32> -> vector<16x128xf32>
    %491 = vector.broadcast %486 : vector<1x128xf32> to vector<16x128xf32>
    %492 = arith.addf %490, %491 : vector<16x128xf32>
    %493 = math.tanh %492 : vector<16x128xf32>
    %494 = arith.truncf %493 : vector<16x128xf32> to vector<16x128xbf16>
    %cst_167 = arith.constant dense<0.000000e+00> : vector<16x128xf32>
    %495 = tpu.matmul %494, %3, %cst_167 {dimension_numbers = #tpu.dot_dimension_numbers<[1], [0], [0], [1], [0, 0, 1, 1], [], []>} : vector<16x128xbf16>, vector<128x128xbf16>, vector<16x128xf32> -> vector<16x128xf32>
    %496 = arith.addf %495, %6 : vector<16x128xf32>
    %497 = vector.broadcast %487 : f32 to vector<16x128xf32>
    %498 = arith.mulf %497, %496 : vector<16x128xf32>
    %499 = vector.broadcast %488 : f32 to vector<16x128xf32>
    %500 = arith.mulf %499, %484 : vector<16x128xf32>
    %501 = arith.addf %498, %500 : vector<16x128xf32>
    %502 = arith.mulf %501, %0 : vector<16x128xf32>
    %503 = arith.addf %502, %1 : vector<16x128xf32>
    %c0_168 = arith.constant 0 : index
    %c0_169 = arith.constant 0 : index
    %504 = vector.load %arg9[%c0_168, %c0_169] : memref<16x128xf32, #tpu.memory_space<vmem>>, vector<16x128xf32>
    tpu.vector_store %arg9[%c0_168, %c0_169], %503 {strides = array<i32>} : memref<16x128xf32, #tpu.memory_space<vmem>>, vector<16x128xf32>,
    return
  }
}

</mosaic_0001>

<bundles_post_ra>
// kernel: tpu_custom_call.1
= control target key start
LH: loop header
LB: loop body
LE: loop exit
PB: predicated region body
PF: predicated region fallthrough
CT: control target
= control target key end

     0   :  { %14 = vsyncpa [#allocation5], 0  ;;  %s5535_s0 = inlined_call_operand.hbm [shape: f32[60], index: 0, kind: input, shape index: {}]   ;;  %s5536_s1 = inlined_call_operand.hbm [shape: f32[16,128], index: 1, kind: input, shape index: {}]   ;;  %s5537_s2 = inlined_call_operand.hbm [shape: f32[19,16,128], index: 2, kind: input, shape index: {}]   ;;  %s5538_s3 = inlined_call_operand.hbm [shape: f32[20,1,128], index: 3, kind: input, shape index: {}]   ;;  %s5539_s4 = inlined_call_operand.hbm [shape: f32[16,128], index: 4, kind: input, shape index: {}]   ;;  %s5540_s5 = inlined_call_operand.vmem [shape: f32[16,128], index: 5, kind: input, shape index: {}]   ;;  %s5541_s6 = inlined_call_operand.hbm [shape: bf16[128,128], index: 6, kind: input, shape index: {}]   ;;  %s5542_s7 = inlined_call_operand.hbm [shape: bf16[128,128], index: 7, kind: input, shape index: {}]   ;;  %s5543_s8 = inlined_call_operand.vmem [shape: f32[1,128], index: 8, kind: input, shape index: {}]   ;;  %s5544_s9 = inlined_call_operand.hbm [shape: f32[16,128], index: 9, kind: output, shape index: {}]  }
   0x1   :  { %15 = vsyncpa [#allocation3], 0 }
   0x2   :  { %16 = vsyncpa [#allocation8], 0 }
   0x3   :  { %17 = vsyncpa [#allocation11], 0 }
   0x4   :  { %18 = vsyncpa [#allocation14], 0 }
   0x5   :  { %19 = vsyncpa [#allocation4], 0  ;;  %s4209_s30 = smov [#allocation7]   ;;  %s4210_s11 = smov [#allocation10]  }
   0x6   :  { %s45_s10 = sshll.u32 %s4209_s30, 4  ;;  %s69_s12 = sshll.u32 %s4210_s11, 4  ;;  %s46_s10 = int_to_ptr.vmem [resolvable:$true] %s45_s10  ;;  %s4275_s12 = int_to_ptr.vmem [resolvable:$true] %s69_s12 }
   0x7   :  { %s4033_s15 = scalar_lea.hbm %s5537_s2, 4864 }
   0x8   :  { %p4034_p0 = scmp.ne.s32.totalorder %s5537_s2, %s4033_s15  ;;  %p4037_p1 = scmp.lt.u32.totalorder %s4033_s15, %s5537_s2 }
   0xa   :  { %p4039_p2 = pnand %p4037_p1, %p4034_p0 }
   0xc   :  { %4042 = shalt.err (!%p4039_p2)
}
   0xd   :  { %s4043_s20 = scalar_lea.vmem %s46_s10, 4864  ;;  %p4048_p4 = scmp.lt.s32.totalorder %s46_s10, %s46_s10 }
   0xe   :  { %p4044_p3 = scmp.ne.s32.totalorder %s46_s10, %s4043_s20  ;;  %p4049_p5 = scmp.lt.s32.totalorder %s4043_s20, %s4043_s20 }
  0x10   :  { %p4050_p6 = por %p4049_p5, %p4048_p4 }
  0x12   :  { %p4051_p7 = pnand %p4050_p6, %p4044_p3 }
  0x14   :  { %4054 = shalt.err (!%p4051_p7)
}
  0x15   :  { %s4211_s21 = smov 128   ;;  %s4212_s22 = smov 8  }
  0x16   :  { %51 = dma.hbm_to_vmem [thread:$0]  %s5537_s2, 4864, %s46_s10, [#allocation8], %s4211_s21, %s4211_s21, %s4212_s22  }
  0x17   :  { %s4055_s27 = scalar_lea.hbm %s5539_s4, 256 }
  0x18   :  { %p4056_p8 = scmp.ne.s32.totalorder %s5539_s4, %s4055_s27  ;;  %p4059_p9 = scmp.lt.u32.totalorder %s4055_s27, %s5539_s4 }
  0x1a   :  { %p4061_p10 = pnand %p4059_p9, %p4056_p8 }
  0x1c   :  { %4064 = shalt.err (!%p4061_p10)
}
  0x1d   :  { %s4065_s13 = scalar_lea.vmem %s4275_s12, 256  ;;  %p4070_p12 = scmp.lt.s32.totalorder %s4275_s12, %s4275_s12 }
  0x1e   :  { %p4066_p11 = scmp.ne.s32.totalorder %s4275_s12, %s4065_s13  ;;  %p4071_p13 = scmp.lt.s32.totalorder %s4065_s13, %s4065_s13 }
  0x20   :  { %p4072_p0 = por %p4071_p13, %p4070_p12 }
  0x22   :  { %p4073_p1 = pnand %p4072_p0, %p4066_p11 }
  0x24   :  { %4076 = shalt.err (!%p4073_p1)
}
  0x25   :  { %75 = dma.hbm_to_vmem [thread:$0]  %s5539_s4, 256, %s4275_s12, [#allocation11], %s4211_s21, %s4211_s21, %s4212_s22  }
  0x26   :  { %s4077_s16 = scalar_lea.hbm %s5535_s0, 16 }
  0x27   :  { %p4078_p2 = scmp.ne.s32.totalorder %s5535_s0, %s4077_s16  ;;  %p4081_p3 = scmp.lt.u32.totalorder %s4077_s16, %s5535_s0 }
  0x29   :  { %p4083_p4 = pnand %p4081_p3, %p4078_p2 }
  0x2b   :  { %4086 = shalt.err (!%p4083_p4)
}
  0x2c   :  { %s4213_s23 = smov [#allocation2]   ;;  %s4214_s4 = smov [#allocation6]  }
  0x2d   :  { %27 = dma.hbm_to_smem %s5535_s0, 16, %s4213_s23, [#allocation5]  }
  0x2e   :  { %s33_s12 = sshll.u32 %s4214_s4, 4  ;;  %s4215_s26 = smov [#allocation9]   ;;  %s34_s12 = int_to_ptr.vmem [resolvable:$true] %s33_s12 }
  0x2f   :  { %s57_s27 = sshll.u32 %s4215_s26, 4  ;;  %s4087_s30 = scalar_lea.hbm %s5536_s1, 256  ;;  %s58_s27 = int_to_ptr.vmem [resolvable:$true] %s57_s27 }
  0x30   :  { %p4088_p5 = scmp.ne.s32.totalorder %s5536_s1, %s4087_s30  ;;  %p4091_p6 = scmp.lt.u32.totalorder %s4087_s30, %s5536_s1 }
  0x32   :  { %p4093_p7 = pnand %p4091_p6, %p4088_p5 }
  0x34   :  { %4096 = shalt.err (!%p4093_p7)
}
  0x35   :  { %s4097_s0 = scalar_lea.vmem %s34_s12, 256  ;;  %p4102_p9 = scmp.lt.s32.totalorder %s34_s12, %s34_s12 }
  0x36   :  { %p4098_p8 = scmp.ne.s32.totalorder %s34_s12, %s4097_s0  ;;  %p4103_p10 = scmp.lt.s32.totalorder %s4097_s0, %s4097_s0 }
  0x38   :  { %p4104_p11 = por %p4103_p10, %p4102_p9 }
  0x3a   :  { %p4105_p12 = pnand %p4104_p11, %p4098_p8 }
  0x3c   :  { %4108 = shalt.err (!%p4105_p12)
}
  0x3d   :  { %39 = dma.hbm_to_vmem [thread:$0]  %s5536_s1, 256, %s34_s12, [#allocation3], %s4211_s21, %s4211_s21, %s4212_s22  }
  0x3e   :  { %s4109_s18 = scalar_lea.hbm %s5538_s3, 320 }
  0x3f   :  { %p4110_p13 = scmp.ne.s32.totalorder %s5538_s3, %s4109_s18  ;;  %p4113_p0 = scmp.lt.u32.totalorder %s4109_s18, %s5538_s3 }
  0x41   :  { %p4115_p1 = pnand %p4113_p0, %p4110_p13 }
  0x43   :  { %4118 = shalt.err (!%p4115_p1)
}
  0x44   :  { %s4119_s25 = scalar_lea.vmem %s58_s27, 320  ;;  %p4124_p3 = scmp.lt.s32.totalorder %s58_s27, %s58_s27 }
  0x45   :  { %p4120_p2 = scmp.ne.s32.totalorder %s58_s27, %s4119_s25  ;;  %p4125_p4 = scmp.lt.s32.totalorder %s4119_s25, %s4119_s25 }
  0x47   :  { %p4126_p5 = por %p4125_p4, %p4124_p3 }
  0x49   :  { %p4127_p6 = pnand %p4126_p5, %p4120_p2 }
  0x4b   :  { %4130 = shalt.err (!%p4127_p6)
}
  0x4c   :  { %s4216_s1 = smov 16   ;;  %s4217_s4 = smov 1  }
  0x4d   :  { %63 = dma.hbm_to_vmem [thread:$0]  %s5538_s3, 320, %s58_s27, [#allocation8], %s4216_s1, %s4216_s1, %s4217_s4  }
  0x4e   :  { %s4218_s28 = smov [#allocation12]   ;;  %s4131_s13 = scalar_lea.hbm %s5541_s6, 1024 }
  0x4f   :  { %s83_s29 = sshll.u32 %s4218_s28, 4  ;;  %p4132_p7 = scmp.ne.s32.totalorder %s5541_s6, %s4131_s13  ;;  %s84_s29 = int_to_ptr.vmem [resolvable:$true] %s83_s29 }
  0x50   :  { %p4135_p8 = scmp.lt.u32.totalorder %s4131_s13, %s5541_s6 }
  0x52   :  { %p4137_p9 = pnand %p4135_p8, %p4132_p7 }
  0x54   :  { %4140 = shalt.err (!%p4137_p9)
}
  0x55   :  { %s4141_s15 = scalar_lea.vmem %s84_s29, 1024  ;;  %p4146_p11 = scmp.lt.s32.totalorder %s84_s29, %s84_s29 }
  0x56   :  { %p4142_p10 = scmp.ne.s32.totalorder %s84_s29, %s4141_s15  ;;  %p4147_p12 = scmp.lt.s32.totalorder %s4141_s15, %s4141_s15 }
  0x58   :  { %p4148_p13 = por %p4147_p12, %p4146_p11 }
  0x5a   :  { %p4149_p0 = pnand %p4148_p13, %p4142_p10 }
  0x5c   :  { %4152 = shalt.err (!%p4149_p0)
}
  0x5d   :  { %s4219_s3 = smov 64   ;;  %s4220_s27 = smov 4  }
  0x5e   :  { %89 = dma.hbm_to_vmem [thread:$0]  %s5541_s6, 1024, %s84_s29, [#allocation11], %s4219_s3, %s4219_s3, %s4220_s27  }
  0x5f   :  { %s4221_s18 = smov [#allocation13]   ;;  %s4153_s24 = scalar_lea.hbm %s5542_s7, 1024 }
  0x60   :  { %s95_s19 = sshll.u32 %s4221_s18, 4  ;;  %p4154_p1 = scmp.ne.s32.totalorder %s5542_s7, %s4153_s24  ;;  %s96_s19 = int_to_ptr.vmem [resolvable:$true] %s95_s19 }
  0x61   :  { %p4157_p2 = scmp.lt.u32.totalorder %s4153_s24, %s5542_s7 }
  0x63   :  { %p4159_p3 = pnand %p4157_p2, %p4154_p1 }
  0x65   :  { %4162 = shalt.err (!%p4159_p3)
}
  0x66   :  { %s4163_s26 = scalar_lea.vmem %s96_s19, 1024  ;;  %p4168_p5 = scmp.lt.s32.totalorder %s96_s19, %s96_s19 }
  0x67   :  { %p4164_p4 = scmp.ne.s32.totalorder %s96_s19, %s4163_s26  ;;  %p4169_p6 = scmp.lt.s32.totalorder %s4163_s26, %s4163_s26 }
  0x69   :  { %p4170_p7 = por %p4169_p6, %p4168_p5 }
  0x6b   :  { %p4171_p8 = pnand %p4170_p7, %p4164_p4 }
  0x6d   :  { %4174 = shalt.err (!%p4171_p8)
}
  0x6e   :  { %101 = dma.hbm_to_vmem [thread:$0]  %s5542_s7, 1024, %s96_s19, [#allocation14], %s4219_s3, %s4219_s3, %s4220_s27  }
  0x6f   :  { %4197 = dma.done.wait [#allocation5], 16  }
  0x70   :  { %4198 = vsyncadd [#allocation5], 4294967280 }
  0x71   :  { %4199 = dma.done.wait [#allocation3], 256  }
  0x72   :  { %4200 = vsyncadd [#allocation3], 4294967040 }
  0x73   :  { %4201 = dma.done.wait [#allocation8], 5184  }
  0x74   :  { %4202 = vsyncadd [#allocation8], 4294962112 }
  0x75   :  { %4203 = dma.done.wait [#allocation11], 1280  }
  0x76   :  { %4204 = vsyncadd [#allocation11], 4294966016 }
  0x77   :  { %4205 = dma.done.wait [#allocation14], 1024  }
  0x78   :  { %4206 = vsyncadd [#allocation14], 4294966272 }
  0x79   :  { %125 = sfence }
  0x7a   :  { %v4375_v0 = vld [vmem:[#allocation12] sm:$0xff]   ;;  %v4222_v1 = vmov 0.0   ;;  %v4380_v2 = vld [vmem:[#allocation12 + $0x8] sm:$0xff]   ;;  %vm4223_vm0 = vmmov 0   ;;  %v4388_v3 = vld [vmem:[#allocation12 + $0x10] sm:$0xff]   ;;  %s2625_s13 = sld [smem:[#allocation2 + $0x1]] }
  0x7b   :  { %3079 = vmatprep.subr.bf16.mxu0 %v4222_v1  ;;  %3099 = vmatprep.subr.bf16.mxu1 %v4222_v1  ;;  %v4391_v4 = vld [vmem:[#allocation12 + $0x18] sm:$0xff]   ;;  %v4394_v5 = vld [vmem:[#allocation13] sm:$0xff]   ;;  %v4398_v6 = vld [vmem:[#allocation13 + $0x8] sm:$0xff]   ;;  %s177_s2 = sld [smem:[#allocation2]]  ;;  %s2626_s10 = sld [smem:[#allocation2 + $0x2]] }
  0x7c   :  { %3080 = vmatpush3.bf16.msra.mxu0 %v4375_v0  ;;  %3095 = vmatprep.mubr.msk.bf16.mxu0 %vm4223_vm0, %v4222_v1  ;;  %v4400_v7 = vld [vmem:[#allocation12 + $0x20] sm:$0xff]   ;;  %v4404_v8 = vld [vmem:[#allocation13 + $0x10] sm:$0xff]   ;;  %v4408_v9 = vld [vmem:[#allocation12 + $0x28] sm:$0xff]   ;;  %s2645_s15 = sld [smem:[#allocation2 + $0x4]]  ;;  %s2644_s3 = sld [smem:[#allocation2 + $0x3]] }
  0x7d   :  { %3081 = vmatprep.subr.bf16.mxu0 %v4222_v1  ;;  %3115 = vmatprep.mubr.msk.bf16.mxu1 %vm4223_vm0, %v4222_v1  ;;  %v4410_v10 = vld [vmem:[#allocation10] sm:$0xff]  ;;  %v4414_v11 = vld [vmem:[#allocation10 + $0x8] sm:$0xff]  ;;  %v171_v13 = vld [vmem:[#allocation6 + $0x8] sm:$0xff]  ;;  %s2646_s27 = sld [smem:[#allocation2 + $0x5]]  ;;  %s2649_s16 = sld [smem:[#allocation2 + $0x7]] }
  0x7e   :  { %3100 = vmatpush3.bf16.msra.mxu1 %v4394_v5  ;;  %v170_v12 = vld [vmem:[#allocation6] sm:$0xff]  ;;  %v173_v16 = vmul.f32 %v171_v13, %v4414_v11  ;;  %v4424_v17 = vld [vmem:[#allocation12 + $0x30] sm:$0xff]   ;;  %v4475_v25 = vld [vmem:[#allocation13 + $0x28] sm:$0xff]   ;;  %s2648_s17 = sld [smem:[#allocation2 + $0x6]]  ;;  %s2650_s18 = sld [smem:[#allocation2 + $0x8]] }
  0x7f   :  { %3101 = vmatprep.subr.bf16.mxu1 %v4222_v1  ;;  %v4418_v14 = vld [vmem:[#allocation13 + $0x18] sm:$0xff]   ;;  %v172_v15 = vmul.f32 %v170_v12, %v4410_v10  ;;  %v4429_v18 = vld [vmem:[%s5540_s5] sm:$0xff]  ;;  %v4471_v24 = vld [vmem:[#allocation13 + $0x20] sm:$0xff]   ;;  %s2653_s19 = sld [smem:[#allocation2 + $0xa]]  ;;  %s2652_s20 = sld [smem:[#allocation2 + $0x9]] }
  0x80   :  { %3082 = vmatpush3.bf16.msra.mxu0 %v4380_v2  ;;  %v4434_v19 = vld [vmem:[%s5540_s5 + $0x8] sm:$0xff]  ;;  %v2627_v28 = vld [vmem:[#allocation9] ss:$0 sm:$0xff]  ;;  %v4508_v38 = vld [vmem:[%s5543_s8] ss:$0 sm:$0xff]  ;;  %v371_v39 = vstv %s2625_s13  ;;  %s2654_s23 = sld [smem:[#allocation2 + $0xb]] }
  0x81   :  { %3083 = vmatprep.subr.bf16.mxu0 %v4222_v1  ;;  %v4439_v20 = vadd.f32 %v172_v15, %v4429_v18  ;;  %v4442_v21 = vadd.f32 %v173_v16, %v4434_v19  ;;  %v4446_v22 = vld [vmem:[#allocation12 + $0x38] sm:$0xff]   ;;  %v4478_v26 = vld [vmem:[#allocation13 + $0x30] sm:$0xff]   ;;  %v368_v41 = vstv %s177_s2  ;;  %v378_v43 = vstv %s2626_s10  ;;  %s2657_s24 = sld [smem:[#allocation2 + $0xd]]  ;;  %s2656_s25 = sld [smem:[#allocation2 + $0xc]] }
  0x82   :  { %3102 = vmatpush3.bf16.msra.mxu1 %v4398_v6  ;;  %v4482_v27 = vld [vmem:[#allocation13 + $0x38] sm:$0xff]   ;;  %v376_v42 = vld [vmem:[#allocation7] sm:$0xff]  ;;  %s2658_s1 = sld [smem:[#allocation2 + $0xe]]  ;;  %s2661_s4 = sld [smem:[#allocation2 + $0x10]] }
  0x83   :  { %3103 = vmatprep.subr.bf16.mxu1 %v4222_v1  ;;  %v180_v23 = vpack.c.bf16 %v4442_v21, %v4439_v20  ;;  %v372_v45 = vmul.f32 %v371_v39, %v4439_v20  ;;  %v377_v48 = vld [vmem:[#allocation7 + $0x8] sm:$0xff]  ;;  %v379_v50 = vmul.f32 %v378_v43, %v376_v42  ;;  %v373_v52 = vmul.f32 %v371_v39, %v4442_v21  ;;  %v2647_v13 = vld [vmem:[#allocation9 + $0x1] ss:$0 sm:$0xff]  ;;  %s2660_s12 = sld [smem:[#allocation2 + $0xf]]  ;;  %s2662_s26 = sld [smem:[#allocation2 + $0x11]] }
  0x84   :  { %3084 = vmatpush3.bf16.msra.mxu0 %v4388_v3  ;;  %v380_v56 = vmul.f32 %v378_v43, %v377_v48  ;;  %s2665_s6 = sld [smem:[#allocation2 + $0x13]]  ;;  %s2664_s28 = sld [smem:[#allocation2 + $0x12]] }
  0x85   :  { %3085 = vmatprep.subr.bf16.mxu0 %v4222_v1  ;;  %s2666_s7 = sld [smem:[#allocation2 + $0x14]]  ;;  %s2669_s2 = sld [smem:[#allocation2 + $0x16]] }
  0x86   :  { %3104 = vmatpush3.bf16.msra.mxu1 %v4404_v8  ;;  %s2668_s10 = sld [smem:[#allocation2 + $0x15]]  ;;  %s2670_s0 = sld [smem:[#allocation2 + $0x17]] }
  0x87   :  { %3105 = vmatprep.subr.bf16.mxu1 %v4222_v1  ;;  %s2694_s29 = sld [smem:[#allocation2 + $0x29]] }
  0x88   :  { %3086 = vmatpush3.bf16.msra.mxu0 %v4391_v4 }
  0x89   :  { %3087 = vmatprep.subr.bf16.mxu0 %v4222_v1 }
  0x8a   :  { %3106 = vmatpush3.bf16.msra.mxu1 %v4418_v14 }
  0x8b   :  { %3107 = vmatprep.subr.bf16.mxu1 %v4222_v1 }
  0x8c   :  { %3088 = vmatpush3.bf16.msra.mxu0 %v4400_v7 }
  0x8d   :  { %3089 = vmatprep.subr.bf16.mxu0 %v4222_v1 }
  0x8e   :  { %3108 = vmatpush3.bf16.msra.mxu1 %v4471_v24 }
  0x8f   :  { %3109 = vmatprep.subr.bf16.mxu1 %v4222_v1 }
  0x90   :  { %3090 = vmatpush3.bf16.msra.mxu0 %v4408_v9 }
  0x91   :  { %3091 = vmatprep.subr.bf16.mxu0 %v4222_v1 }
  0x92   :  { %3110 = vmatpush3.bf16.msra.mxu1 %v4475_v25 }
  0x93   :  { %3111 = vmatprep.subr.bf16.mxu1 %v4222_v1 }
  0x94   :  { %3092 = vmatpush3.bf16.msra.mxu0 %v4424_v17 }
  0x95   :  { %3093 = vmatprep.subr.bf16.mxu0 %v4222_v1 }
  0x96   :  { %3112 = vmatpush3.bf16.msra.mxu1 %v4478_v26 }
  0x97   :  { %3113 = vmatprep.subr.bf16.mxu1 %v4222_v1 }
  0x98   :  { %3094 = vmatpush3.bf16.msra.mxu0 %v4446_v22 }
  0x99   :  { %3119 = vmatprep.subr.bf16.mxu0 %v4222_v1 }
  0x9a   :  { %3114 = vmatpush3.bf16.msra.mxu1 %v4482_v27 }
  0x9b   :  { %3096 = vmatmul.mubr.bf16.vlgmr.msra.gmra.mrb[0].mxu0 %v180_v23  ;;  %3139 = vmatprep.subr.bf16.mxu1 %v4222_v1 }
  0x9c   :  { %3120 = vmatpush3.bf16.msra.mxu0 %v4375_v0  ;;  %3135 = vmatprep.mubr.msk.bf16.mxu0 %vm4223_vm0, %v4222_v1 }
  0x9d   :  { %3121 = vmatprep.subr.bf16.mxu0 %v4222_v1 }
  0xa0   :  { %3122 = vmatpush3.bf16.msra.mxu0 %v4380_v2 }
  0xa1   :  { %3123 = vmatprep.subr.bf16.mxu0 %v4222_v1 }
  0xa4   :  { %3124 = vmatpush3.bf16.msra.mxu0 %v4388_v3 }
  0xa5   :  { %3125 = vmatprep.subr.bf16.mxu0 %v4222_v1 }
  0xa8   :  { %3126 = vmatpush3.bf16.msra.mxu0 %v4391_v4 }
  0xa9   :  { %3127 = vmatprep.subr.bf16.mxu0 %v4222_v1 }
  0xac   :  { %3128 = vmatpush3.bf16.msra.mxu0 %v4400_v7 }
  0xad   :  { %3129 = vmatprep.subr.bf16.mxu0 %v4222_v1 }
  0xb0   :  { %3130 = vmatpush3.bf16.msra.mxu0 %v4408_v9 }
  0xb1   :  { %3131 = vmatprep.subr.bf16.mxu0 %v4222_v1 }
  0xb4   :  { %3132 = vmatpush3.bf16.msra.mxu0 %v4424_v17 }
  0xb5   :  { %3133 = vmatprep.subr.bf16.mxu0 %v4222_v1 }
  0xb8   :  { %3134 = vmatpush3.bf16.msra.mxu0 %v4446_v22 }
  0xb9   :  { %3159 = vmatprep.subr.bf16.mxu0 %v4222_v1 }
 0x16e   :  { %v269_v29 = vpop.f32.mrb[0].mxu0 }
 0x16f   :  { %v270_v30 = vadd.f32 %v2627_v28, %v269_v29  ;;  %v3097_v31 = vpop.f32.mrb[1].mxu0 }
 0x170   :  { %v272_v32 = vpop.f32.mrb[2].mxu0 }
 0x171   :  { %v273_v33 = vadd.f32 %v2627_v28, %v272_v32  ;;  %v3098_v34 = vpop.f32.mrb[3].mxu0  ;;  %3911 = vtanh.f32 %v270_v30 }
 0x172   :  { %v487_v34 = vstv %s2645_s15 }
 0x173   :  { %3913 = vtanh.f32 %v273_v33  ;;  %v484_v33 = vstv %s2644_s3  ;;  %s2673_s3 = sld [smem:[#allocation2 + $0x19]] }
 0x17b   :  { %v3912_v35 = vpop.eup %3911 }
 0x17d   :  { %v3914_v36 = vpop.eup %3913 }
 0x17e   :  { %v278_v37 = vpack.c.bf16 %v3914_v36, %v3912_v35  ;;  %v493_v35 = vld [vmem:[#allocation7 + $0x10] sm:$0xff]  ;;  %v495_v36 = vstv %s2646_s27  ;;  %s2672_s27 = sld [smem:[#allocation2 + $0x18]] }
 0x180   :  { %3116 = vmatmul.mubr.bf16.vlgmr.msra.gmra.mrb[0].mxu1 %v278_v37 }
 0x181   :  { %3140 = vmatpush3.bf16.msra.mxu1 %v4394_v5  ;;  %3155 = vmatprep.mubr.msk.bf16.mxu1 %vm4223_vm0, %v4222_v1 }
 0x182   :  { %3141 = vmatprep.subr.bf16.mxu1 %v4222_v1 }
 0x185   :  { %3142 = vmatpush3.bf16.msra.mxu1 %v4398_v6 }
 0x186   :  { %3143 = vmatprep.subr.bf16.mxu1 %v4222_v1 }
 0x189   :  { %3144 = vmatpush3.bf16.msra.mxu1 %v4404_v8 }
 0x18a   :  { %3145 = vmatprep.subr.bf16.mxu1 %v4222_v1 }
 0x18d   :  { %3146 = vmatpush3.bf16.msra.mxu1 %v4418_v14 }
 0x18e   :  { %3147 = vmatprep.subr.bf16.mxu1 %v4222_v1 }
 0x191   :  { %3148 = vmatpush3.bf16.msra.mxu1 %v4471_v24 }
 0x192   :  { %3149 = vmatprep.subr.bf16.mxu1 %v4222_v1 }
 0x195   :  { %3150 = vmatpush3.bf16.msra.mxu1 %v4475_v25 }
 0x196   :  { %3151 = vmatprep.subr.bf16.mxu1 %v4222_v1 }
 0x199   :  { %3152 = vmatpush3.bf16.msra.mxu1 %v4478_v26 }
 0x19a   :  { %3153 = vmatprep.subr.bf16.mxu1 %v4222_v1 }
 0x19d   :  { %3154 = vmatpush3.bf16.msra.mxu1 %v4482_v27 }
 0x19e   :  { %3179 = vmatprep.subr.bf16.mxu1 %v4222_v1 }
 0x253   :  { %v361_v40 = vpop.f32.mrb[0].mxu1 }
 0x254   :  { %v362_v44 = vadd.f32 %v4508_v38, %v361_v40  ;;  %v3117_v46 = vpop.f32.mrb[1].mxu1 }
 0x255   :  { %v364_v47 = vpop.f32.mrb[2].mxu1 }
 0x256   :  { %v369_v49 = vmul.f32 %v368_v41, %v362_v44  ;;  %v365_v51 = vadd.f32 %v4508_v38, %v364_v47  ;;  %v3118_v53 = vpop.f32.mrb[3].mxu1  ;;  %v496_v44 = vmul.f32 %v495_v36, %v493_v35 }
 0x258   :  { %v374_v54 = vadd.f32 %v372_v45, %v369_v49  ;;  %v370_v55 = vmul.f32 %v368_v41, %v365_v51  ;;  %v494_v41 = vld [vmem:[#allocation7 + $0x18] sm:$0xff] }
 0x25a   :  { %v381_v57 = vadd.f32 %v379_v50, %v374_v54  ;;  %v375_v58 = vadd.f32 %v373_v52, %v370_v55  ;;  %v497_v50 = vmul.f32 %v495_v36, %v494_v41 }
 0x25c   :  { %v383_v59 = vmul.f32 %v381_v57, %v4410_v10  ;;  %v382_v60 = vadd.f32 %v380_v56, %v375_v58 }
 0x25e   :  { %v384_v61 = vmul.f32 %v382_v60, %v4414_v11  ;;  %v4517_v62 = vadd.f32 %v383_v59, %v4429_v18  ;;  %v2651_v59 = vld [vmem:[#allocation9 + $0x2] ss:$0 sm:$0xff] }
 0x260   :  { %v4520_v63 = vadd.f32 %v384_v61, %v4434_v19  ;;  %v488_v43 = vmul.f32 %v487_v34, %v4517_v62 }
 0x262   :  { %v392_v12 = vpack.c.bf16 %v4520_v63, %v4517_v62  ;;  %v489_v49 = vmul.f32 %v487_v34, %v4520_v63  ;;  %v611_v34 = vld [vmem:[#allocation7 + $0x28] sm:$0xff] }
 0x264   :  { %3136 = vmatmul.mubr.bf16.vlgmr.msra.gmra.mrb[4].mxu0 %v392_v12 }
 0x265   :  { %3160 = vmatpush3.bf16.msra.mxu0 %v4375_v0  ;;  %3175 = vmatprep.mubr.msk.bf16.mxu0 %vm4223_vm0, %v4222_v1 }
 0x266   :  { %3161 = vmatprep.subr.bf16.mxu0 %v4222_v1 }
 0x269   :  { %3162 = vmatpush3.bf16.msra.mxu0 %v4380_v2 }
 0x26a   :  { %3163 = vmatprep.subr.bf16.mxu0 %v4222_v1 }
 0x26d   :  { %3164 = vmatpush3.bf16.msra.mxu0 %v4388_v3 }
 0x26e   :  { %3165 = vmatprep.subr.bf16.mxu0 %v4222_v1 }
 0x271   :  { %3166 = vmatpush3.bf16.msra.mxu0 %v4391_v4 }
 0x272   :  { %3167 = vmatprep.subr.bf16.mxu0 %v4222_v1 }
 0x275   :  { %3168 = vmatpush3.bf16.msra.mxu0 %v4400_v7 }
 0x276   :  { %3169 = vmatprep.subr.bf16.mxu0 %v4222_v1 }
 0x279   :  { %3170 = vmatpush3.bf16.msra.mxu0 %v4408_v9 }
 0x27a   :  { %3171 = vmatprep.subr.bf16.mxu0 %v4222_v1 }
 0x27d   :  { %3172 = vmatpush3.bf16.msra.mxu0 %v4424_v17 }
 0x27e   :  { %3173 = vmatprep.subr.bf16.mxu0 %v4222_v1 }
 0x281   :  { %3174 = vmatpush3.bf16.msra.mxu0 %v4446_v22 }
 0x282   :  { %3199 = vmatprep.subr.bf16.mxu0 %v4222_v1 }
 0x337   :  { %v433_v15 = vpop.f32.mrb[4].mxu0 }
 0x338   :  { %v434_v16 = vadd.f32 %v2647_v13, %v433_v15  ;;  %v3137_v20 = vpop.f32.mrb[5].mxu0 }
 0x339   :  { %v436_v21 = vpop.f32.mrb[6].mxu0 }
 0x33a   :  { %v437_v23 = vadd.f32 %v2647_v13, %v436_v21  ;;  %v3138_v28 = vpop.f32.mrb[7].mxu0  ;;  %3915 = vtanh.f32 %v434_v16 }
 0x33b   :  { %v604_v28 = vstv %s2649_s16  ;;  %s2674_s16 = sld [smem:[#allocation2 + $0x1a]] }
 0x33c   :  { %3917 = vtanh.f32 %v437_v23  ;;  %v601_v23 = vstv %s2648_s17  ;;  %s2677_s17 = sld [smem:[#allocation2 + $0x1c]] }
 0x344   :  { %v3916_v29 = vpop.eup %3915 }
 0x346   :  { %v3918_v30 = vpop.eup %3917 }
 0x347   :  { %v442_v31 = vpack.c.bf16 %v3918_v30, %v3916_v29  ;;  %v610_v29 = vld [vmem:[#allocation7 + $0x20] sm:$0xff]  ;;  %v612_v30 = vstv %s2650_s18  ;;  %s2676_s18 = sld [smem:[#allocation2 + $0x1b]] }
 0x349   :  { %3156 = vmatmul.mubr.bf16.vlgmr.msra.gmra.mrb[4].mxu1 %v442_v31 }
 0x34a   :  { %3180 = vmatpush3.bf16.msra.mxu1 %v4394_v5  ;;  %3195 = vmatprep.mubr.msk.bf16.mxu1 %vm4223_vm0, %v4222_v1 }
 0x34b   :  { %3181 = vmatprep.subr.bf16.mxu1 %v4222_v1 }
 0x34e   :  { %3182 = vmatpush3.bf16.msra.mxu1 %v4398_v6 }
 0x34f   :  { %3183 = vmatprep.subr.bf16.mxu1 %v4222_v1 }
 0x352   :  { %3184 = vmatpush3.bf16.msra.mxu1 %v4404_v8 }
 0x353   :  { %3185 = vmatprep.subr.bf16.mxu1 %v4222_v1 }
 0x356   :  { %3186 = vmatpush3.bf16.msra.mxu1 %v4418_v14 }
 0x357   :  { %3187 = vmatprep.subr.bf16.mxu1 %v4222_v1 }
 0x35a   :  { %3188 = vmatpush3.bf16.msra.mxu1 %v4471_v24 }
 0x35b   :  { %3189 = vmatprep.subr.bf16.mxu1 %v4222_v1 }
 0x35e   :  { %3190 = vmatpush3.bf16.msra.mxu1 %v4475_v25 }
 0x35f   :  { %3191 = vmatprep.subr.bf16.mxu1 %v4222_v1 }
 0x362   :  { %3192 = vmatpush3.bf16.msra.mxu1 %v4478_v26 }
 0x363   :  { %3193 = vmatprep.subr.bf16.mxu1 %v4222_v1 }
 0x366   :  { %3194 = vmatpush3.bf16.msra.mxu1 %v4482_v27 }
 0x367   :  { %3219 = vmatprep.subr.bf16.mxu1 %v4222_v1 }
 0x41c   :  { %v477_v32 = vpop.f32.mrb[4].mxu1 }
 0x41d   :  { %v478_v37 = vadd.f32 %v4508_v38, %v477_v32  ;;  %v3157_v39 = vpop.f32.mrb[5].mxu1 }
 0x41e   :  { %v480_v40 = vpop.f32.mrb[6].mxu1 }
 0x41f   :  { %v485_v42 = vmul.f32 %v484_v33, %v478_v37  ;;  %v481_v45 = vadd.f32 %v4508_v38, %v480_v40  ;;  %v3158_v46 = vpop.f32.mrb[7].mxu1  ;;  %v613_v37 = vmul.f32 %v612_v30, %v610_v29 }
 0x421   :  { %v490_v47 = vadd.f32 %v488_v43, %v485_v42  ;;  %v486_v48 = vmul.f32 %v484_v33, %v481_v45 }
 0x423   :  { %v498_v51 = vadd.f32 %v496_v44, %v490_v47  ;;  %v491_v52 = vadd.f32 %v489_v49, %v486_v48  ;;  %v614_v44 = vmul.f32 %v612_v30, %v611_v34 }
 0x425   :  { %v500_v53 = vmul.f32 %v498_v51, %v4410_v10  ;;  %v499_v54 = vadd.f32 %v497_v50, %v491_v52 }
 0x427   :  { %v501_v55 = vmul.f32 %v499_v54, %v4414_v11  ;;  %v4567_v56 = vadd.f32 %v500_v53, %v4429_v18  ;;  %v2655_v53 = vld [vmem:[#allocation9 + $0x3] ss:$0 sm:$0xff] }
 0x429   :  { %v4570_v57 = vadd.f32 %v501_v55, %v4434_v19  ;;  %v605_v36 = vmul.f32 %v604_v28, %v4567_v56 }
 0x42b   :  { %v509_v58 = vpack.c.bf16 %v4570_v57, %v4567_v56  ;;  %v606_v43 = vmul.f32 %v604_v28, %v4570_v57  ;;  %v728_v28 = vld [vmem:[#allocation7 + $0x38] sm:$0xff] }
 0x42d   :  { %3176 = vmatmul.mubr.bf16.vlgmr.msra.gmra.mrb[8].mxu0 %v509_v58 }
 0x42e   :  { %3200 = vmatpush3.bf16.msra.mxu0 %v4375_v0  ;;  %3215 = vmatprep.mubr.msk.bf16.mxu0 %vm4223_vm0, %v4222_v1 }
 0x42f   :  { %3201 = vmatprep.subr.bf16.mxu0 %v4222_v1 }
 0x432   :  { %3202 = vmatpush3.bf16.msra.mxu0 %v4380_v2 }
 0x433   :  { %3203 = vmatprep.subr.bf16.mxu0 %v4222_v1 }
 0x436   :  { %3204 = vmatpush3.bf16.msra.mxu0 %v4388_v3 }
 0x437   :  { %3205 = vmatprep.subr.bf16.mxu0 %v4222_v1 }
 0x43a   :  { %3206 = vmatpush3.bf16.msra.mxu0 %v4391_v4 }
 0x43b   :  { %3207 = vmatprep.subr.bf16.mxu0 %v4222_v1 }
 0x43e   :  { %3208 = vmatpush3.bf16.msra.mxu0 %v4400_v7 }
 0x43f   :  { %3209 = vmatprep.subr.bf16.mxu0 %v4222_v1 }
 0x442   :  { %3210 = vmatpush3.bf16.msra.mxu0 %v4408_v9 }
 0x443   :  { %3211 = vmatprep.subr.bf16.mxu0 %v4222_v1 }
 0x446   :  { %3212 = vmatpush3.bf16.msra.mxu0 %v4424_v17 }
 0x447   :  { %3213 = vmatprep.subr.bf16.mxu0 %v4222_v1 }
 0x44a   :  { %3214 = vmatpush3.bf16.msra.mxu0 %v4446_v22 }
 0x44b   :  { %3239 = vmatprep.subr.bf16.mxu0 %v4222_v1 }
 0x500   :  { %v550_v60 = vpop.f32.mrb[8].mxu0 }
 0x501   :  { %v551_v61 = vadd.f32 %v2651_v59, %v550_v60  ;;  %v3177_v62 = vpop.f32.mrb[9].mxu0 }
 0x502   :  { %v553_v63 = vpop.f32.mrb[10].mxu0 }
 0x503   :  { %v554_v12 = vadd.f32 %v2651_v59, %v553_v63  ;;  %v3178_v13 = vpop.f32.mrb[11].mxu0  ;;  %3919 = vtanh.f32 %v551_v61 }
 0x504   :  { %v721_v13 = vstv %s2653_s19  ;;  %s2678_s19 = sld [smem:[#allocation2 + $0x1d]] }
 0x505   :  { %3921 = vtanh.f32 %v554_v12  ;;  %v718_v12 = vstv %s2652_s20  ;;  %s2681_s20 = sld [smem:[#allocation2 + $0x1f]] }
 0x50d   :  { %v3920_v15 = vpop.eup %3919 }
 0x50f   :  { %v3922_v16 = vpop.eup %3921 }
 0x510   :  { %v559_v20 = vpack.c.bf16 %v3922_v16, %v3920_v15  ;;  %v727_v15 = vld [vmem:[#allocation7 + $0x30] sm:$0xff]  ;;  %v729_v16 = vstv %s2654_s23  ;;  %s2680_s23 = sld [smem:[#allocation2 + $0x1e]] }
 0x512   :  { %3196 = vmatmul.mubr.bf16.vlgmr.msra.gmra.mrb[8].mxu1 %v559_v20 }
 0x513   :  { %3220 = vmatpush3.bf16.msra.mxu1 %v4394_v5  ;;  %3235 = vmatprep.mubr.msk.bf16.mxu1 %vm4223_vm0, %v4222_v1 }
 0x514   :  { %3221 = vmatprep.subr.bf16.mxu1 %v4222_v1 }
 0x517   :  { %3222 = vmatpush3.bf16.msra.mxu1 %v4398_v6 }
 0x518   :  { %3223 = vmatprep.subr.bf16.mxu1 %v4222_v1 }
 0x51b   :  { %3224 = vmatpush3.bf16.msra.mxu1 %v4404_v8 }
 0x51c   :  { %3225 = vmatprep.subr.bf16.mxu1 %v4222_v1 }
 0x51f   :  { %3226 = vmatpush3.bf16.msra.mxu1 %v4418_v14 }
 0x520   :  { %3227 = vmatprep.subr.bf16.mxu1 %v4222_v1 }
 0x523   :  { %3228 = vmatpush3.bf16.msra.mxu1 %v4471_v24 }
 0x524   :  { %3229 = vmatprep.subr.bf16.mxu1 %v4222_v1 }
 0x527   :  { %3230 = vmatpush3.bf16.msra.mxu1 %v4475_v25 }
 0x528   :  { %3231 = vmatprep.subr.bf16.mxu1 %v4222_v1 }
 0x52b   :  { %3232 = vmatpush3.bf16.msra.mxu1 %v4478_v26 }
 0x52c   :  { %3233 = vmatprep.subr.bf16.mxu1 %v4222_v1 }
 0x52f   :  { %3234 = vmatpush3.bf16.msra.mxu1 %v4482_v27 }
 0x530   :  { %3259 = vmatprep.subr.bf16.mxu1 %v4222_v1 }
 0x5e5   :  { %v594_v21 = vpop.f32.mrb[8].mxu1 }
 0x5e6   :  { %v595_v31 = vadd.f32 %v4508_v38, %v594_v21  ;;  %v3197_v32 = vpop.f32.mrb[9].mxu1 }
 0x5e7   :  { %v597_v33 = vpop.f32.mrb[10].mxu1 }
 0x5e8   :  { %v602_v35 = vmul.f32 %v601_v23, %v595_v31  ;;  %v598_v39 = vadd.f32 %v4508_v38, %v597_v33  ;;  %v3198_v40 = vpop.f32.mrb[11].mxu1  ;;  %v730_v31 = vmul.f32 %v729_v16, %v727_v15 }
 0x5ea   :  { %v607_v41 = vadd.f32 %v605_v36, %v602_v35  ;;  %v603_v42 = vmul.f32 %v601_v23, %v598_v39 }
 0x5ec   :  { %v615_v45 = vadd.f32 %v613_v37, %v607_v41  ;;  %v608_v46 = vadd.f32 %v606_v43, %v603_v42  ;;  %v731_v37 = vmul.f32 %v729_v16, %v728_v28 }
 0x5ee   :  { %v617_v47 = vmul.f32 %v615_v45, %v4410_v10  ;;  %v616_v48 = vadd.f32 %v614_v44, %v608_v46 }
 0x5f0   :  { %v618_v49 = vmul.f32 %v616_v48, %v4414_v11  ;;  %v4617_v50 = vadd.f32 %v617_v47, %v4429_v18  ;;  %v2659_v47 = vld [vmem:[#allocation9 + $0x4] ss:$0 sm:$0xff] }
 0x5f2   :  { %v4620_v51 = vadd.f32 %v618_v49, %v4434_v19  ;;  %v722_v30 = vmul.f32 %v721_v13, %v4617_v50 }
 0x5f4   :  { %v626_v52 = vpack.c.bf16 %v4620_v51, %v4617_v50  ;;  %v723_v36 = vmul.f32 %v721_v13, %v4620_v51  ;;  %v845_v13 = vld [vmem:[#allocation7 + $0x48] sm:$0xff] }
 0x5f6   :  { %3216 = vmatmul.mubr.bf16.vlgmr.msra.gmra.mrb[12].mxu0 %v626_v52 }
 0x5f7   :  { %3240 = vmatpush3.bf16.msra.mxu0 %v4375_v0  ;;  %3255 = vmatprep.mubr.msk.bf16.mxu0 %vm4223_vm0, %v4222_v1 }
 0x5f8   :  { %3241 = vmatprep.subr.bf16.mxu0 %v4222_v1 }
 0x5fb   :  { %3242 = vmatpush3.bf16.msra.mxu0 %v4380_v2 }
 0x5fc   :  { %3243 = vmatprep.subr.bf16.mxu0 %v4222_v1 }
 0x5ff   :  { %3244 = vmatpush3.bf16.msra.mxu0 %v4388_v3 }
 0x600   :  { %3245 = vmatprep.subr.bf16.mxu0 %v4222_v1 }
 0x603   :  { %3246 = vmatpush3.bf16.msra.mxu0 %v4391_v4 }
 0x604   :  { %3247 = vmatprep.subr.bf16.mxu0 %v4222_v1 }
 0x607   :  { %3248 = vmatpush3.bf16.msra.mxu0 %v4400_v7 }
 0x608   :  { %3249 = vmatprep.subr.bf16.mxu0 %v4222_v1 }
 0x60b   :  { %3250 = vmatpush3.bf16.msra.mxu0 %v4408_v9 }
 0x60c   :  { %3251 = vmatprep.subr.bf16.mxu0 %v4222_v1 }
 0x60f   :  { %3252 = vmatpush3.bf16.msra.mxu0 %v4424_v17 }
 0x610   :  { %3253 = vmatprep.subr.bf16.mxu0 %v4222_v1 }
 0x613   :  { %3254 = vmatpush3.bf16.msra.mxu0 %v4446_v22 }
 0x614   :  { %3279 = vmatprep.subr.bf16.mxu0 %v4222_v1 }
 0x6c9   :  { %v667_v54 = vpop.f32.mrb[12].mxu0 }
 0x6ca   :  { %v668_v55 = vadd.f32 %v2655_v53, %v667_v54  ;;  %v3217_v56 = vpop.f32.mrb[13].mxu0 }
 0x6cb   :  { %v670_v57 = vpop.f32.mrb[14].mxu0 }
 0x6cc   :  { %v671_v58 = vadd.f32 %v2655_v53, %v670_v57  ;;  %v3218_v59 = vpop.f32.mrb[15].mxu0  ;;  %3923 = vtanh.f32 %v668_v55 }
 0x6cd   :  { %v838_v59 = vstv %s2657_s24  ;;  %s2682_s24 = sld [smem:[#allocation2 + $0x20]] }
 0x6ce   :  { %3925 = vtanh.f32 %v671_v58  ;;  %v835_v58 = vstv %s2656_s25  ;;  %s2685_s25 = sld [smem:[#allocation2 + $0x22]] }
 0x6d6   :  { %v3924_v60 = vpop.eup %3923 }
 0x6d8   :  { %v3926_v61 = vpop.eup %3925 }
 0x6d9   :  { %v676_v62 = vpack.c.bf16 %v3926_v61, %v3924_v60  ;;  %v844_v60 = vld [vmem:[#allocation7 + $0x40] sm:$0xff]  ;;  %v846_v61 = vstv %s2658_s1  ;;  %s2684_s1 = sld [smem:[#allocation2 + $0x21]] }
 0x6db   :  { %3236 = vmatmul.mubr.bf16.vlgmr.msra.gmra.mrb[12].mxu1 %v676_v62 }
 0x6dc   :  { %3260 = vmatpush3.bf16.msra.mxu1 %v4394_v5  ;;  %3275 = vmatprep.mubr.msk.bf16.mxu1 %vm4223_vm0, %v4222_v1 }
 0x6dd   :  { %3261 = vmatprep.subr.bf16.mxu1 %v4222_v1 }
 0x6e0   :  { %3262 = vmatpush3.bf16.msra.mxu1 %v4398_v6 }
 0x6e1   :  { %3263 = vmatprep.subr.bf16.mxu1 %v4222_v1 }
 0x6e4   :  { %3264 = vmatpush3.bf16.msra.mxu1 %v4404_v8 }
 0x6e5   :  { %3265 = vmatprep.subr.bf16.mxu1 %v4222_v1 }
 0x6e8   :  { %3266 = vmatpush3.bf16.msra.mxu1 %v4418_v14 }
 0x6e9   :  { %3267 = vmatprep.subr.bf16.mxu1 %v4222_v1 }
 0x6ec   :  { %3268 = vmatpush3.bf16.msra.mxu1 %v4471_v24 }
 0x6ed   :  { %3269 = vmatprep.subr.bf16.mxu1 %v4222_v1 }
 0x6f0   :  { %3270 = vmatpush3.bf16.msra.mxu1 %v4475_v25 }
 0x6f1   :  { %3271 = vmatprep.subr.bf16.mxu1 %v4222_v1 }
 0x6f4   :  { %3272 = vmatpush3.bf16.msra.mxu1 %v4478_v26 }
 0x6f5   :  { %3273 = vmatprep.subr.bf16.mxu1 %v4222_v1 }
 0x6f8   :  { %3274 = vmatpush3.bf16.msra.mxu1 %v4482_v27 }
 0x6f9   :  { %3299 = vmatprep.subr.bf16.mxu1 %v4222_v1 }
 0x7ae   :  { %v711_v63 = vpop.f32.mrb[12].mxu1 }
 0x7af   :  { %v712_v20 = vadd.f32 %v4508_v38, %v711_v63  ;;  %v3237_v21 = vpop.f32.mrb[13].mxu1 }
 0x7b0   :  { %v714_v23 = vpop.f32.mrb[14].mxu1 }
 0x7b1   :  { %v719_v29 = vmul.f32 %v718_v12, %v712_v20  ;;  %v715_v32 = vadd.f32 %v4508_v38, %v714_v23  ;;  %v3238_v33 = vpop.f32.mrb[15].mxu1  ;;  %v847_v20 = vmul.f32 %v846_v61, %v844_v60 }
 0x7b3   :  { %v724_v34 = vadd.f32 %v722_v30, %v719_v29  ;;  %v720_v35 = vmul.f32 %v718_v12, %v715_v32 }
 0x7b5   :  { %v732_v39 = vadd.f32 %v730_v31, %v724_v34  ;;  %v725_v40 = vadd.f32 %v723_v36, %v720_v35  ;;  %v848_v31 = vmul.f32 %v846_v61, %v845_v13 }
 0x7b7   :  { %v734_v41 = vmul.f32 %v732_v39, %v4410_v10  ;;  %v733_v42 = vadd.f32 %v731_v37, %v725_v40 }
 0x7b9   :  { %v735_v43 = vmul.f32 %v733_v42, %v4414_v11  ;;  %v4667_v44 = vadd.f32 %v734_v41, %v4429_v18 }
 0x7bb   :  { %v4670_v45 = vadd.f32 %v735_v43, %v4434_v19  ;;  %v839_v16 = vmul.f32 %v838_v59, %v4667_v44 }
 0x7bd   :  { %v743_v46 = vpack.c.bf16 %v4670_v45, %v4667_v44  ;;  %v840_v30 = vmul.f32 %v838_v59, %v4670_v45  ;;  %v963_v45 = vstv %s2662_s26  ;;  %s2688_s26 = sld [smem:[#allocation2 + $0x24]] }
 0x7bf   :  { %3256 = vmatmul.mubr.bf16.vlgmr.msra.gmra.mrb[16].mxu0 %v743_v46 }
 0x7c0   :  { %3280 = vmatpush3.bf16.msra.mxu0 %v4375_v0  ;;  %3295 = vmatprep.mubr.msk.bf16.mxu0 %vm4223_vm0, %v4222_v1 }
 0x7c1   :  { %3281 = vmatprep.subr.bf16.mxu0 %v4222_v1 }
 0x7c4   :  { %3282 = vmatpush3.bf16.msra.mxu0 %v4380_v2 }
 0x7c5   :  { %3283 = vmatprep.subr.bf16.mxu0 %v4222_v1 }
 0x7c8   :  { %3284 = vmatpush3.bf16.msra.mxu0 %v4388_v3 }
 0x7c9   :  { %3285 = vmatprep.subr.bf16.mxu0 %v4222_v1 }
 0x7cc   :  { %3286 = vmatpush3.bf16.msra.mxu0 %v4391_v4 }
 0x7cd   :  { %3287 = vmatprep.subr.bf16.mxu0 %v4222_v1 }
 0x7d0   :  { %3288 = vmatpush3.bf16.msra.mxu0 %v4400_v7 }
 0x7d1   :  { %3289 = vmatprep.subr.bf16.mxu0 %v4222_v1 }
 0x7d4   :  { %3290 = vmatpush3.bf16.msra.mxu0 %v4408_v9 }
 0x7d5   :  { %3291 = vmatprep.subr.bf16.mxu0 %v4222_v1 }
 0x7d8   :  { %3292 = vmatpush3.bf16.msra.mxu0 %v4424_v17 }
 0x7d9   :  { %3293 = vmatprep.subr.bf16.mxu0 %v4222_v1 }
 0x7dc   :  { %3294 = vmatpush3.bf16.msra.mxu0 %v4446_v22 }
 0x7dd   :  { %3319 = vmatprep.subr.bf16.mxu0 %v4222_v1 }
 0x892   :  { %v784_v48 = vpop.f32.mrb[16].mxu0 }
 0x893   :  { %v785_v49 = vadd.f32 %v2659_v47, %v784_v48  ;;  %v3257_v50 = vpop.f32.mrb[17].mxu0 }
 0x894   :  { %v787_v51 = vpop.f32.mrb[18].mxu0 }
 0x895   :  { %v788_v52 = vadd.f32 %v2659_v47, %v787_v51  ;;  %v3258_v53 = vpop.f32.mrb[19].mxu0  ;;  %3927 = vtanh.f32 %v785_v49  ;;  %v962_v49 = vld [vmem:[#allocation7 + $0x58] sm:$0xff] }
 0x897   :  { %3929 = vtanh.f32 %v788_v52 }
 0x89f   :  { %v3928_v54 = vpop.eup %3927 }
 0x8a1   :  { %v3930_v55 = vpop.eup %3929 }
 0x8a2   :  { %v793_v56 = vpack.c.bf16 %v3930_v55, %v3928_v54 }
 0x8a4   :  { %3276 = vmatmul.mubr.bf16.vlgmr.msra.gmra.mrb[16].mxu1 %v793_v56 }
 0x8a5   :  { %3300 = vmatpush3.bf16.msra.mxu1 %v4394_v5  ;;  %3315 = vmatprep.mubr.msk.bf16.mxu1 %vm4223_vm0, %v4222_v1 }
 0x8a6   :  { %3301 = vmatprep.subr.bf16.mxu1 %v4222_v1 }
 0x8a9   :  { %3302 = vmatpush3.bf16.msra.mxu1 %v4398_v6 }
 0x8aa   :  { %3303 = vmatprep.subr.bf16.mxu1 %v4222_v1 }
 0x8ad   :  { %3304 = vmatpush3.bf16.msra.mxu1 %v4404_v8 }
 0x8ae   :  { %3305 = vmatprep.subr.bf16.mxu1 %v4222_v1 }
 0x8b1   :  { %3306 = vmatpush3.bf16.msra.mxu1 %v4418_v14 }
 0x8b2   :  { %3307 = vmatprep.subr.bf16.mxu1 %v4222_v1 }
 0x8b5   :  { %3308 = vmatpush3.bf16.msra.mxu1 %v4471_v24 }
 0x8b6   :  { %3309 = vmatprep.subr.bf16.mxu1 %v4222_v1 }
 0x8b9   :  { %3310 = vmatpush3.bf16.msra.mxu1 %v4475_v25 }
 0x8ba   :  { %3311 = vmatprep.subr.bf16.mxu1 %v4222_v1 }
 0x8bd   :  { %3312 = vmatpush3.bf16.msra.mxu1 %v4478_v26 }
 0x8be   :  { %3313 = vmatprep.subr.bf16.mxu1 %v4222_v1 }
 0x8c1   :  { %3314 = vmatpush3.bf16.msra.mxu1 %v4482_v27 }
 0x8c2   :  { %3339 = vmatprep.subr.bf16.mxu1 %v4222_v1 }
 0x977   :  { %v828_v57 = vpop.f32.mrb[16].mxu1 }
 0x978   :  { %v829_v62 = vadd.f32 %v4508_v38, %v828_v57  ;;  %v3277_v63 = vpop.f32.mrb[17].mxu1 }
 0x979   :  { %v831_v12 = vpop.f32.mrb[18].mxu1 }
 0x97a   :  { %v836_v15 = vmul.f32 %v835_v58, %v829_v62  ;;  %v832_v21 = vadd.f32 %v4508_v38, %v831_v12  ;;  %v3278_v23 = vpop.f32.mrb[19].mxu1 }
 0x97c   :  { %v841_v28 = vadd.f32 %v839_v16, %v836_v15  ;;  %v837_v29 = vmul.f32 %v835_v58, %v832_v21  ;;  %v965_v58 = vmul.f32 %v963_v45, %v962_v49  ;;  %v4774_v16 = vld [vmem:[#allocation12] sm:$0xff]  }
 0x97d   :  { %v2667_v21 = vld [vmem:[#allocation9 + $0x6] ss:$0 sm:$0xff] }
 0x97e   :  { %v849_v32 = vadd.f32 %v847_v20, %v841_v28  ;;  %v842_v33 = vadd.f32 %v840_v30, %v837_v29  ;;  %v4796_v20 = vld [vmem:[#allocation12 + $0x28] sm:$0xff]  }
 0x980   :  { %v851_v34 = vmul.f32 %v849_v32, %v4410_v10  ;;  %v850_v35 = vadd.f32 %v848_v31, %v842_v33 }
 0x982   :  { %v852_v36 = vmul.f32 %v850_v35, %v4414_v11  ;;  %v4717_v37 = vadd.f32 %v851_v34, %v4429_v18 }
 0x984   :  { %v4720_v39 = vadd.f32 %v852_v36, %v4434_v19  ;;  %v4814_v36 = vld [vmem:[#allocation13 + $0x10] sm:$0xff]  }
 0x986   :  { %v860_v40 = vpack.c.bf16 %v4720_v39, %v4717_v37 }
 0x988   :  { %3296 = vmatmul.mubr.bf16.vlgmr.msra.gmra.mrb[20].mxu0 %v860_v40  ;;  %v1069_v40 = vstv %s2664_s28  ;;  %s2693_s28 = sld [smem:[#allocation2 + $0x28]] }
 0x989   :  { %3320 = vmatpush3.bf16.msra.mxu0 %v4375_v0  ;;  %3335 = vmatprep.mubr.msk.bf16.mxu0 %vm4223_vm0, %v4222_v1  ;;  %v2663_v0 = vld [vmem:[#allocation9 + $0x5] ss:$0 sm:$0xff] }
 0x98a   :  { %3321 = vmatprep.subr.bf16.mxu0 %v4222_v1 }
 0x98d   :  { %3322 = vmatpush3.bf16.msra.mxu0 %v4380_v2 }
 0x98e   :  { %3323 = vmatprep.subr.bf16.mxu0 %v4222_v1 }
 0x991   :  { %3324 = vmatpush3.bf16.msra.mxu0 %v4388_v3 }
 0x992   :  { %3325 = vmatprep.subr.bf16.mxu0 %v4222_v1 }
 0x995   :  { %3326 = vmatpush3.bf16.msra.mxu0 %v4391_v4 }
 0x996   :  { %3327 = vmatprep.subr.bf16.mxu0 %v4222_v1 }
 0x999   :  { %3328 = vmatpush3.bf16.msra.mxu0 %v4400_v7 }
 0x99a   :  { %3329 = vmatprep.subr.bf16.mxu0 %v4222_v1 }
 0x99d   :  { %3330 = vmatpush3.bf16.msra.mxu0 %v4408_v9 }
 0x99e   :  { %3331 = vmatprep.subr.bf16.mxu0 %v4222_v1 }
 0x9a1   :  { %3332 = vmatpush3.bf16.msra.mxu0 %v4424_v17 }
 0x9a2   :  { %3333 = vmatprep.subr.bf16.mxu0 %v4222_v1 }
 0x9a5   :  { %3334 = vmatpush3.bf16.msra.mxu0 %v4446_v22 }
 0x9a6   :  { %3359 = vmatprep.subr.bf16.mxu0 %v4222_v1 }
 0xa5b   :  { %v901_v2 = vpop.f32.mrb[20].mxu0 }
 0xa5c   :  { %v902_v3 = vadd.f32 %v2663_v0, %v901_v2  ;;  %v3297_v4 = vpop.f32.mrb[21].mxu0  ;;  %v1080_v2 = vstv %s2666_s7  ;;  %s2692_s7 = sld [smem:[#allocation2 + $0x27]] }
 0xa5d   :  { %v904_v41 = vpop.f32.mrb[22].mxu0 }
 0xa5e   :  { %v905_v7 = vadd.f32 %v2663_v0, %v904_v41  ;;  %v3298_v42 = vpop.f32.mrb[23].mxu0  ;;  %3931 = vtanh.f32 %v902_v3  ;;  %v1078_v0 = vld [vmem:[#allocation7 + $0x60] sm:$0xff]  ;;  %v1079_v41 = vld [vmem:[#allocation7 + $0x68] sm:$0xff] }
 0xa5f   :  { %v1081_v42 = vmul.f32 %v1080_v2, %v1078_v0 }
 0xa60   :  { %3933 = vtanh.f32 %v905_v7 }
 0xa68   :  { %v3932_v9 = vpop.eup %3931 }
 0xa6a   :  { %v3934_v43 = vpop.eup %3933 }
 0xa6b   :  { %v910_v44 = vpack.c.bf16 %v3934_v43, %v3932_v9 }
 0xa6d   :  { %3316 = vmatmul.mubr.bf16.vlgmr.msra.gmra.mrb[20].mxu1 %v910_v44 }
 0xa6e   :  { %3340 = vmatpush3.bf16.msra.mxu1 %v4394_v5  ;;  %3355 = vmatprep.mubr.msk.bf16.mxu1 %vm4223_vm0, %v4222_v1 }
 0xa6f   :  { %3341 = vmatprep.subr.bf16.mxu1 %v4222_v1 }
 0xa72   :  { %3342 = vmatpush3.bf16.msra.mxu1 %v4398_v6  ;;  %v952_v6 = vstv %s2660_s12  ;;  %s2689_s12 = sld [smem:[#allocation2 + $0x25]] }
 0xa73   :  { %3343 = vmatprep.subr.bf16.mxu1 %v4222_v1 }
 0xa76   :  { %3344 = vmatpush3.bf16.msra.mxu1 %v4404_v8  ;;  %v955_v8 = vstv %s2661_s4  ;;  %s2686_s4 = sld [smem:[#allocation2 + $0x23]] }
 0xa77   :  { %3345 = vmatprep.subr.bf16.mxu1 %v4222_v1  ;;  %v956_v51 = vmul.f32 %v955_v8, %v4717_v37  ;;  %v957_v57 = vmul.f32 %v955_v8, %v4720_v39  ;;  %v4818_v37 = vld [vmem:[#allocation13 + $0x18] sm:$0xff]  }
 0xa7a   :  { %3346 = vmatpush3.bf16.msra.mxu1 %v4418_v14  ;;  %v961_v14 = vld [vmem:[#allocation7 + $0x50] sm:$0xff] }
 0xa7b   :  { %3347 = vmatprep.subr.bf16.mxu1 %v4222_v1  ;;  %v964_v52 = vmul.f32 %v963_v45, %v961_v14  ;;  %v4834_v45 = vld [vmem:[#allocation10] sm:$0xff] }
 0xa7e   :  { %3348 = vmatpush3.bf16.msra.mxu1 %v4471_v24 }
 0xa7f   :  { %3349 = vmatprep.subr.bf16.mxu1 %v4222_v1 }
 0xa82   :  { %3350 = vmatpush3.bf16.msra.mxu1 %v4475_v25 }
 0xa83   :  { %3351 = vmatprep.subr.bf16.mxu1 %v4222_v1 }
 0xa86   :  { %3352 = vmatpush3.bf16.msra.mxu1 %v4478_v26 }
 0xa87   :  { %3353 = vmatprep.subr.bf16.mxu1 %v4222_v1 }
 0xa8a   :  { %3354 = vmatpush3.bf16.msra.mxu1 %v4482_v27 }
 0xa8b   :  { %3379 = vmatprep.subr.bf16.mxu1 %v4222_v1 }
 0xb40   :  { %v945_v5 = vpop.f32.mrb[20].mxu1 }
 0xb41   :  { %v946_v46 = vadd.f32 %v4508_v38, %v945_v5  ;;  %v3317_v47 = vpop.f32.mrb[21].mxu1 }
 0xb42   :  { %v948_v48 = vpop.f32.mrb[22].mxu1 }
 0xb43   :  { %v953_v50 = vmul.f32 %v952_v6, %v946_v46  ;;  %v949_v53 = vadd.f32 %v4508_v38, %v948_v48  ;;  %v3318_v54 = vpop.f32.mrb[23].mxu1  ;;  %v4837_v48 = vld [vmem:[#allocation10 + $0x8] sm:$0xff] }
 0xb44   :  { %v4872_v54 = vld [vmem:[#allocation12 + $0x30] sm:$0xff]  }
 0xb45   :  { %v958_v55 = vadd.f32 %v956_v51, %v953_v50  ;;  %v954_v56 = vmul.f32 %v952_v6, %v949_v53  ;;  %v1082_v6 = vmul.f32 %v1080_v2, %v1079_v41  ;;  %v4851_v51 = vld [vmem:[%s5540_s5 + $0x8] sm:$0xff] }
 0xb47   :  { %v966_v59 = vadd.f32 %v964_v52, %v958_v55  ;;  %v959_v60 = vadd.f32 %v957_v57, %v954_v56  ;;  %v4876_v55 = vld [vmem:[#allocation12 + $0x38] sm:$0xff]   ;;  %v2671_v56 = vld [vmem:[#allocation9 + $0x7] ss:$0 sm:$0xff] }
 0xb49   :  { %v968_v61 = vmul.f32 %v966_v59, %v4410_v10  ;;  %v967_v62 = vadd.f32 %v965_v58, %v959_v60  ;;  %v4780_v10 = vld [vmem:[#allocation12 + $0x8] sm:$0xff]  }
 0xb4b   :  { %v969_v63 = vmul.f32 %v967_v62, %v4414_v11  ;;  %v4767_v12 = vadd.f32 %v968_v61, %v4429_v18  ;;  %v4784_v11 = vld [vmem:[#allocation12 + $0x10] sm:$0xff]   ;;  %v4788_v18 = vld [vmem:[#allocation12 + $0x18] sm:$0xff]  }
 0xb4d   :  { %v4770_v13 = vadd.f32 %v969_v63, %v4434_v19  ;;  %v4792_v19 = vld [vmem:[#allocation12 + $0x20] sm:$0xff]  }
 0xb4f   :  { %v977_v15 = vpack.c.bf16 %v4770_v13, %v4767_v12 }
 0xb51   :  { %3336 = vmatmul.mubr.bf16.vlgmr.msra.gmra.mrb[24].mxu0 %v977_v15  ;;  %v4890_v15 = vld [vmem:[#allocation13 + $0x20] sm:$0xff]  }
 0xb52   :  { %3360 = vmatpush3.bf16.msra.mxu0 %v4774_v16  ;;  %3375 = vmatprep.mubr.msk.bf16.mxu0 %vm4223_vm0, %v4222_v1 }
 0xb53   :  { %3361 = vmatprep.subr.bf16.mxu0 %v4222_v1 }
 0xb56   :  { %3362 = vmatpush3.bf16.msra.mxu0 %v4780_v10 }
 0xb57   :  { %3363 = vmatprep.subr.bf16.mxu0 %v4222_v1 }
 0xb5a   :  { %3364 = vmatpush3.bf16.msra.mxu0 %v4784_v11 }
 0xb5b   :  { %3365 = vmatprep.subr.bf16.mxu0 %v4222_v1 }
 0xb5e   :  { %3366 = vmatpush3.bf16.msra.mxu0 %v4788_v18 }
 0xb5f   :  { %3367 = vmatprep.subr.bf16.mxu0 %v4222_v1 }
 0xb62   :  { %3368 = vmatpush3.bf16.msra.mxu0 %v4792_v19 }
 0xb63   :  { %3369 = vmatprep.subr.bf16.mxu0 %v4222_v1 }
 0xb66   :  { %3370 = vmatpush3.bf16.msra.mxu0 %v4796_v20 }
 0xb67   :  { %3371 = vmatprep.subr.bf16.mxu0 %v4222_v1 }
 0xb6a   :  { %3372 = vmatpush3.bf16.msra.mxu0 %v4424_v17  ;;  %v4804_v17 = vld [vmem:[#allocation13] sm:$0xff]  }
 0xb6b   :  { %3373 = vmatprep.subr.bf16.mxu0 %v4222_v1 }
 0xb6e   :  { %3374 = vmatpush3.bf16.msra.mxu0 %v4446_v22  ;;  %v4810_v22 = vld [vmem:[#allocation13 + $0x8] sm:$0xff]  }
 0xb6f   :  { %3399 = vmatprep.subr.bf16.mxu0 %v4222_v1 }
 0xc24   :  { %v1018_v23 = vpop.f32.mrb[24].mxu0 }
 0xc25   :  { %v1019_v28 = vadd.f32 %v2667_v21, %v1018_v23  ;;  %v3337_v29 = vpop.f32.mrb[25].mxu0  ;;  %v4898_v23 = vld [vmem:[#allocation13 + $0x30] sm:$0xff]  }
 0xc26   :  { %v1021_v30 = vpop.f32.mrb[26].mxu0 }
 0xc27   :  { %v1022_v31 = vadd.f32 %v2667_v21, %v1021_v30  ;;  %v3338_v32 = vpop.f32.mrb[27].mxu0  ;;  %3935 = vtanh.f32 %v1019_v28  ;;  %v4894_v21 = vld [vmem:[#allocation13 + $0x28] sm:$0xff]   ;;  %v4902_v28 = vld [vmem:[#allocation13 + $0x38] sm:$0xff]   ;;  %v1186_v30 = vstv %s2668_s10  ;;  %s2696_s10 = sld [smem:[#allocation2 + $0x2a]] }
 0xc28   :  { %v1195_v32 = vld [vmem:[#allocation7 + $0x70] sm:$0xff] }
 0xc29   :  { %3937 = vtanh.f32 %v1022_v31  ;;  %v1189_v31 = vstv %s2669_s2 }
 0xc31   :  { %v3936_v33 = vpop.eup %3935 }
 0xc33   :  { %v3938_v34 = vpop.eup %3937 }
 0xc34   :  { %v1027_v35 = vpack.c.bf16 %v3938_v34, %v3936_v33  ;;  %v1197_v33 = vstv %s2670_s0  ;;  %v4909_v34 = vld [vmem:[%s5543_s8] ss:$0 sm:$0xff]  ;;  %s2698_s0 = sld [smem:[#allocation2 + $0x2c]] }
 0xc36   :  { %3356 = vmatmul.mubr.bf16.vlgmr.msra.gmra.mrb[24].mxu1 %v1027_v35 }
 0xc37   :  { %3380 = vmatpush3.bf16.msra.mxu1 %v4804_v17  ;;  %3395 = vmatprep.mubr.msk.bf16.mxu1 %vm4223_vm0, %v4222_v1 }
 0xc38   :  { %3381 = vmatprep.subr.bf16.mxu1 %v4222_v1 }
 0xc3b   :  { %3382 = vmatpush3.bf16.msra.mxu1 %v4810_v22 }
 0xc3c   :  { %3383 = vmatprep.subr.bf16.mxu1 %v4222_v1 }
 0xc3f   :  { %3384 = vmatpush3.bf16.msra.mxu1 %v4814_v36 }
 0xc40   :  { %3385 = vmatprep.subr.bf16.mxu1 %v4222_v1 }
 0xc43   :  { %3386 = vmatpush3.bf16.msra.mxu1 %v4818_v37 }
 0xc44   :  { %3387 = vmatprep.subr.bf16.mxu1 %v4222_v1 }
 0xc47   :  { %3388 = vmatpush3.bf16.msra.mxu1 %v4471_v24  ;;  %v1072_v24 = vstv %s2665_s6  ;;  %s2690_s6 = sld [smem:[#allocation2 + $0x26]] }
 0xc48   :  { %3389 = vmatprep.subr.bf16.mxu1 %v4222_v1  ;;  %v1073_v7 = vmul.f32 %v1072_v24, %v4767_v12  ;;  %v1074_v5 = vmul.f32 %v1072_v24, %v4770_v13  ;;  %v1196_v24 = vld [vmem:[#allocation7 + $0x78] sm:$0xff] }
 0xc4b   :  { %3390 = vmatpush3.bf16.msra.mxu1 %v4475_v25 }
 0xc4c   :  { %3391 = vmatprep.subr.bf16.mxu1 %v4222_v1 }
 0xc4f   :  { %3392 = vmatpush3.bf16.msra.mxu1 %v4478_v26 }
 0xc50   :  { %3393 = vmatprep.subr.bf16.mxu1 %v4222_v1 }
 0xc53   :  { %3394 = vmatpush3.bf16.msra.mxu1 %v4482_v27 }
 0xc54   :  { %3419 = vmatprep.subr.bf16.mxu1 %v4222_v1 }
 0xd09   :  { %v1062_v39 = vpop.f32.mrb[24].mxu1 }
 0xd0a   :  { %v1063_v25 = vadd.f32 %v4508_v38, %v1062_v39  ;;  %v3357_v3 = vpop.f32.mrb[25].mxu1 }
 0xd0b   :  { %v1065_v4 = vpop.f32.mrb[26].mxu1 }
 0xd0c   :  { %v1070_v26 = vmul.f32 %v1069_v40, %v1063_v25  ;;  %v1066_v27 = vadd.f32 %v4508_v38, %v1065_v4  ;;  %v3358_v9 = vpop.f32.mrb[27].mxu1  ;;  %v4843_v38 = vld [vmem:[%s5540_s5] sm:$0xff]  ;;  %v1198_v25 = vmul.f32 %v1197_v33, %v1195_v32 }
 0xd0e   :  { %v1075_v43 = vadd.f32 %v1073_v7, %v1070_v26  ;;  %v1071_v44 = vmul.f32 %v1069_v40, %v1066_v27 }
 0xd10   :  { %v1083_v8 = vadd.f32 %v1081_v42, %v1075_v43  ;;  %v1076_v14 = vadd.f32 %v1074_v5, %v1071_v44  ;;  %v1199_v42 = vmul.f32 %v1197_v33, %v1196_v24 }
 0xd12   :  { %v1085_v46 = vmul.f32 %v4834_v45, %v1083_v8  ;;  %v1084_v47 = vadd.f32 %v1082_v6, %v1076_v14 }
 0xd14   :  { %v1086_v49 = vmul.f32 %v4837_v48, %v1084_v47  ;;  %v4846_v50 = vadd.f32 %v4843_v38, %v1085_v46  ;;  %v2675_v46 = vld [vmem:[#allocation9 + $0x8] ss:$0 sm:$0xff] }
 0xd16   :  { %v4854_v52 = vadd.f32 %v4851_v51, %v1086_v49  ;;  %v1190_v2 = vmul.f32 %v1189_v31, %v4846_v50 }
 0xd18   :  { %v1094_v53 = vpack.c.bf16 %v4854_v52, %v4846_v50  ;;  %v1191_v7 = vmul.f32 %v1189_v31, %v4854_v52  ;;  %v1313_v31 = vld [vmem:[#allocation7 + $0x88] sm:$0xff] }
 0xd1a   :  { %3376 = vmatmul.mubr.bf16.vlgmr.msra.gmra.mrb[28].mxu0 %v1094_v53 }
 0xd1b   :  { %3400 = vmatpush3.bf16.msra.mxu0 %v4774_v16  ;;  %3415 = vmatprep.mubr.msk.bf16.mxu0 %vm4223_vm0, %v4222_v1 }
 0xd1c   :  { %3401 = vmatprep.subr.bf16.mxu0 %v4222_v1 }
 0xd1f   :  { %3402 = vmatpush3.bf16.msra.mxu0 %v4780_v10 }
 0xd20   :  { %3403 = vmatprep.subr.bf16.mxu0 %v4222_v1 }
 0xd23   :  { %3404 = vmatpush3.bf16.msra.mxu0 %v4784_v11 }
 0xd24   :  { %3405 = vmatprep.subr.bf16.mxu0 %v4222_v1 }
 0xd27   :  { %3406 = vmatpush3.bf16.msra.mxu0 %v4788_v18 }
 0xd28   :  { %3407 = vmatprep.subr.bf16.mxu0 %v4222_v1 }
 0xd2b   :  { %3408 = vmatpush3.bf16.msra.mxu0 %v4792_v19 }
 0xd2c   :  { %3409 = vmatprep.subr.bf16.mxu0 %v4222_v1 }
 0xd2f   :  { %3410 = vmatpush3.bf16.msra.mxu0 %v4796_v20 }
 0xd30   :  { %3411 = vmatprep.subr.bf16.mxu0 %v4222_v1 }
 0xd33   :  { %3412 = vmatpush3.bf16.msra.mxu0 %v4872_v54 }
 0xd34   :  { %3413 = vmatprep.subr.bf16.mxu0 %v4222_v1 }
 0xd37   :  { %3414 = vmatpush3.bf16.msra.mxu0 %v4876_v55 }
 0xd38   :  { %3439 = vmatprep.subr.bf16.mxu0 %v4222_v1 }
 0xded   :  { %v1135_v57 = vpop.f32.mrb[28].mxu0 }
 0xdee   :  { %v1136_v58 = vadd.f32 %v2671_v56, %v1135_v57  ;;  %v3377_v59 = vpop.f32.mrb[29].mxu0 }
 0xdef   :  { %v1138_v60 = vpop.f32.mrb[30].mxu0 }
 0xdf0   :  { %v1139_v61 = vadd.f32 %v2671_v56, %v1138_v60  ;;  %v3378_v62 = vpop.f32.mrb[31].mxu0  ;;  %3939 = vtanh.f32 %v1136_v58 }
 0xdf1   :  { %v1306_v62 = vstv %s2673_s3  ;;  %s2700_s3 = sld [smem:[#allocation2 + $0x2d]] }
 0xdf2   :  { %3941 = vtanh.f32 %v1139_v61  ;;  %v1303_v61 = vstv %s2672_s27  ;;  %s2702_s27 = sld [smem:[#allocation2 + $0x2f]] }
 0xdfa   :  { %v3940_v63 = vpop.eup %3939 }
 0xdfc   :  { %v3942_v12 = vpop.eup %3941 }
 0xdfd   :  { %v1144_v13 = vpack.c.bf16 %v3942_v12, %v3940_v63  ;;  %v1312_v63 = vld [vmem:[#allocation7 + $0x80] sm:$0xff]  ;;  %v1314_v12 = vstv %s2674_s16  ;;  %s2705_s16 = sld [smem:[#allocation2 + $0x31]] }
 0xdff   :  { %3396 = vmatmul.mubr.bf16.vlgmr.msra.gmra.mrb[28].mxu1 %v1144_v13 }
 0xe00   :  { %3420 = vmatpush3.bf16.msra.mxu1 %v4804_v17  ;;  %3435 = vmatprep.mubr.msk.bf16.mxu1 %vm4223_vm0, %v4222_v1 }
 0xe01   :  { %3421 = vmatprep.subr.bf16.mxu1 %v4222_v1 }
 0xe04   :  { %3422 = vmatpush3.bf16.msra.mxu1 %v4810_v22 }
 0xe05   :  { %3423 = vmatprep.subr.bf16.mxu1 %v4222_v1 }
 0xe08   :  { %3424 = vmatpush3.bf16.msra.mxu1 %v4814_v36 }
 0xe09   :  { %3425 = vmatprep.subr.bf16.mxu1 %v4222_v1 }
 0xe0c   :  { %3426 = vmatpush3.bf16.msra.mxu1 %v4818_v37 }
 0xe0d   :  { %3427 = vmatprep.subr.bf16.mxu1 %v4222_v1 }
 0xe10   :  { %3428 = vmatpush3.bf16.msra.mxu1 %v4890_v15 }
 0xe11   :  { %3429 = vmatprep.subr.bf16.mxu1 %v4222_v1 }
 0xe14   :  { %3430 = vmatpush3.bf16.msra.mxu1 %v4894_v21 }
 0xe15   :  { %3431 = vmatprep.subr.bf16.mxu1 %v4222_v1 }
 0xe18   :  { %3432 = vmatpush3.bf16.msra.mxu1 %v4898_v23 }
 0xe19   :  { %3433 = vmatprep.subr.bf16.mxu1 %v4222_v1 }
 0xe1c   :  { %3434 = vmatpush3.bf16.msra.mxu1 %v4902_v28 }
 0xe1d   :  { %3459 = vmatprep.subr.bf16.mxu1 %v4222_v1 }
 0xed2   :  { %v1179_v29 = vpop.f32.mrb[28].mxu1 }
 0xed3   :  { %v1180_v35 = vadd.f32 %v4909_v34, %v1179_v29  ;;  %v3397_v39 = vpop.f32.mrb[29].mxu1 }
 0xed4   :  { %v1182_v40 = vpop.f32.mrb[30].mxu1 }
 0xed5   :  { %v1187_v0 = vmul.f32 %v1186_v30, %v1180_v35  ;;  %v1183_v3 = vadd.f32 %v4909_v34, %v1182_v40  ;;  %v3398_v4 = vpop.f32.mrb[31].mxu1  ;;  %v1315_v35 = vmul.f32 %v1314_v12, %v1312_v63 }
 0xed7   :  { %v1192_v41 = vadd.f32 %v1190_v2, %v1187_v0  ;;  %v1188_v26 = vmul.f32 %v1186_v30, %v1183_v3 }
 0xed9   :  { %v1200_v27 = vadd.f32 %v1198_v25, %v1192_v41  ;;  %v1193_v9 = vadd.f32 %v1191_v7, %v1188_v26  ;;  %v1316_v25 = vmul.f32 %v1314_v12, %v1313_v31 }
 0xedb   :  { %v1202_v43 = vmul.f32 %v4834_v45, %v1200_v27  ;;  %v1201_v44 = vadd.f32 %v1199_v42, %v1193_v9 }
 0xedd   :  { %v1203_v5 = vmul.f32 %v4837_v48, %v1201_v44  ;;  %v4918_v6 = vadd.f32 %v4843_v38, %v1202_v43  ;;  %v2679_v43 = vld [vmem:[#allocation9 + $0x9] ss:$0 sm:$0xff] }
 0xedf   :  { %v4921_v8 = vadd.f32 %v4851_v51, %v1203_v5  ;;  %v1307_v33 = vmul.f32 %v1306_v62, %v4918_v6 }
 0xee1   :  { %v1211_v14 = vpack.c.bf16 %v4921_v8, %v4918_v6  ;;  %v1308_v2 = vmul.f32 %v1306_v62, %v4921_v8  ;;  %v1430_v62 = vld [vmem:[#allocation7 + $0x98] sm:$0xff] }
 0xee3   :  { %3416 = vmatmul.mubr.bf16.vlgmr.msra.gmra.mrb[32].mxu0 %v1211_v14 }
 0xee4   :  { %3440 = vmatpush3.bf16.msra.mxu0 %v4774_v16  ;;  %3455 = vmatprep.mubr.msk.bf16.mxu0 %vm4223_vm0, %v4222_v1 }
 0xee5   :  { %3441 = vmatprep.subr.bf16.mxu0 %v4222_v1 }
 0xee8   :  { %3442 = vmatpush3.bf16.msra.mxu0 %v4780_v10 }
 0xee9   :  { %3443 = vmatprep.subr.bf16.mxu0 %v4222_v1 }
 0xeec   :  { %3444 = vmatpush3.bf16.msra.mxu0 %v4784_v11 }
 0xeed   :  { %3445 = vmatprep.subr.bf16.mxu0 %v4222_v1 }
 0xef0   :  { %3446 = vmatpush3.bf16.msra.mxu0 %v4788_v18 }
 0xef1   :  { %3447 = vmatprep.subr.bf16.mxu0 %v4222_v1 }
 0xef4   :  { %3448 = vmatpush3.bf16.msra.mxu0 %v4792_v19 }
 0xef5   :  { %3449 = vmatprep.subr.bf16.mxu0 %v4222_v1 }
 0xef8   :  { %3450 = vmatpush3.bf16.msra.mxu0 %v4796_v20 }
 0xef9   :  { %3451 = vmatprep.subr.bf16.mxu0 %v4222_v1 }
 0xefc   :  { %3452 = vmatpush3.bf16.msra.mxu0 %v4872_v54 }
 0xefd   :  { %3453 = vmatprep.subr.bf16.mxu0 %v4222_v1 }
 0xf00   :  { %3454 = vmatpush3.bf16.msra.mxu0 %v4876_v55 }
 0xf01   :  { %3479 = vmatprep.subr.bf16.mxu0 %v4222_v1 }
 0xfb6   :  { %v1252_v47 = vpop.f32.mrb[32].mxu0 }
 0xfb7   :  { %v1253_v49 = vadd.f32 %v2675_v46, %v1252_v47  ;;  %v3417_v50 = vpop.f32.mrb[33].mxu0 }
 0xfb8   :  { %v1255_v52 = vpop.f32.mrb[34].mxu0 }
 0xfb9   :  { %v1256_v53 = vadd.f32 %v2675_v46, %v1255_v52  ;;  %v3418_v56 = vpop.f32.mrb[35].mxu0  ;;  %3943 = vtanh.f32 %v1253_v49 }
 0xfba   :  { %v1423_v56 = vstv %s2677_s17  ;;  %s2704_s17 = sld [smem:[#allocation2 + $0x30]] }
 0xfbb   :  { %3945 = vtanh.f32 %v1256_v53  ;;  %v1420_v53 = vstv %s2676_s18  ;;  %s2706_s18 = sld [smem:[#allocation2 + $0x32]] }
 0xfc3   :  { %v3944_v57 = vpop.eup %3943 }
 0xfc5   :  { %v3946_v58 = vpop.eup %3945 }
 0xfc6   :  { %v1261_v59 = vpack.c.bf16 %v3946_v58, %v3944_v57  ;;  %v1429_v57 = vld [vmem:[#allocation7 + $0x90] sm:$0xff]  ;;  %v1431_v58 = vstv %s2678_s19  ;;  %s2709_s19 = sld [smem:[#allocation2 + $0x34]] }
 0xfc8   :  { %3436 = vmatmul.mubr.bf16.vlgmr.msra.gmra.mrb[32].mxu1 %v1261_v59 }
 0xfc9   :  { %3460 = vmatpush3.bf16.msra.mxu1 %v4804_v17  ;;  %3475 = vmatprep.mubr.msk.bf16.mxu1 %vm4223_vm0, %v4222_v1 }
 0xfca   :  { %3461 = vmatprep.subr.bf16.mxu1 %v4222_v1 }
 0xfcd   :  { %3462 = vmatpush3.bf16.msra.mxu1 %v4810_v22 }
 0xfce   :  { %3463 = vmatprep.subr.bf16.mxu1 %v4222_v1 }
 0xfd1   :  { %3464 = vmatpush3.bf16.msra.mxu1 %v4814_v36 }
 0xfd2   :  { %3465 = vmatprep.subr.bf16.mxu1 %v4222_v1 }
 0xfd5   :  { %3466 = vmatpush3.bf16.msra.mxu1 %v4818_v37 }
 0xfd6   :  { %3467 = vmatprep.subr.bf16.mxu1 %v4222_v1 }
 0xfd9   :  { %3468 = vmatpush3.bf16.msra.mxu1 %v4890_v15 }
 0xfda   :  { %3469 = vmatprep.subr.bf16.mxu1 %v4222_v1 }
 0xfdd   :  { %3470 = vmatpush3.bf16.msra.mxu1 %v4894_v21 }
 0xfde   :  { %3471 = vmatprep.subr.bf16.mxu1 %v4222_v1 }
 0xfe1   :  { %3472 = vmatpush3.bf16.msra.mxu1 %v4898_v23 }
 0xfe2   :  { %3473 = vmatprep.subr.bf16.mxu1 %v4222_v1 }
 0xfe5   :  { %3474 = vmatpush3.bf16.msra.mxu1 %v4902_v28 }
 0xfe6   :  { %3499 = vmatprep.subr.bf16.mxu1 %v4222_v1 }
0x109b   :  { %v1296_v60 = vpop.f32.mrb[32].mxu1 }
0x109c   :  { %v1297_v13 = vadd.f32 %v4909_v34, %v1296_v60  ;;  %v3437_v29 = vpop.f32.mrb[33].mxu1 }
0x109d   :  { %v1299_v30 = vpop.f32.mrb[34].mxu1 }
0x109e   :  { %v1304_v32 = vmul.f32 %v1303_v61, %v1297_v13  ;;  %v1300_v39 = vadd.f32 %v4909_v34, %v1299_v30  ;;  %v3438_v40 = vpop.f32.mrb[35].mxu1  ;;  %v1432_v13 = vmul.f32 %v1431_v58, %v1429_v57 }
0x10a0   :  { %v1309_v24 = vadd.f32 %v1307_v33, %v1304_v32  ;;  %v1305_v0 = vmul.f32 %v1303_v61, %v1300_v39 }
0x10a2   :  { %v1317_v3 = vadd.f32 %v1315_v35, %v1309_v24  ;;  %v1310_v4 = vadd.f32 %v1308_v2, %v1305_v0  ;;  %v1433_v35 = vmul.f32 %v1431_v58, %v1430_v62 }
0x10a4   :  { %v1319_v41 = vmul.f32 %v4834_v45, %v1317_v3  ;;  %v1318_v26 = vadd.f32 %v1316_v25, %v1310_v4 }
0x10a6   :  { %v1320_v7 = vmul.f32 %v4837_v48, %v1318_v26  ;;  %v4968_v42 = vadd.f32 %v4843_v38, %v1319_v41  ;;  %v2683_v41 = vld [vmem:[#allocation9 + $0xa] ss:$0 sm:$0xff] }
0x10a8   :  { %v4971_v27 = vadd.f32 %v4851_v51, %v1320_v7  ;;  %v1424_v12 = vmul.f32 %v1423_v56, %v4968_v42 }
0x10aa   :  { %v1328_v9 = vpack.c.bf16 %v4971_v27, %v4968_v42  ;;  %v1425_v33 = vmul.f32 %v1423_v56, %v4971_v27  ;;  %v1547_v56 = vld [vmem:[#allocation7 + $0xa8] sm:$0xff] }
0x10ac   :  { %3456 = vmatmul.mubr.bf16.vlgmr.msra.gmra.mrb[36].mxu0 %v1328_v9 }
0x10ad   :  { %3480 = vmatpush3.bf16.msra.mxu0 %v4774_v16  ;;  %3495 = vmatprep.mubr.msk.bf16.mxu0 %vm4223_vm0, %v4222_v1 }
0x10ae   :  { %3481 = vmatprep.subr.bf16.mxu0 %v4222_v1 }
0x10b1   :  { %3482 = vmatpush3.bf16.msra.mxu0 %v4780_v10 }
0x10b2   :  { %3483 = vmatprep.subr.bf16.mxu0 %v4222_v1 }
0x10b5   :  { %3484 = vmatpush3.bf16.msra.mxu0 %v4784_v11 }
0x10b6   :  { %3485 = vmatprep.subr.bf16.mxu0 %v4222_v1 }
0x10b9   :  { %3486 = vmatpush3.bf16.msra.mxu0 %v4788_v18 }
0x10ba   :  { %3487 = vmatprep.subr.bf16.mxu0 %v4222_v1 }
0x10bd   :  { %3488 = vmatpush3.bf16.msra.mxu0 %v4792_v19 }
0x10be   :  { %3489 = vmatprep.subr.bf16.mxu0 %v4222_v1 }
0x10c1   :  { %3490 = vmatpush3.bf16.msra.mxu0 %v4796_v20 }
0x10c2   :  { %3491 = vmatprep.subr.bf16.mxu0 %v4222_v1 }
0x10c5   :  { %3492 = vmatpush3.bf16.msra.mxu0 %v4872_v54 }
0x10c6   :  { %3493 = vmatprep.subr.bf16.mxu0 %v4222_v1 }
0x10c9   :  { %3494 = vmatpush3.bf16.msra.mxu0 %v4876_v55 }
0x10ca   :  { %3519 = vmatprep.subr.bf16.mxu0 %v4222_v1 }
0x117f   :  { %v1369_v44 = vpop.f32.mrb[36].mxu0 }
0x1180   :  { %v1370_v5 = vadd.f32 %v2679_v43, %v1369_v44  ;;  %v3457_v6 = vpop.f32.mrb[37].mxu0 }
0x1181   :  { %v1372_v8 = vpop.f32.mrb[38].mxu0 }
0x1182   :  { %v1373_v14 = vadd.f32 %v2679_v43, %v1372_v8  ;;  %v3458_v46 = vpop.f32.mrb[39].mxu0  ;;  %3947 = vtanh.f32 %v1370_v5 }
0x1183   :  { %v1540_v46 = vstv %s2681_s20  ;;  %s2708_s20 = sld [smem:[#allocation2 + $0x33]] }
0x1184   :  { %3949 = vtanh.f32 %v1373_v14  ;;  %v1537_v14 = vstv %s2680_s23  ;;  %s2710_s23 = sld [smem:[#allocation2 + $0x35]] }
0x118c   :  { %v3948_v47 = vpop.eup %3947 }
0x118e   :  { %v3950_v49 = vpop.eup %3949 }
0x118f   :  { %v1378_v50 = vpack.c.bf16 %v3950_v49, %v3948_v47  ;;  %v1546_v47 = vld [vmem:[#allocation7 + $0xa0] sm:$0xff]  ;;  %v1548_v49 = vstv %s2682_s24  ;;  %s2713_s24 = sld [smem:[#allocation2 + $0x37]] }
0x1191   :  { %3476 = vmatmul.mubr.bf16.vlgmr.msra.gmra.mrb[36].mxu1 %v1378_v50 }
0x1192   :  { %3500 = vmatpush3.bf16.msra.mxu1 %v4804_v17  ;;  %3515 = vmatprep.mubr.msk.bf16.mxu1 %vm4223_vm0, %v4222_v1 }
0x1193   :  { %3501 = vmatprep.subr.bf16.mxu1 %v4222_v1 }
0x1196   :  { %3502 = vmatpush3.bf16.msra.mxu1 %v4810_v22 }
0x1197   :  { %3503 = vmatprep.subr.bf16.mxu1 %v4222_v1 }
0x119a   :  { %3504 = vmatpush3.bf16.msra.mxu1 %v4814_v36 }
0x119b   :  { %3505 = vmatprep.subr.bf16.mxu1 %v4222_v1 }
0x119e   :  { %3506 = vmatpush3.bf16.msra.mxu1 %v4818_v37 }
0x119f   :  { %3507 = vmatprep.subr.bf16.mxu1 %v4222_v1 }
0x11a2   :  { %3508 = vmatpush3.bf16.msra.mxu1 %v4890_v15 }
0x11a3   :  { %3509 = vmatprep.subr.bf16.mxu1 %v4222_v1 }
0x11a6   :  { %3510 = vmatpush3.bf16.msra.mxu1 %v4894_v21 }
0x11a7   :  { %3511 = vmatprep.subr.bf16.mxu1 %v4222_v1 }
0x11aa   :  { %3512 = vmatpush3.bf16.msra.mxu1 %v4898_v23 }
0x11ab   :  { %3513 = vmatprep.subr.bf16.mxu1 %v4222_v1 }
0x11ae   :  { %3514 = vmatpush3.bf16.msra.mxu1 %v4902_v28 }
0x11af   :  { %3539 = vmatprep.subr.bf16.mxu1 %v4222_v1 }
0x1264   :  { %v1413_v52 = vpop.f32.mrb[36].mxu1 }
0x1265   :  { %v1414_v59 = vadd.f32 %v4909_v34, %v1413_v52  ;;  %v3477_v60 = vpop.f32.mrb[37].mxu1 }
0x1266   :  { %v1416_v61 = vpop.f32.mrb[38].mxu1 }
0x1267   :  { %v1421_v63 = vmul.f32 %v1420_v53, %v1414_v59  ;;  %v1417_v29 = vadd.f32 %v4909_v34, %v1416_v61  ;;  %v3478_v30 = vpop.f32.mrb[39].mxu1  ;;  %v1549_v59 = vmul.f32 %v1548_v49, %v1546_v47 }
0x1269   :  { %v1426_v31 = vadd.f32 %v1424_v12, %v1421_v63  ;;  %v1422_v32 = vmul.f32 %v1420_v53, %v1417_v29 }
0x126b   :  { %v1434_v39 = vadd.f32 %v1432_v13, %v1426_v31  ;;  %v1427_v40 = vadd.f32 %v1425_v33, %v1422_v32  ;;  %v1550_v13 = vmul.f32 %v1548_v49, %v1547_v56 }
0x126d   :  { %v1436_v24 = vmul.f32 %v4834_v45, %v1434_v39  ;;  %v1435_v0 = vadd.f32 %v1433_v35, %v1427_v40 }
0x126f   :  { %v1437_v2 = vmul.f32 %v4837_v48, %v1435_v0  ;;  %v5018_v25 = vadd.f32 %v4843_v38, %v1436_v24  ;;  %v2687_v24 = vld [vmem:[#allocation9 + $0xb] ss:$0 sm:$0xff] }
0x1271   :  { %v5021_v3 = vadd.f32 %v4851_v51, %v1437_v2  ;;  %v1541_v58 = vmul.f32 %v1540_v46, %v5018_v25 }
0x1273   :  { %v1445_v4 = vpack.c.bf16 %v5021_v3, %v5018_v25  ;;  %v1542_v12 = vmul.f32 %v1540_v46, %v5021_v3  ;;  %v1664_v46 = vld [vmem:[#allocation7 + $0xb8] sm:$0xff] }
0x1275   :  { %3496 = vmatmul.mubr.bf16.vlgmr.msra.gmra.mrb[40].mxu0 %v1445_v4 }
0x1276   :  { %3520 = vmatpush3.bf16.msra.mxu0 %v4774_v16  ;;  %3535 = vmatprep.mubr.msk.bf16.mxu0 %vm4223_vm0, %v4222_v1 }
0x1277   :  { %3521 = vmatprep.subr.bf16.mxu0 %v4222_v1 }
0x127a   :  { %3522 = vmatpush3.bf16.msra.mxu0 %v4780_v10 }
0x127b   :  { %3523 = vmatprep.subr.bf16.mxu0 %v4222_v1 }
0x127e   :  { %3524 = vmatpush3.bf16.msra.mxu0 %v4784_v11 }
0x127f   :  { %3525 = vmatprep.subr.bf16.mxu0 %v4222_v1 }
0x1282   :  { %3526 = vmatpush3.bf16.msra.mxu0 %v4788_v18 }
0x1283   :  { %3527 = vmatprep.subr.bf16.mxu0 %v4222_v1 }
0x1286   :  { %3528 = vmatpush3.bf16.msra.mxu0 %v4792_v19 }
0x1287   :  { %3529 = vmatprep.subr.bf16.mxu0 %v4222_v1 }
0x128a   :  { %3530 = vmatpush3.bf16.msra.mxu0 %v4796_v20 }
0x128b   :  { %3531 = vmatprep.subr.bf16.mxu0 %v4222_v1 }
0x128e   :  { %3532 = vmatpush3.bf16.msra.mxu0 %v4872_v54 }
0x128f   :  { %3533 = vmatprep.subr.bf16.mxu0 %v4222_v1 }
0x1292   :  { %3534 = vmatpush3.bf16.msra.mxu0 %v4876_v55 }
0x1293   :  { %3559 = vmatprep.subr.bf16.mxu0 %v4222_v1 }
0x1348   :  { %v1486_v26 = vpop.f32.mrb[40].mxu0 }
0x1349   :  { %v1487_v7 = vadd.f32 %v2683_v41, %v1486_v26  ;;  %v3497_v42 = vpop.f32.mrb[41].mxu0 }
0x134a   :  { %v1489_v27 = vpop.f32.mrb[42].mxu0 }
0x134b   :  { %v1490_v9 = vadd.f32 %v2683_v41, %v1489_v27  ;;  %v3498_v43 = vpop.f32.mrb[43].mxu0  ;;  %3951 = vtanh.f32 %v1487_v7 }
0x134c   :  { %v1657_v43 = vstv %s2685_s25  ;;  %s2712_s25 = sld [smem:[#allocation2 + $0x36]] }
0x134d   :  { %3953 = vtanh.f32 %v1490_v9  ;;  %v1654_v9 = vstv %s2684_s1  ;;  %s2714_s1 = sld [smem:[#allocation2 + $0x38]] }
0x1355   :  { %v3952_v44 = vpop.eup %3951 }
0x1357   :  { %v3954_v5 = vpop.eup %3953 }
0x1358   :  { %v1495_v6 = vpack.c.bf16 %v3954_v5, %v3952_v44  ;;  %v1663_v44 = vld [vmem:[#allocation7 + $0xb0] sm:$0xff]  ;;  %v1665_v5 = vstv %s2686_s4  ;;  %s2716_s4 = sld [smem:[#allocation2 + $0x39]] }
0x135a   :  { %3516 = vmatmul.mubr.bf16.vlgmr.msra.gmra.mrb[40].mxu1 %v1495_v6 }
0x135b   :  { %3540 = vmatpush3.bf16.msra.mxu1 %v4804_v17  ;;  %3555 = vmatprep.mubr.msk.bf16.mxu1 %vm4223_vm0, %v4222_v1 }
0x135c   :  { %3541 = vmatprep.subr.bf16.mxu1 %v4222_v1 }
0x135f   :  { %3542 = vmatpush3.bf16.msra.mxu1 %v4810_v22 }
0x1360   :  { %3543 = vmatprep.subr.bf16.mxu1 %v4222_v1 }
0x1363   :  { %3544 = vmatpush3.bf16.msra.mxu1 %v4814_v36 }
0x1364   :  { %3545 = vmatprep.subr.bf16.mxu1 %v4222_v1 }
0x1367   :  { %3546 = vmatpush3.bf16.msra.mxu1 %v4818_v37 }
0x1368   :  { %3547 = vmatprep.subr.bf16.mxu1 %v4222_v1 }
0x136b   :  { %3548 = vmatpush3.bf16.msra.mxu1 %v4890_v15 }
0x136c   :  { %3549 = vmatprep.subr.bf16.mxu1 %v4222_v1 }
0x136f   :  { %3550 = vmatpush3.bf16.msra.mxu1 %v4894_v21 }
0x1370   :  { %3551 = vmatprep.subr.bf16.mxu1 %v4222_v1 }
0x1373   :  { %3552 = vmatpush3.bf16.msra.mxu1 %v4898_v23 }
0x1374   :  { %3553 = vmatprep.subr.bf16.mxu1 %v4222_v1 }
0x1377   :  { %3554 = vmatpush3.bf16.msra.mxu1 %v4902_v28 }
0x1378   :  { %3579 = vmatprep.subr.bf16.mxu1 %v4222_v1 }
0x142d   :  { %v1530_v8 = vpop.f32.mrb[40].mxu1 }
0x142e   :  { %v1531_v50 = vadd.f32 %v4909_v34, %v1530_v8  ;;  %v3517_v52 = vpop.f32.mrb[41].mxu1 }
0x142f   :  { %v1533_v53 = vpop.f32.mrb[42].mxu1 }
0x1430   :  { %v1538_v57 = vmul.f32 %v1537_v14, %v1531_v50  ;;  %v1534_v60 = vadd.f32 %v4909_v34, %v1533_v53  ;;  %v3518_v61 = vpop.f32.mrb[43].mxu1  ;;  %v1666_v50 = vmul.f32 %v1665_v5, %v1663_v44 }
0x1432   :  { %v1543_v62 = vadd.f32 %v1541_v58, %v1538_v57  ;;  %v1539_v63 = vmul.f32 %v1537_v14, %v1534_v60 }
0x1434   :  { %v1551_v29 = vadd.f32 %v1549_v59, %v1543_v62  ;;  %v1544_v30 = vadd.f32 %v1542_v12, %v1539_v63  ;;  %v1667_v59 = vmul.f32 %v1665_v5, %v1664_v46 }
0x1436   :  { %v1553_v31 = vmul.f32 %v4834_v45, %v1551_v29  ;;  %v1552_v32 = vadd.f32 %v1550_v13, %v1544_v30 }
0x1438   :  { %v1554_v33 = vmul.f32 %v4837_v48, %v1552_v32  ;;  %v5068_v35 = vadd.f32 %v4843_v38, %v1553_v31 }
0x143a   :  { %v5071_v39 = vadd.f32 %v4851_v51, %v1554_v33  ;;  %v1658_v49 = vmul.f32 %v1657_v43, %v5068_v35 }
0x143c   :  { %v1562_v40 = vpack.c.bf16 %v5071_v39, %v5068_v35  ;;  %v1659_v58 = vmul.f32 %v1657_v43, %v5071_v39  ;;  %v1782_v39 = vstv %s2690_s6 }
0x143e   :  { %3536 = vmatmul.mubr.bf16.vlgmr.msra.gmra.mrb[44].mxu0 %v1562_v40 }
0x143f   :  { %3560 = vmatpush3.bf16.msra.mxu0 %v4774_v16  ;;  %3575 = vmatprep.mubr.msk.bf16.mxu0 %vm4223_vm0, %v4222_v1 }
0x1440   :  { %3561 = vmatprep.subr.bf16.mxu0 %v4222_v1 }
0x1443   :  { %3562 = vmatpush3.bf16.msra.mxu0 %v4780_v10 }
0x1444   :  { %3563 = vmatprep.subr.bf16.mxu0 %v4222_v1 }
0x1447   :  { %3564 = vmatpush3.bf16.msra.mxu0 %v4784_v11 }
0x1448   :  { %3565 = vmatprep.subr.bf16.mxu0 %v4222_v1 }
0x144b   :  { %3566 = vmatpush3.bf16.msra.mxu0 %v4788_v18 }
0x144c   :  { %3567 = vmatprep.subr.bf16.mxu0 %v4222_v1 }
0x144f   :  { %3568 = vmatpush3.bf16.msra.mxu0 %v4792_v19 }
0x1450   :  { %3569 = vmatprep.subr.bf16.mxu0 %v4222_v1 }
0x1453   :  { %3570 = vmatpush3.bf16.msra.mxu0 %v4796_v20 }
0x1454   :  { %3571 = vmatprep.subr.bf16.mxu0 %v4222_v1 }
0x1457   :  { %3572 = vmatpush3.bf16.msra.mxu0 %v4872_v54 }
0x1458   :  { %3573 = vmatprep.subr.bf16.mxu0 %v4222_v1 }
0x145b   :  { %3574 = vmatpush3.bf16.msra.mxu0 %v4876_v55 }
0x145c   :  { %3599 = vmatprep.subr.bf16.mxu0 %v4222_v1 }
0x1511   :  { %v1603_v0 = vpop.f32.mrb[44].mxu0 }
0x1512   :  { %v1604_v2 = vadd.f32 %v2687_v24, %v1603_v0  ;;  %v3537_v25 = vpop.f32.mrb[45].mxu0 }
0x1513   :  { %v1606_v3 = vpop.f32.mrb[46].mxu0 }
0x1514   :  { %v1607_v4 = vadd.f32 %v2687_v24, %v1606_v3  ;;  %v3538_v41 = vpop.f32.mrb[47].mxu0  ;;  %3955 = vtanh.f32 %v1604_v2  ;;  %v1781_v2 = vld [vmem:[#allocation7 + $0xc8] sm:$0xff] }
0x1516   :  { %3957 = vtanh.f32 %v1607_v4 }
0x151e   :  { %v3956_v26 = vpop.eup %3955 }
0x1520   :  { %v3958_v7 = vpop.eup %3957 }
0x1521   :  { %v1612_v42 = vpack.c.bf16 %v3958_v7, %v3956_v26 }
0x1523   :  { %3556 = vmatmul.mubr.bf16.vlgmr.msra.gmra.mrb[44].mxu1 %v1612_v42 }
0x1524   :  { %3580 = vmatpush3.bf16.msra.mxu1 %v4804_v17  ;;  %3595 = vmatprep.mubr.msk.bf16.mxu1 %vm4223_vm0, %v4222_v1 }
0x1525   :  { %3581 = vmatprep.subr.bf16.mxu1 %v4222_v1 }
0x1528   :  { %3582 = vmatpush3.bf16.msra.mxu1 %v4810_v22 }
0x1529   :  { %3583 = vmatprep.subr.bf16.mxu1 %v4222_v1 }
0x152c   :  { %3584 = vmatpush3.bf16.msra.mxu1 %v4814_v36 }
0x152d   :  { %3585 = vmatprep.subr.bf16.mxu1 %v4222_v1 }
0x1530   :  { %3586 = vmatpush3.bf16.msra.mxu1 %v4818_v37 }
0x1531   :  { %3587 = vmatprep.subr.bf16.mxu1 %v4222_v1 }
0x1534   :  { %3588 = vmatpush3.bf16.msra.mxu1 %v4890_v15 }
0x1535   :  { %3589 = vmatprep.subr.bf16.mxu1 %v4222_v1 }
0x1538   :  { %3590 = vmatpush3.bf16.msra.mxu1 %v4894_v21 }
0x1539   :  { %3591 = vmatprep.subr.bf16.mxu1 %v4222_v1 }
0x153c   :  { %3592 = vmatpush3.bf16.msra.mxu1 %v4898_v23 }
0x153d   :  { %3593 = vmatprep.subr.bf16.mxu1 %v4222_v1 }
0x1540   :  { %3594 = vmatpush3.bf16.msra.mxu1 %v4902_v28 }
0x1541   :  { %3619 = vmatprep.subr.bf16.mxu1 %v4222_v1 }
0x15f6   :  { %v1647_v27 = vpop.f32.mrb[44].mxu1 }
0x15f7   :  { %v1648_v6 = vadd.f32 %v4909_v34, %v1647_v27  ;;  %v3557_v8 = vpop.f32.mrb[45].mxu1 }
0x15f8   :  { %v1650_v14 = vpop.f32.mrb[46].mxu1 }
0x15f9   :  { %v1655_v47 = vmul.f32 %v1654_v9, %v1648_v6  ;;  %v1651_v52 = vadd.f32 %v4909_v34, %v1650_v14  ;;  %v3558_v53 = vpop.f32.mrb[47].mxu1 }
0x15fb   :  { %v1660_v56 = vadd.f32 %v1658_v49, %v1655_v47  ;;  %v1656_v57 = vmul.f32 %v1654_v9, %v1651_v52  ;;  %v1784_v9 = vmul.f32 %v1782_v39, %v1781_v2  ;;  %v5175_v49 = vld [vmem:[#allocation12] sm:$0xff]   ;;  %v2695_v52 = vld [vmem:[#allocation9 + $0xd] ss:$0 sm:$0xff] }
0x15fd   :  { %v1668_v60 = vadd.f32 %v1666_v50, %v1660_v56  ;;  %v1661_v61 = vadd.f32 %v1659_v58, %v1656_v57  ;;  %v5197_v50 = vld [vmem:[#allocation12 + $0x28] sm:$0xff]  }
0x15ff   :  { %v1670_v62 = vmul.f32 %v4834_v45, %v1668_v60  ;;  %v1669_v63 = vadd.f32 %v1667_v59, %v1661_v61 }
0x1601   :  { %v1671_v12 = vmul.f32 %v4837_v48, %v1669_v63  ;;  %v5118_v13 = vadd.f32 %v4843_v38, %v1670_v62 }
0x1603   :  { %v5121_v29 = vadd.f32 %v4851_v51, %v1671_v12  ;;  %v5215_v12 = vld [vmem:[#allocation13 + $0x10] sm:$0xff]  }
0x1605   :  { %v1679_v30 = vpack.c.bf16 %v5121_v29, %v5118_v13 }
0x1607   :  { %3576 = vmatmul.mubr.bf16.vlgmr.msra.gmra.mrb[48].mxu0 %v1679_v30  ;;  %v1888_v30 = vstv %s2692_s7 }
0x1608   :  { %3600 = vmatpush3.bf16.msra.mxu0 %v4774_v16  ;;  %3615 = vmatprep.mubr.msk.bf16.mxu0 %vm4223_vm0, %v4222_v1  ;;  %v2691_v16 = vld [vmem:[#allocation9 + $0xc] ss:$0 sm:$0xff] }
0x1609   :  { %3601 = vmatprep.subr.bf16.mxu0 %v4222_v1 }
0x160c   :  { %3602 = vmatpush3.bf16.msra.mxu0 %v4780_v10 }
0x160d   :  { %3603 = vmatprep.subr.bf16.mxu0 %v4222_v1 }
0x1610   :  { %3604 = vmatpush3.bf16.msra.mxu0 %v4784_v11 }
0x1611   :  { %3605 = vmatprep.subr.bf16.mxu0 %v4222_v1 }
0x1614   :  { %3606 = vmatpush3.bf16.msra.mxu0 %v4788_v18 }
0x1615   :  { %3607 = vmatprep.subr.bf16.mxu0 %v4222_v1 }
0x1618   :  { %3608 = vmatpush3.bf16.msra.mxu0 %v4792_v19 }
0x1619   :  { %3609 = vmatprep.subr.bf16.mxu0 %v4222_v1 }
0x161c   :  { %3610 = vmatpush3.bf16.msra.mxu0 %v4796_v20 }
0x161d   :  { %3611 = vmatprep.subr.bf16.mxu0 %v4222_v1 }
0x1620   :  { %3612 = vmatpush3.bf16.msra.mxu0 %v4872_v54 }
0x1621   :  { %3613 = vmatprep.subr.bf16.mxu0 %v4222_v1 }
0x1624   :  { %3614 = vmatpush3.bf16.msra.mxu0 %v4876_v55 }
0x1625   :  { %3639 = vmatprep.subr.bf16.mxu0 %v4222_v1 }
0x16da   :  { %v1720_v10 = vpop.f32.mrb[48].mxu0 }
0x16db   :  { %v1721_v11 = vadd.f32 %v2691_v16, %v1720_v10  ;;  %v3577_v18 = vpop.f32.mrb[49].mxu0  ;;  %v1899_v10 = vstv %s2694_s29 }
0x16dc   :  { %v1723_v31 = vpop.f32.mrb[50].mxu0 }
0x16dd   :  { %v1724_v19 = vadd.f32 %v2691_v16, %v1723_v31  ;;  %v3578_v32 = vpop.f32.mrb[51].mxu0  ;;  %3959 = vtanh.f32 %v1721_v11  ;;  %v1897_v16 = vld [vmem:[#allocation7 + $0xd0] sm:$0xff]  ;;  %v1898_v31 = vld [vmem:[#allocation7 + $0xd8] sm:$0xff] }
0x16de   :  { %v1900_v32 = vmul.f32 %v1899_v10, %v1897_v16 }
0x16df   :  { %3961 = vtanh.f32 %v1724_v19 }
0x16e7   :  { %v3960_v20 = vpop.eup %3959 }
0x16e9   :  { %v3962_v33 = vpop.eup %3961 }
0x16ea   :  { %v1729_v35 = vpack.c.bf16 %v3962_v33, %v3960_v20 }
0x16ec   :  { %3596 = vmatmul.mubr.bf16.vlgmr.msra.gmra.mrb[48].mxu1 %v1729_v35 }
0x16ed   :  { %3620 = vmatpush3.bf16.msra.mxu1 %v4804_v17  ;;  %3635 = vmatprep.mubr.msk.bf16.mxu1 %vm4223_vm0, %v4222_v1 }
0x16ee   :  { %3621 = vmatprep.subr.bf16.mxu1 %v4222_v1 }
0x16f1   :  { %3622 = vmatpush3.bf16.msra.mxu1 %v4810_v22  ;;  %v1771_v22 = vstv %s2688_s26  ;;  %s4224_s26 = smov [#allocation15]  }
0x16f2   :  { %3623 = vmatprep.subr.bf16.mxu1 %v4222_v1  ;;  %s2608_s6 = sshll.u32 %s4224_s26, 4  ;;  %s2609_s6 = int_to_ptr.vmem [resolvable:$true] %s2608_s6 }
0x16f3   :  { %p4180_p10 = scmp.lt.s32.totalorder %s2609_s6, %s2609_s6 }
0x16f5   :  { %3624 = vmatpush3.bf16.msra.mxu1 %v4814_v36  ;;  %v1774_v36 = vstv %s2689_s12  ;;  %s2717_s12 = sld [smem:[#allocation2 + $0x3a]] }
0x16f6   :  { %3625 = vmatprep.subr.bf16.mxu1 %v4222_v1  ;;  %v1775_v3 = vmul.f32 %v1774_v36, %v5118_v13  ;;  %v1776_v27 = vmul.f32 %v1774_v36, %v5121_v29  ;;  %v5219_v13 = vld [vmem:[#allocation13 + $0x18] sm:$0xff]  }
0x16f9   :  { %3626 = vmatpush3.bf16.msra.mxu1 %v4818_v37  ;;  %v1780_v37 = vld [vmem:[#allocation7 + $0xc0] sm:$0xff] }
0x16fa   :  { %3627 = vmatprep.subr.bf16.mxu1 %v4222_v1  ;;  %v1783_v4 = vmul.f32 %v1782_v39, %v1780_v37  ;;  %v5235_v39 = vld [vmem:[#allocation10] sm:$0xff] }
0x16fd   :  { %3628 = vmatpush3.bf16.msra.mxu1 %v4890_v15 }
0x16fe   :  { %3629 = vmatprep.subr.bf16.mxu1 %v4222_v1 }
0x1701   :  { %3630 = vmatpush3.bf16.msra.mxu1 %v4894_v21 }
0x1702   :  { %3631 = vmatprep.subr.bf16.mxu1 %v4222_v1 }
0x1705   :  { %3632 = vmatpush3.bf16.msra.mxu1 %v4898_v23 }
0x1706   :  { %3633 = vmatprep.subr.bf16.mxu1 %v4222_v1 }
0x1709   :  { %3634 = vmatpush3.bf16.msra.mxu1 %v4902_v28 }
0x170a   :  { %3659 = vmatprep.subr.bf16.mxu1 %v4222_v1 }
0x17bf   :  { %v1764_v17 = vpop.f32.mrb[48].mxu1 }
0x17c0   :  { %v1765_v40 = vadd.f32 %v4909_v34, %v1764_v17  ;;  %v3597_v24 = vpop.f32.mrb[49].mxu1 }
0x17c1   :  { %v1767_v0 = vpop.f32.mrb[50].mxu1 }
0x17c2   :  { %v1772_v25 = vmul.f32 %v1771_v22, %v1765_v40  ;;  %v1768_v41 = vadd.f32 %v4909_v34, %v1767_v0  ;;  %v3598_v26 = vpop.f32.mrb[51].mxu1  ;;  %v5238_v0 = vld [vmem:[#allocation10 + $0x8] sm:$0xff] }
0x17c3   :  { %v5273_v26 = vld [vmem:[#allocation12 + $0x30] sm:$0xff]  }
0x17c4   :  { %v1777_v7 = vadd.f32 %v1775_v3, %v1772_v25  ;;  %v1773_v42 = vmul.f32 %v1771_v22, %v1768_v41  ;;  %v1901_v22 = vmul.f32 %v1899_v10, %v1898_v31  ;;  %v5252_v3 = vld [vmem:[%s5540_s5 + $0x8] sm:$0xff] }
0x17c6   :  { %v1785_v43 = vadd.f32 %v1783_v4, %v1777_v7  ;;  %v1778_v44 = vadd.f32 %v1776_v27, %v1773_v42  ;;  %v5277_v7 = vld [vmem:[#allocation12 + $0x38] sm:$0xff]   ;;  %v2699_v42 = vld [vmem:[#allocation9 + $0xe] ss:$0 sm:$0xff] }
0x17c8   :  { %v1787_v5 = vmul.f32 %v4834_v45, %v1785_v43  ;;  %v1786_v6 = vadd.f32 %v1784_v9, %v1778_v44  ;;  %v5181_v45 = vld [vmem:[#allocation12 + $0x8] sm:$0xff]  }
0x17ca   :  { %v1788_v8 = vmul.f32 %v4837_v48, %v1786_v6  ;;  %v5168_v14 = vadd.f32 %v4843_v38, %v1787_v5  ;;  %v5185_v48 = vld [vmem:[#allocation12 + $0x10] sm:$0xff]   ;;  %v5189_v38 = vld [vmem:[#allocation12 + $0x18] sm:$0xff]  }
0x17cc   :  { %v5171_v46 = vadd.f32 %v4851_v51, %v1788_v8  ;;  %v5193_v51 = vld [vmem:[#allocation12 + $0x20] sm:$0xff]  }
0x17ce   :  { %v1796_v47 = vpack.c.bf16 %v5171_v46, %v5168_v14 }
0x17d0   :  { %3616 = vmatmul.mubr.bf16.vlgmr.msra.gmra.mrb[52].mxu0 %v1796_v47  ;;  %v5291_v47 = vld [vmem:[#allocation13 + $0x20] sm:$0xff]  }
0x17d1   :  { %3640 = vmatpush3.bf16.msra.mxu0 %v5175_v49  ;;  %3655 = vmatprep.mubr.msk.bf16.mxu0 %vm4223_vm0, %v4222_v1 }
0x17d2   :  { %3641 = vmatprep.subr.bf16.mxu0 %v4222_v1 }
0x17d5   :  { %3642 = vmatpush3.bf16.msra.mxu0 %v5181_v45 }
0x17d6   :  { %3643 = vmatprep.subr.bf16.mxu0 %v4222_v1 }
0x17d9   :  { %3644 = vmatpush3.bf16.msra.mxu0 %v5185_v48 }
0x17da   :  { %3645 = vmatprep.subr.bf16.mxu0 %v4222_v1 }
0x17dd   :  { %3646 = vmatpush3.bf16.msra.mxu0 %v5189_v38 }
0x17de   :  { %3647 = vmatprep.subr.bf16.mxu0 %v4222_v1 }
0x17e1   :  { %3648 = vmatpush3.bf16.msra.mxu0 %v5193_v51 }
0x17e2   :  { %3649 = vmatprep.subr.bf16.mxu0 %v4222_v1 }
0x17e5   :  { %3650 = vmatpush3.bf16.msra.mxu0 %v5197_v50 }
0x17e6   :  { %3651 = vmatprep.subr.bf16.mxu0 %v4222_v1 }
0x17e9   :  { %3652 = vmatpush3.bf16.msra.mxu0 %v4872_v54  ;;  %v5205_v54 = vld [vmem:[#allocation13] sm:$0xff]  }
0x17ea   :  { %3653 = vmatprep.subr.bf16.mxu0 %v4222_v1 }
0x17ed   :  { %3654 = vmatpush3.bf16.msra.mxu0 %v4876_v55  ;;  %v5211_v55 = vld [vmem:[#allocation13 + $0x8] sm:$0xff]  }
0x17ee   :  { %3679 = vmatprep.subr.bf16.mxu0 %v4222_v1 }
0x18a3   :  { %v1837_v53 = vpop.f32.mrb[52].mxu0 }
0x18a4   :  { %v1838_v56 = vadd.f32 %v2695_v52, %v1837_v53  ;;  %v3617_v57 = vpop.f32.mrb[53].mxu0  ;;  %v5299_v53 = vld [vmem:[#allocation13 + $0x30] sm:$0xff]  }
0x18a5   :  { %v1840_v58 = vpop.f32.mrb[54].mxu0 }
0x18a6   :  { %v1841_v59 = vadd.f32 %v2695_v52, %v1840_v58  ;;  %v3618_v60 = vpop.f32.mrb[55].mxu0  ;;  %3963 = vtanh.f32 %v1838_v56  ;;  %v5295_v52 = vld [vmem:[#allocation13 + $0x28] sm:$0xff]   ;;  %v5303_v56 = vld [vmem:[#allocation13 + $0x38] sm:$0xff]   ;;  %v2005_v58 = vstv %s2696_s10 }
0x18a7   :  { %v2014_v60 = vld [vmem:[#allocation7 + $0xe0] sm:$0xff] }
0x18a8   :  { %3965 = vtanh.f32 %v1841_v59 }
0x18b0   :  { %v3964_v61 = vpop.eup %3963 }
0x18b2   :  { %v3966_v62 = vpop.eup %3965 }
0x18b3   :  { %v1846_v63 = vpack.c.bf16 %v3966_v62, %v3964_v61  ;;  %v2016_v61 = vstv %s2698_s0  ;;  %v5310_v62 = vld [vmem:[%s5543_s8] ss:$0 sm:$0xff]  ;;  %s2701_s8 = sld [smem:[#allocation2 + $0x2e]] }
0x18b5   :  { %3636 = vmatmul.mubr.bf16.vlgmr.msra.gmra.mrb[52].mxu1 %v1846_v63 }
0x18b6   :  { %3660 = vmatpush3.bf16.msra.mxu1 %v5205_v54  ;;  %3675 = vmatprep.mubr.msk.bf16.mxu1 %vm4223_vm0, %v4222_v1 }
0x18b7   :  { %3661 = vmatprep.subr.bf16.mxu1 %v4222_v1 }
0x18ba   :  { %3662 = vmatpush3.bf16.msra.mxu1 %v5211_v55 }
0x18bb   :  { %3663 = vmatprep.subr.bf16.mxu1 %v4222_v1 }
0x18be   :  { %3664 = vmatpush3.bf16.msra.mxu1 %v5215_v12 }
0x18bf   :  { %3665 = vmatprep.subr.bf16.mxu1 %v4222_v1 }
0x18c2   :  { %3666 = vmatpush3.bf16.msra.mxu1 %v5219_v13 }
0x18c3   :  { %3667 = vmatprep.subr.bf16.mxu1 %v4222_v1 }
0x18c6   :  { %3668 = vmatpush3.bf16.msra.mxu1 %v4890_v15  ;;  %v1891_v15 = vstv %s2693_s28  ;;  %s4175_s28 = scalar_lea.vmem %s2609_s6, 256 }
0x18c7   :  { %3669 = vmatprep.subr.bf16.mxu1 %v4222_v1  ;;  %v1892_v19 = vmul.f32 %v1891_v15, %v5168_v14  ;;  %v1893_v17 = vmul.f32 %v1891_v15, %v5171_v46  ;;  %v2015_v15 = vld [vmem:[#allocation7 + $0xe8] sm:$0xff]  ;;  %p4176_p9 = scmp.ne.s32.totalorder %s2609_s6, %s4175_s28  ;;  %p4181_p11 = scmp.lt.s32.totalorder %s4175_s28, %s4175_s28 }
0x18c9   :  { %p4182_p12 = por %p4181_p11, %p4180_p10 }
0x18ca   :  { %3670 = vmatpush3.bf16.msra.mxu1 %v4894_v21 }
0x18cb   :  { %3671 = vmatprep.subr.bf16.mxu1 %v4222_v1  ;;  %p4183_p13 = pnand %p4182_p12, %p4176_p9 }
0x18ce   :  { %3672 = vmatpush3.bf16.msra.mxu1 %v4898_v23 }
0x18cf   :  { %3673 = vmatprep.subr.bf16.mxu1 %v4222_v1 }
0x18d2   :  { %3674 = vmatpush3.bf16.msra.mxu1 %v4902_v28 }
0x18d3   :  { %3699 = vmatprep.subr.bf16.mxu1 %v4222_v1 }
0x1988   :  { %v1881_v29 = vpop.f32.mrb[52].mxu1 }
0x1989   :  { %v1882_v21 = vadd.f32 %v4909_v34, %v1881_v29  ;;  %v3637_v11 = vpop.f32.mrb[53].mxu1 }
0x198a   :  { %v1884_v18 = vpop.f32.mrb[54].mxu1 }
0x198b   :  { %v1889_v23 = vmul.f32 %v1888_v30, %v1882_v21  ;;  %v1885_v28 = vadd.f32 %v4909_v34, %v1884_v18  ;;  %v3638_v20 = vpop.f32.mrb[55].mxu1  ;;  %v5244_v34 = vld [vmem:[%s5540_s5] sm:$0xff]  ;;  %s2697_s5 = sld [smem:[#allocation2 + $0x2b]]  ;;  %v2017_v21 = vmul.f32 %v2016_v61, %v2014_v60 }
0x198d   :  { %v1894_v33 = vadd.f32 %v1892_v19, %v1889_v23  ;;  %v1890_v35 = vmul.f32 %v1888_v30, %v1885_v28 }
0x198f   :  { %v1902_v36 = vadd.f32 %v1900_v32, %v1894_v33  ;;  %v1895_v37 = vadd.f32 %v1893_v17, %v1890_v35  ;;  %v2018_v32 = vmul.f32 %v2016_v61, %v2015_v15 }
0x1991   :  { %v1904_v40 = vmul.f32 %v5235_v39, %v1902_v36  ;;  %v1903_v24 = vadd.f32 %v1901_v22, %v1895_v37  ;;  %v2008_v59 = vstv %s2697_s5 }
0x1993   :  { %v1905_v2 = vmul.f32 %v5238_v0, %v1903_v24  ;;  %v5247_v25 = vadd.f32 %v5244_v34, %v1904_v40  ;;  %v2703_v40 = vld [vmem:[#allocation9 + $0xf] ss:$0 sm:$0xff] }
0x1995   :  { %v5255_v4 = vadd.f32 %v5252_v3, %v1905_v2  ;;  %v2009_v10 = vmul.f32 %v2008_v59, %v5247_v25 }
0x1997   :  { %v1913_v41 = vpack.c.bf16 %v5255_v4, %v5247_v25  ;;  %v2010_v19 = vmul.f32 %v2008_v59, %v5255_v4  ;;  %v2132_v59 = vld [vmem:[#allocation7 + $0xf8] sm:$0xff] }
0x1999   :  { %3656 = vmatmul.mubr.bf16.vlgmr.msra.gmra.mrb[56].mxu0 %v1913_v41 }
0x199a   :  { %3680 = vmatpush3.bf16.msra.mxu0 %v5175_v49  ;;  %3695 = vmatprep.mubr.msk.bf16.mxu0 %vm4223_vm0, %v4222_v1 }
0x199b   :  { %3681 = vmatprep.subr.bf16.mxu0 %v4222_v1 }
0x199e   :  { %3682 = vmatpush3.bf16.msra.mxu0 %v5181_v45 }
0x199f   :  { %3683 = vmatprep.subr.bf16.mxu0 %v4222_v1 }
0x19a2   :  { %3684 = vmatpush3.bf16.msra.mxu0 %v5185_v48 }
0x19a3   :  { %3685 = vmatprep.subr.bf16.mxu0 %v4222_v1 }
0x19a6   :  { %3686 = vmatpush3.bf16.msra.mxu0 %v5189_v38 }
0x19a7   :  { %3687 = vmatprep.subr.bf16.mxu0 %v4222_v1 }
0x19aa   :  { %3688 = vmatpush3.bf16.msra.mxu0 %v5193_v51 }
0x19ab   :  { %3689 = vmatprep.subr.bf16.mxu0 %v4222_v1 }
0x19ae   :  { %3690 = vmatpush3.bf16.msra.mxu0 %v5197_v50 }
0x19af   :  { %3691 = vmatprep.subr.bf16.mxu0 %v4222_v1 }
0x19b2   :  { %3692 = vmatpush3.bf16.msra.mxu0 %v5273_v26 }
0x19b3   :  { %3693 = vmatprep.subr.bf16.mxu0 %v4222_v1 }
0x19b6   :  { %3694 = vmatpush3.bf16.msra.mxu0 %v5277_v7 }
0x19b7   :  { %3719 = vmatprep.subr.bf16.mxu0 %v4222_v1 }
0x1a6c   :  { %v1954_v27 = vpop.f32.mrb[56].mxu0 }
0x1a6d   :  { %v1955_v9 = vadd.f32 %v2699_v42, %v1954_v27  ;;  %v3657_v43 = vpop.f32.mrb[57].mxu0 }
0x1a6e   :  { %v1957_v44 = vpop.f32.mrb[58].mxu0 }
0x1a6f   :  { %v1958_v5 = vadd.f32 %v2699_v42, %v1957_v44  ;;  %v3658_v6 = vpop.f32.mrb[59].mxu0  ;;  %3967 = vtanh.f32 %v1955_v9 }
0x1a70   :  { %v2125_v6 = vstv %s2701_s8 }
0x1a71   :  { %3969 = vtanh.f32 %v1958_v5  ;;  %v2122_v5 = vstv %s2700_s3 }
0x1a79   :  { %v3968_v8 = vpop.eup %3967 }
0x1a7b   :  { %v3970_v14 = vpop.eup %3969 }
0x1a7c   :  { %v1963_v46 = vpack.c.bf16 %v3970_v14, %v3968_v8  ;;  %v2131_v8 = vld [vmem:[#allocation7 + $0xf0] sm:$0xff]  ;;  %v2133_v14 = vstv %s2702_s27 }
0x1a7e   :  { %3676 = vmatmul.mubr.bf16.vlgmr.msra.gmra.mrb[56].mxu1 %v1963_v46 }
0x1a7f   :  { %3700 = vmatpush3.bf16.msra.mxu1 %v5205_v54  ;;  %3715 = vmatprep.mubr.msk.bf16.mxu1 %vm4223_vm0, %v4222_v1 }
0x1a80   :  { %3701 = vmatprep.subr.bf16.mxu1 %v4222_v1 }
0x1a83   :  { %3702 = vmatpush3.bf16.msra.mxu1 %v5211_v55 }
0x1a84   :  { %3703 = vmatprep.subr.bf16.mxu1 %v4222_v1 }
0x1a87   :  { %3704 = vmatpush3.bf16.msra.mxu1 %v5215_v12 }
0x1a88   :  { %3705 = vmatprep.subr.bf16.mxu1 %v4222_v1 }
0x1a8b   :  { %3706 = vmatpush3.bf16.msra.mxu1 %v5219_v13 }
0x1a8c   :  { %3707 = vmatprep.subr.bf16.mxu1 %v4222_v1 }
0x1a8f   :  { %3708 = vmatpush3.bf16.msra.mxu1 %v5291_v47 }
0x1a90   :  { %3709 = vmatprep.subr.bf16.mxu1 %v4222_v1 }
0x1a93   :  { %3710 = vmatpush3.bf16.msra.mxu1 %v5295_v52 }
0x1a94   :  { %3711 = vmatprep.subr.bf16.mxu1 %v4222_v1 }
0x1a97   :  { %3712 = vmatpush3.bf16.msra.mxu1 %v5299_v53 }
0x1a98   :  { %3713 = vmatprep.subr.bf16.mxu1 %v4222_v1 }
0x1a9b   :  { %3714 = vmatpush3.bf16.msra.mxu1 %v5303_v56 }
0x1a9c   :  { %3739 = vmatprep.subr.bf16.mxu1 %v4222_v1 }
0x1b51   :  { %v1998_v57 = vpop.f32.mrb[56].mxu1 }
0x1b52   :  { %v1999_v63 = vadd.f32 %v5310_v62, %v1998_v57  ;;  %v3677_v29 = vpop.f32.mrb[57].mxu1 }
0x1b53   :  { %v2001_v30 = vpop.f32.mrb[58].mxu1 }
0x1b54   :  { %v2006_v16 = vmul.f32 %v2005_v58, %v1999_v63  ;;  %v2002_v11 = vadd.f32 %v5310_v62, %v2001_v30  ;;  %v3678_v18 = vpop.f32.mrb[59].mxu1  ;;  %v2134_v63 = vmul.f32 %v2133_v14, %v2131_v8 }
0x1b56   :  { %v2011_v31 = vadd.f32 %v2009_v10, %v2006_v16  ;;  %v2007_v23 = vmul.f32 %v2005_v58, %v2002_v11 }
0x1b58   :  { %v2019_v28 = vadd.f32 %v2017_v21, %v2011_v31  ;;  %v2012_v20 = vadd.f32 %v2010_v19, %v2007_v23  ;;  %v2135_v21 = vmul.f32 %v2133_v14, %v2132_v59 }
0x1b5a   :  { %v2021_v33 = vmul.f32 %v5235_v39, %v2019_v28  ;;  %v2020_v35 = vadd.f32 %v2018_v32, %v2012_v20 }
0x1b5c   :  { %v2022_v17 = vmul.f32 %v5238_v0, %v2020_v35  ;;  %v5319_v22 = vadd.f32 %v5244_v34, %v2021_v33  ;;  %v2707_v33 = vld [vmem:[#allocation9 + $0x10] ss:$0 sm:$0xff] }
0x1b5e   :  { %v5322_v36 = vadd.f32 %v5252_v3, %v2022_v17  ;;  %v2126_v61 = vmul.f32 %v2125_v6, %v5319_v22 }
0x1b60   :  { %v2030_v37 = vpack.c.bf16 %v5322_v36, %v5319_v22  ;;  %v2127_v10 = vmul.f32 %v2125_v6, %v5322_v36  ;;  %v2249_v6 = vld [vmem:[#allocation7 + $0x108] sm:$0xff] }
0x1b62   :  { %3696 = vmatmul.mubr.bf16.vlgmr.msra.gmra.mrb[60].mxu0 %v2030_v37 }
0x1b63   :  { %3720 = vmatpush3.bf16.msra.mxu0 %v5175_v49  ;;  %3735 = vmatprep.mubr.msk.bf16.mxu0 %vm4223_vm0, %v4222_v1 }
0x1b64   :  { %3721 = vmatprep.subr.bf16.mxu0 %v4222_v1 }
0x1b67   :  { %3722 = vmatpush3.bf16.msra.mxu0 %v5181_v45 }
0x1b68   :  { %3723 = vmatprep.subr.bf16.mxu0 %v4222_v1 }
0x1b6b   :  { %3724 = vmatpush3.bf16.msra.mxu0 %v5185_v48 }
0x1b6c   :  { %3725 = vmatprep.subr.bf16.mxu0 %v4222_v1 }
0x1b6f   :  { %3726 = vmatpush3.bf16.msra.mxu0 %v5189_v38 }
0x1b70   :  { %3727 = vmatprep.subr.bf16.mxu0 %v4222_v1 }
0x1b73   :  { %3728 = vmatpush3.bf16.msra.mxu0 %v5193_v51 }
0x1b74   :  { %3729 = vmatprep.subr.bf16.mxu0 %v4222_v1 }
0x1b77   :  { %3730 = vmatpush3.bf16.msra.mxu0 %v5197_v50 }
0x1b78   :  { %3731 = vmatprep.subr.bf16.mxu0 %v4222_v1 }
0x1b7b   :  { %3732 = vmatpush3.bf16.msra.mxu0 %v5273_v26 }
0x1b7c   :  { %3733 = vmatprep.subr.bf16.mxu0 %v4222_v1 }
0x1b7f   :  { %3734 = vmatpush3.bf16.msra.mxu0 %v5277_v7 }
0x1b80   :  { %3759 = vmatprep.subr.bf16.mxu0 %v4222_v1 }
0x1c35   :  { %v2071_v24 = vpop.f32.mrb[60].mxu0 }
0x1c36   :  { %v2072_v2 = vadd.f32 %v2703_v40, %v2071_v24  ;;  %v3697_v25 = vpop.f32.mrb[61].mxu0 }
0x1c37   :  { %v2074_v4 = vpop.f32.mrb[62].mxu0 }
0x1c38   :  { %v2075_v41 = vadd.f32 %v2703_v40, %v2074_v4  ;;  %v3698_v42 = vpop.f32.mrb[63].mxu0  ;;  %3971 = vtanh.f32 %v2072_v2 }
0x1c39   :  { %v2242_v42 = vstv %s2705_s16 }
0x1c3a   :  { %3973 = vtanh.f32 %v2075_v41  ;;  %v2239_v41 = vstv %s2704_s17 }
0x1c42   :  { %v3972_v27 = vpop.eup %3971 }
0x1c44   :  { %v3974_v9 = vpop.eup %3973 }
0x1c45   :  { %v2080_v43 = vpack.c.bf16 %v3974_v9, %v3972_v27  ;;  %v2248_v27 = vld [vmem:[#allocation7 + $0x100] sm:$0xff]  ;;  %v2250_v9 = vstv %s2706_s18 }
0x1c47   :  { %3716 = vmatmul.mubr.bf16.vlgmr.msra.gmra.mrb[60].mxu1 %v2080_v43 }
0x1c48   :  { %3740 = vmatpush3.bf16.msra.mxu1 %v5205_v54  ;;  %3755 = vmatprep.mubr.msk.bf16.mxu1 %vm4223_vm0, %v4222_v1 }
0x1c49   :  { %3741 = vmatprep.subr.bf16.mxu1 %v4222_v1 }
0x1c4c   :  { %3742 = vmatpush3.bf16.msra.mxu1 %v5211_v55 }
0x1c4d   :  { %3743 = vmatprep.subr.bf16.mxu1 %v4222_v1 }
0x1c50   :  { %3744 = vmatpush3.bf16.msra.mxu1 %v5215_v12 }
0x1c51   :  { %3745 = vmatprep.subr.bf16.mxu1 %v4222_v1 }
0x1c54   :  { %3746 = vmatpush3.bf16.msra.mxu1 %v5219_v13 }
0x1c55   :  { %3747 = vmatprep.subr.bf16.mxu1 %v4222_v1 }
0x1c58   :  { %3748 = vmatpush3.bf16.msra.mxu1 %v5291_v47 }
0x1c59   :  { %3749 = vmatprep.subr.bf16.mxu1 %v4222_v1 }
0x1c5c   :  { %3750 = vmatpush3.bf16.msra.mxu1 %v5295_v52 }
0x1c5d   :  { %3751 = vmatprep.subr.bf16.mxu1 %v4222_v1 }
0x1c60   :  { %3752 = vmatpush3.bf16.msra.mxu1 %v5299_v53 }
0x1c61   :  { %3753 = vmatprep.subr.bf16.mxu1 %v4222_v1 }
0x1c64   :  { %3754 = vmatpush3.bf16.msra.mxu1 %v5303_v56 }
0x1c65   :  { %3779 = vmatprep.subr.bf16.mxu1 %v4222_v1 }
0x1d1a   :  { %v2115_v44 = vpop.f32.mrb[60].mxu1 }
0x1d1b   :  { %v2116_v46 = vadd.f32 %v5310_v62, %v2115_v44  ;;  %v3717_v57 = vpop.f32.mrb[61].mxu1 }
0x1d1c   :  { %v2118_v58 = vpop.f32.mrb[62].mxu1 }
0x1d1d   :  { %v2123_v60 = vmul.f32 %v2122_v5, %v2116_v46  ;;  %v2119_v29 = vadd.f32 %v5310_v62, %v2118_v58  ;;  %v3718_v30 = vpop.f32.mrb[63].mxu1  ;;  %v2251_v46 = vmul.f32 %v2250_v9, %v2248_v27 }
0x1d1f   :  { %v2128_v15 = vadd.f32 %v2126_v61, %v2123_v60  ;;  %v2124_v16 = vmul.f32 %v2122_v5, %v2119_v29 }
0x1d21   :  { %v2136_v11 = vadd.f32 %v2134_v63, %v2128_v15  ;;  %v2129_v18 = vadd.f32 %v2127_v10, %v2124_v16  ;;  %v2252_v63 = vmul.f32 %v2250_v9, %v2249_v6 }
0x1d23   :  { %v2138_v31 = vmul.f32 %v5235_v39, %v2136_v11  ;;  %v2137_v23 = vadd.f32 %v2135_v21, %v2129_v18 }
0x1d25   :  { %v2139_v19 = vmul.f32 %v5238_v0, %v2137_v23  ;;  %v5369_v32 = vadd.f32 %v5244_v34, %v2138_v31  ;;  %v2711_v31 = vld [vmem:[#allocation9 + $0x11] ss:$0 sm:$0xff] }
0x1d27   :  { %v5372_v28 = vadd.f32 %v5252_v3, %v2139_v19  ;;  %v2243_v14 = vmul.f32 %v2242_v42, %v5369_v32 }
0x1d29   :  { %v2147_v20 = vpack.c.bf16 %v5372_v28, %v5369_v32  ;;  %v2244_v61 = vmul.f32 %v2242_v42, %v5372_v28  ;;  %v2366_v42 = vld [vmem:[#allocation7 + $0x118] sm:$0xff] }
0x1d2b   :  { %3736 = vmatmul.mubr.bf16.vlgmr.msra.gmra.mrb[64].mxu0 %v2147_v20 }
0x1d2c   :  { %3760 = vmatpush3.bf16.msra.mxu0 %v5175_v49  ;;  %3775 = vmatprep.mubr.msk.bf16.mxu0 %vm4223_vm0, %v4222_v1 }
0x1d2d   :  { %3761 = vmatprep.subr.bf16.mxu0 %v4222_v1 }
0x1d30   :  { %3762 = vmatpush3.bf16.msra.mxu0 %v5181_v45 }
0x1d31   :  { %3763 = vmatprep.subr.bf16.mxu0 %v4222_v1 }
0x1d34   :  { %3764 = vmatpush3.bf16.msra.mxu0 %v5185_v48 }
0x1d35   :  { %3765 = vmatprep.subr.bf16.mxu0 %v4222_v1 }
0x1d38   :  { %3766 = vmatpush3.bf16.msra.mxu0 %v5189_v38 }
0x1d39   :  { %3767 = vmatprep.subr.bf16.mxu0 %v4222_v1 }
0x1d3c   :  { %3768 = vmatpush3.bf16.msra.mxu0 %v5193_v51 }
0x1d3d   :  { %3769 = vmatprep.subr.bf16.mxu0 %v4222_v1 }
0x1d40   :  { %3770 = vmatpush3.bf16.msra.mxu0 %v5197_v50 }
0x1d41   :  { %3771 = vmatprep.subr.bf16.mxu0 %v4222_v1 }
0x1d44   :  { %3772 = vmatpush3.bf16.msra.mxu0 %v5273_v26 }
0x1d45   :  { %3773 = vmatprep.subr.bf16.mxu0 %v4222_v1 }
0x1d48   :  { %3774 = vmatpush3.bf16.msra.mxu0 %v5277_v7 }
0x1d49   :  { %3799 = vmatprep.subr.bf16.mxu0 %v4222_v1 }
0x1dfe   :  { %v2188_v35 = vpop.f32.mrb[64].mxu0 }
0x1dff   :  { %v2189_v17 = vadd.f32 %v2707_v33, %v2188_v35  ;;  %v3737_v22 = vpop.f32.mrb[65].mxu0 }
0x1e00   :  { %v2191_v36 = vpop.f32.mrb[66].mxu0 }
0x1e01   :  { %v2192_v37 = vadd.f32 %v2707_v33, %v2191_v36  ;;  %v3738_v40 = vpop.f32.mrb[67].mxu0  ;;  %3975 = vtanh.f32 %v2189_v17 }
0x1e02   :  { %v2359_v40 = vstv %s2709_s19 }
0x1e03   :  { %3977 = vtanh.f32 %v2192_v37  ;;  %v2356_v37 = vstv %s2708_s20 }
0x1e0b   :  { %v3976_v24 = vpop.eup %3975 }
0x1e0d   :  { %v3978_v2 = vpop.eup %3977 }
0x1e0e   :  { %v2197_v25 = vpack.c.bf16 %v3978_v2, %v3976_v24  ;;  %v2365_v24 = vld [vmem:[#allocation7 + $0x110] sm:$0xff]  ;;  %v2367_v2 = vstv %s2710_s23 }
0x1e10   :  { %3756 = vmatmul.mubr.bf16.vlgmr.msra.gmra.mrb[64].mxu1 %v2197_v25 }
0x1e11   :  { %3780 = vmatpush3.bf16.msra.mxu1 %v5205_v54  ;;  %3795 = vmatprep.mubr.msk.bf16.mxu1 %vm4223_vm0, %v4222_v1 }
0x1e12   :  { %3781 = vmatprep.subr.bf16.mxu1 %v4222_v1 }
0x1e15   :  { %3782 = vmatpush3.bf16.msra.mxu1 %v5211_v55 }
0x1e16   :  { %3783 = vmatprep.subr.bf16.mxu1 %v4222_v1 }
0x1e19   :  { %3784 = vmatpush3.bf16.msra.mxu1 %v5215_v12 }
0x1e1a   :  { %3785 = vmatprep.subr.bf16.mxu1 %v4222_v1 }
0x1e1d   :  { %3786 = vmatpush3.bf16.msra.mxu1 %v5219_v13 }
0x1e1e   :  { %3787 = vmatprep.subr.bf16.mxu1 %v4222_v1 }
0x1e21   :  { %3788 = vmatpush3.bf16.msra.mxu1 %v5291_v47 }
0x1e22   :  { %3789 = vmatprep.subr.bf16.mxu1 %v4222_v1 }
0x1e25   :  { %3790 = vmatpush3.bf16.msra.mxu1 %v5295_v52 }
0x1e26   :  { %3791 = vmatprep.subr.bf16.mxu1 %v4222_v1 }
0x1e29   :  { %3792 = vmatpush3.bf16.msra.mxu1 %v5299_v53 }
0x1e2a   :  { %3793 = vmatprep.subr.bf16.mxu1 %v4222_v1 }
0x1e2d   :  { %3794 = vmatpush3.bf16.msra.mxu1 %v5303_v56 }
0x1e2e   :  { %3819 = vmatprep.subr.bf16.mxu1 %v4222_v1 }
0x1ee3   :  { %v2232_v4 = vpop.f32.mrb[64].mxu1 }
0x1ee4   :  { %v2233_v43 = vadd.f32 %v5310_v62, %v2232_v4  ;;  %v3757_v44 = vpop.f32.mrb[65].mxu1 }
0x1ee5   :  { %v2235_v5 = vpop.f32.mrb[66].mxu1 }
0x1ee6   :  { %v2240_v8 = vmul.f32 %v2239_v41, %v2233_v43  ;;  %v2236_v57 = vadd.f32 %v5310_v62, %v2235_v5  ;;  %v3758_v58 = vpop.f32.mrb[67].mxu1  ;;  %v2368_v43 = vmul.f32 %v2367_v2, %v2365_v24  ;;  %v2718_v24 = vld [vmem:[#allocation9 + $0x13] ss:$0 sm:$0xff] }
0x1ee8   :  { %v2245_v59 = vadd.f32 %v2243_v14, %v2240_v8  ;;  %v2241_v60 = vmul.f32 %v2239_v41, %v2236_v57 }
0x1eea   :  { %v2253_v29 = vadd.f32 %v2251_v46, %v2245_v59  ;;  %v2246_v30 = vadd.f32 %v2244_v61, %v2241_v60  ;;  %v2369_v46 = vmul.f32 %v2367_v2, %v2366_v42 }
0x1eec   :  { %v2255_v15 = vmul.f32 %v5235_v39, %v2253_v29  ;;  %v2254_v16 = vadd.f32 %v2252_v63, %v2246_v30 }
0x1eee   :  { %v2256_v10 = vmul.f32 %v5238_v0, %v2254_v16  ;;  %v5419_v21 = vadd.f32 %v5244_v34, %v2255_v15 }
0x1ef0   :  { %v5422_v11 = vadd.f32 %v5252_v3, %v2256_v10  ;;  %v2360_v9 = vmul.f32 %v2359_v40, %v5419_v21 }
0x1ef2   :  { %v2264_v18 = vpack.c.bf16 %v5422_v11, %v5419_v21  ;;  %v2361_v14 = vmul.f32 %v2359_v40, %v5422_v11  ;;  %v2483_v11 = vld [vmem:[#allocation7 + $0x128] sm:$0xff] }
0x1ef4   :  { %3776 = vmatmul.mubr.bf16.vlgmr.msra.gmra.mrb[68].mxu0 %v2264_v18 }
0x1ef5   :  { %3800 = vmatpush3.bf16.msra.mxu0 %v5175_v49  ;;  %3815 = vmatprep.mubr.msk.bf16.mxu0 %vm4223_vm0, %v4222_v1 }
0x1ef6   :  { %3801 = vmatprep.subr.bf16.mxu0 %v4222_v1 }
0x1ef9   :  { %3802 = vmatpush3.bf16.msra.mxu0 %v5181_v45 }
0x1efa   :  { %3803 = vmatprep.subr.bf16.mxu0 %v4222_v1 }
0x1efd   :  { %3804 = vmatpush3.bf16.msra.mxu0 %v5185_v48 }
0x1efe   :  { %3805 = vmatprep.subr.bf16.mxu0 %v4222_v1 }
0x1f01   :  { %3806 = vmatpush3.bf16.msra.mxu0 %v5189_v38 }
0x1f02   :  { %3807 = vmatprep.subr.bf16.mxu0 %v4222_v1 }
0x1f05   :  { %3808 = vmatpush3.bf16.msra.mxu0 %v5193_v51 }
0x1f06   :  { %3809 = vmatprep.subr.bf16.mxu0 %v4222_v1 }
0x1f09   :  { %3810 = vmatpush3.bf16.msra.mxu0 %v5197_v50 }
0x1f0a   :  { %3811 = vmatprep.subr.bf16.mxu0 %v4222_v1 }
0x1f0d   :  { %3812 = vmatpush3.bf16.msra.mxu0 %v5273_v26 }
0x1f0e   :  { %3813 = vmatprep.subr.bf16.mxu0 %v4222_v1 }
0x1f11   :  { %3814 = vmatpush3.bf16.msra.mxu0 %v5277_v7 }
0x1f12   :  { %3839 = vmatprep.subr.bf16.mxu0 %v4222_v1 }
0x1fc7   :  { %v2305_v23 = vpop.f32.mrb[68].mxu0 }
0x1fc8   :  { %v2306_v19 = vadd.f32 %v2711_v31, %v2305_v23  ;;  %v3777_v32 = vpop.f32.mrb[69].mxu0 }
0x1fc9   :  { %v2308_v28 = vpop.f32.mrb[70].mxu0 }
0x1fca   :  { %v2309_v20 = vadd.f32 %v2711_v31, %v2308_v28  ;;  %v3778_v33 = vpop.f32.mrb[71].mxu0  ;;  %3979 = vtanh.f32 %v2306_v19 }
0x1fcc   :  { %3981 = vtanh.f32 %v2309_v20 }
0x1fd4   :  { %v3980_v35 = vpop.eup %3979 }
0x1fd6   :  { %v3982_v17 = vpop.eup %3981 }
0x1fd7   :  { %v2314_v22 = vpack.c.bf16 %v3982_v17, %v3980_v35 }
0x1fd9   :  { %3796 = vmatmul.mubr.bf16.vlgmr.msra.gmra.mrb[68].mxu1 %v2314_v22 }
0x1fda   :  { %3820 = vmatpush3.bf16.msra.mxu1 %v5205_v54  ;;  %3835 = vmatprep.mubr.msk.bf16.mxu1 %vm4223_vm0, %v4222_v1 }
0x1fdb   :  { %3821 = vmatprep.subr.bf16.mxu1 %v4222_v1 }
0x1fde   :  { %3822 = vmatpush3.bf16.msra.mxu1 %v5211_v55 }
0x1fdf   :  { %3823 = vmatprep.subr.bf16.mxu1 %v4222_v1 }
0x1fe2   :  { %3824 = vmatpush3.bf16.msra.mxu1 %v5215_v12 }
0x1fe3   :  { %3825 = vmatprep.subr.bf16.mxu1 %v4222_v1 }
0x1fe6   :  { %3826 = vmatpush3.bf16.msra.mxu1 %v5219_v13 }
0x1fe7   :  { %3827 = vmatprep.subr.bf16.mxu1 %v4222_v1 }
0x1fea   :  { %3828 = vmatpush3.bf16.msra.mxu1 %v5291_v47 }
0x1feb   :  { %3829 = vmatprep.subr.bf16.mxu1 %v4222_v1 }
0x1fee   :  { %3830 = vmatpush3.bf16.msra.mxu1 %v5295_v52 }
0x1fef   :  { %3831 = vmatprep.subr.bf16.mxu1 %v4222_v1 }
0x1ff2   :  { %3832 = vmatpush3.bf16.msra.mxu1 %v5299_v53 }
0x1ff3   :  { %3833 = vmatprep.subr.bf16.mxu1 %v4222_v1 }
0x1ff6   :  { %3834 = vmatpush3.bf16.msra.mxu1 %v5303_v56 }
0x1ff7   :  { %3859 = vmatprep.subr.bf16.mxu1 %v4222_v1 }
0x20ac   :  { %v2349_v36 = vpop.f32.mrb[68].mxu1 }
0x20ad   :  { %v2350_v25 = vadd.f32 %v5310_v62, %v2349_v36  ;;  %v3797_v4 = vpop.f32.mrb[69].mxu1 }
0x20ae   :  { %v2352_v41 = vpop.f32.mrb[70].mxu1 }
0x20af   :  { %v2357_v27 = vmul.f32 %v2356_v37, %v2350_v25  ;;  %v2353_v44 = vadd.f32 %v5310_v62, %v2352_v41  ;;  %v3798_v5 = vpop.f32.mrb[71].mxu1 }
0x20b1   :  { %v2362_v6 = vadd.f32 %v2360_v9, %v2357_v27  ;;  %v2358_v8 = vmul.f32 %v2356_v37, %v2353_v44 }
0x20b3   :  { %v2370_v57 = vadd.f32 %v2368_v43, %v2362_v6  ;;  %v2363_v58 = vadd.f32 %v2361_v14, %v2358_v8  ;;  %v2589_v6 = vstv %s2716_s4  ;;  %v2592_v8 = vstv %s2717_s12 }
0x20b5   :  { %v2372_v59 = vmul.f32 %v5235_v39, %v2370_v57  ;;  %v2371_v60 = vadd.f32 %v2369_v46, %v2363_v58 }
0x20b7   :  { %v2373_v61 = vmul.f32 %v5238_v0, %v2371_v60  ;;  %v2374_v63 = vadd.f32 %v5244_v34, %v2372_v59 }
0x20b9   :  { %v5470_v29 = vadd.f32 %v5252_v3, %v2373_v61 }
0x20bb   :  { %v2381_v30 = vpack.c.bf16 %v5470_v29, %v2374_v63 }
0x20bd   :  { %3816 = vmatmul.mubr.bf16.vlgmr.msra.gmra.mrb[72].mxu0 %v2381_v30 }
0x20be   :  { %3840 = vmatpush3.bf16.msra.mxu0 %v5175_v49  ;;  %3855 = vmatprep.mubr.msk.bf16.mxu0 %vm4223_vm0, %v4222_v1  ;;  %v2715_v49 = vld [vmem:[#allocation9 + $0x12] ss:$0 sm:$0xff] }
0x20bf   :  { %3841 = vmatprep.subr.bf16.mxu0 %v4222_v1 }
0x20c2   :  { %3842 = vmatpush3.bf16.msra.mxu0 %v5181_v45 }
0x20c3   :  { %3843 = vmatprep.subr.bf16.mxu0 %v4222_v1 }
0x20c6   :  { %3844 = vmatpush3.bf16.msra.mxu0 %v5185_v48 }
0x20c7   :  { %3845 = vmatprep.subr.bf16.mxu0 %v4222_v1 }
0x20ca   :  { %3846 = vmatpush3.bf16.msra.mxu0 %v5189_v38 }
0x20cb   :  { %3847 = vmatprep.subr.bf16.mxu0 %v4222_v1 }
0x20ce   :  { %3848 = vmatpush3.bf16.msra.mxu0 %v5193_v51 }
0x20cf   :  { %3849 = vmatprep.subr.bf16.mxu0 %v4222_v1 }
0x20d2   :  { %3850 = vmatpush3.bf16.msra.mxu0 %v5197_v50 }
0x20d3   :  { %3851 = vmatprep.subr.bf16.mxu0 %v4222_v1 }
0x20d6   :  { %3852 = vmatpush3.bf16.msra.mxu0 %v5273_v26  ;;  %v2484_v26 = vstv %s2714_s1 }
0x20d7   :  { %3853 = vmatprep.subr.bf16.mxu0 %v4222_v1  ;;  %v2486_v28 = vmul.f32 %v2484_v26, %v2483_v11 }
0x20da   :  { %3854 = vmatpush3.bf16.msra.mxu0 %v5277_v7 }
0x2190   :  { %v2422_v45 = vpop.f32.mrb[72].mxu0 }
0x2191   :  { %v2423_v48 = vadd.f32 %v2715_v49, %v2422_v45  ;;  %v3817_v38 = vpop.f32.mrb[73].mxu0 }
0x2192   :  { %v2425_v15 = vpop.f32.mrb[74].mxu0 }
0x2193   :  { %v2426_v16 = vadd.f32 %v2715_v49, %v2425_v15  ;;  %v3818_v10 = vpop.f32.mrb[75].mxu0  ;;  %3983 = vtanh.f32 %v2423_v48 }
0x2195   :  { %3985 = vtanh.f32 %v2426_v16 }
0x219d   :  { %v3984_v51 = vpop.eup %3983 }
0x219f   :  { %v3986_v21 = vpop.eup %3985 }
0x21a0   :  { %v2431_v50 = vpack.c.bf16 %v3986_v21, %v3984_v51 }
0x21a2   :  { %3836 = vmatmul.mubr.bf16.vlgmr.msra.gmra.mrb[72].mxu1 %v2431_v50 }
0x21a3   :  { %3860 = vmatpush3.bf16.msra.mxu1 %v5205_v54  ;;  %3875 = vmatprep.mubr.msk.bf16.mxu1 %vm4223_vm0, %v4222_v1 }
0x21a4   :  { %3861 = vmatprep.subr.bf16.mxu1 %v4222_v1 }
0x21a7   :  { %3862 = vmatpush3.bf16.msra.mxu1 %v5211_v55  ;;  %v2473_v55 = vstv %s2712_s25 }
0x21a8   :  { %3863 = vmatprep.subr.bf16.mxu1 %v4222_v1 }
0x21ab   :  { %3864 = vmatpush3.bf16.msra.mxu1 %v5215_v12  ;;  %v2476_v12 = vstv %s2713_s24 }
0x21ac   :  { %3865 = vmatprep.subr.bf16.mxu1 %v4222_v1  ;;  %v2477_v31 = vmul.f32 %v2476_v12, %v2374_v63  ;;  %v2478_v32 = vmul.f32 %v2476_v12, %v5470_v29 }
0x21af   :  { %3866 = vmatpush3.bf16.msra.mxu1 %v5219_v13  ;;  %v2482_v13 = vld [vmem:[#allocation7 + $0x120] sm:$0xff] }
0x21b0   :  { %3867 = vmatprep.subr.bf16.mxu1 %v4222_v1 }
0x21b3   :  { %3868 = vmatpush3.bf16.msra.mxu1 %v5291_v47 }
0x21b4   :  { %3869 = vmatprep.subr.bf16.mxu1 %v4222_v1 }
0x21b7   :  { %3870 = vmatpush3.bf16.msra.mxu1 %v5295_v52 }
0x21b8   :  { %3871 = vmatprep.subr.bf16.mxu1 %v4222_v1 }
0x21bb   :  { %3872 = vmatpush3.bf16.msra.mxu1 %v5299_v53  ;;  %v2485_v53 = vmul.f32 %v2484_v26, %v2482_v13 }
0x21bc   :  { %3873 = vmatprep.subr.bf16.mxu1 %v4222_v1 }
0x21bf   :  { %3874 = vmatpush3.bf16.msra.mxu1 %v5303_v56 }
0x2275   :  { %v2466_v54 = vpop.f32.mrb[72].mxu1 }
0x2276   :  { %v2467_v7 = vadd.f32 %v5310_v62, %v2466_v54  ;;  %v3837_v47 = vpop.f32.mrb[73].mxu1 }
0x2277   :  { %v2469_v52 = vpop.f32.mrb[74].mxu1 }
0x2278   :  { %v2474_v18 = vmul.f32 %v2473_v55, %v2467_v7  ;;  %v2470_v1 = vadd.f32 %v5310_v62, %v2469_v52  ;;  %v3838_v23 = vpop.f32.mrb[75].mxu1 }
0x227a   :  { %v2479_v56 = vadd.f32 %v2477_v31, %v2474_v18  ;;  %v2475_v19 = vmul.f32 %v2473_v55, %v2470_v1 }
0x227c   :  { %v2487_v20 = vadd.f32 %v2485_v53, %v2479_v56  ;;  %v2480_v33 = vadd.f32 %v2478_v32, %v2475_v19 }
0x227e   :  { %v2489_v35 = vmul.f32 %v5235_v39, %v2487_v20  ;;  %v2488_v17 = vadd.f32 %v2486_v28, %v2480_v33 }
0x2280   :  { %v2490_v22 = vmul.f32 %v5238_v0, %v2488_v17  ;;  %v2491_v36 = vadd.f32 %v5244_v34, %v2489_v35 }
0x2282   :  { %v2492_v37 = vadd.f32 %v5252_v3, %v2490_v22  ;;  %v2593_v59 = vmul.f32 %v2592_v8, %v2491_v36 }
0x2284   :  { %v2497_v40 = vpack.c.bf16 %v2492_v37, %v2491_v36  ;;  %v2594_v30 = vmul.f32 %v2592_v8, %v2492_v37 }
0x2286   :  { %3856 = vmatmul.mubr.bf16.vlgmr.msra.gmra.mrb[76].mxu0 %v2497_v40 }
0x2359   :  { %v2538_v2 = vpop.f32.mrb[76].mxu0 }
0x235a   :  { %v2539_v25 = vadd.f32 %v2718_v24, %v2538_v2  ;;  %v3857_v4 = vpop.f32.mrb[77].mxu0 }
0x235b   :  { %v2541_v41 = vpop.f32.mrb[78].mxu0 }
0x235c   :  { %v2542_v42 = vadd.f32 %v2718_v24, %v2541_v41  ;;  %v3858_v27 = vpop.f32.mrb[79].mxu0  ;;  %3987 = vtanh.f32 %v2539_v25 }
0x235e   :  { %3989 = vtanh.f32 %v2542_v42 }
0x2366   :  { %v3988_v9 = vpop.eup %3987 }
0x2368   :  { %v3990_v43 = vpop.eup %3989 }
0x2369   :  { %v2547_v44 = vpack.c.bf16 %v3990_v43, %v3988_v9 }
0x236b   :  { %3876 = vmatmul.mubr.bf16.vlgmr.msra.gmra.mrb[76].mxu1 %v2547_v44 }
0x243e   :  { %v2582_v5 = vpop.f32.mrb[76].mxu1 }
0x243f   :  { %v2583_v14 = vadd.f32 %v5310_v62, %v2582_v5  ;;  %v3877_v46 = vpop.f32.mrb[77].mxu1 }
0x2440   :  { %v2585_v57 = vpop.f32.mrb[78].mxu1 }
0x2441   :  { %v2590_v58 = vmul.f32 %v2589_v6, %v2583_v14  ;;  %v2586_v60 = vadd.f32 %v5310_v62, %v2585_v57  ;;  %v3878_v61 = vpop.f32.mrb[79].mxu1 }
0x2443   :  { %v2595_v63 = vadd.f32 %v2593_v59, %v2590_v58  ;;  %v2591_v29 = vmul.f32 %v2589_v6, %v2586_v60 }
0x2445   :  { %v2596_v49 = vadd.f32 %v2594_v30, %v2591_v29  ;;  %v2597_v45 = vmul.f32 %v5235_v39, %v2595_v63 }
0x2447   :  { %v2598_v48 = vmul.f32 %v5238_v0, %v2596_v49  ;;  %v2599_v38 = vadd.f32 %v5244_v34, %v2597_v45 }
0x2449   :  { %v2600_v15 = vadd.f32 %v5252_v3, %v2598_v48  ;;  %2601 = vst [vmem:[#allocation15] sm:$0xff] %v2599_v38 }
0x244b   :  { %2602 = vst [vmem:[#allocation15 + $0x8] sm:$0xff] %v2600_v15 }
0x244c   :  { %4186 = shalt.err (!%p4183_p13)
}
0x244d   :  { %s4187_s30 = scalar_lea.hbm %s5544_s9, 256 }
0x244e   :  { %p4188_p0 = scmp.ne.s32.totalorder %s5544_s9, %s4187_s30  ;;  %p4191_p1 = scmp.lt.u32.totalorder %s4187_s30, %s5544_s9 }
0x2450   :  { %p4193_p2 = pnand %p4191_p1, %p4188_p0 }
0x2452   :  { %4196 = shalt.err (!%p4193_p2)
}
0x2453   :  { %2614 = dma.vmem_to_hbm [thread:$0]  %s2609_s6, 256, %s5544_s9, [#allocation4], %s4211_s21, %s4211_s21, %s4212_s22  }
0x2454   :  { %4207 = dma.done.wait [#allocation4], 256  }
0x2455   :  { %4208 = vsyncadd [#allocation4], 4294967040 }
0x2456   :  { %2618 = vsyncpa [#allocation3], 1 }
0x2457   :  { %2619 = vsyncpa [#allocation8], 1 }
0x2458   :  { %2620 = vsyncpa [#allocation11], 1 }
0x2459   :  { %2621 = vsyncpa [#allocation14], 1 }
0x245a   :  { %2622 = vsyncpa [#allocation4], 1 }
0x245b   :  { %2623 = vsyncpa [#allocation5], 1 }

</bundles_post_ra>
